<compile_context>
chip_gen: v7x
topology: tpu7x:2x2x1
jax: 0.10.0
libtpu: 0.0.40
codegen_flags: <defaults>
</compile_context>

<pallas_src>
import functools
import math

import jax
import jax.numpy as jnp
from jax.experimental import pallas as pl
from jax.experimental.pallas import tpu as pltpu


def _cdiv(a, b):
    return -(-a // b)


def _round_up(a, b):
    return _cdiv(a, b) * b


def _gelu(h, approx):
    if approx:
        # tanh-approx GELU: tanh routes to the EUP slot (separate VLIW slot),
        # relieving the VALU when the MXU is the intended bottleneck.
        c = jnp.float32(0.7978845608028654)  # sqrt(2/pi)
        return 0.5 * h * (1.0 + jnp.tanh(c * (h + jnp.float32(0.044715) * h * h * h)))
    # Exact erf GELU — matches torch.nn.GELU() default.
    return 0.5 * h * (1.0 + jax.lax.erf(h * jnp.float32(1.0 / math.sqrt(2.0))))


def _mlp_kernel_resident(x_ref, w1_ref, b1_ref, w2_ref, b2_ref, o_ref, *, approx):
    """Weight-resident path: grid = (M tiles,), whole H in VMEM, fully fused."""
    x = x_ref[...]                                               # (TM, D_in)
    h = jnp.dot(x, w1_ref[...], preferred_element_type=jnp.float32) + b1_ref[...]
    h = _gelu(h, approx)
    # Dropout(p=0.0) is identity — nothing to do.
    y = jnp.dot(h.astype(w2_ref.dtype), w2_ref[...],
                preferred_element_type=jnp.float32)
    o_ref[...] = (y + b2_ref[...]).astype(o_ref.dtype)


def _mlp_kernel_chunked(x_ref, w1_ref, b1_ref, w2_ref, b2_ref, o_ref, acc_ref, *, approx):
    """H-chunked path: grid = (M tiles, H chunks); accumulate fc2 over the last axis."""
    k = pl.program_id(1)
    nk = pl.num_programs(1)

    @pl.when(k == 0)
    def _():
        acc_ref[...] = jnp.zeros_like(acc_ref)

    x = x_ref[...]
    h = jnp.dot(x, w1_ref[...], preferred_element_type=jnp.float32) + b1_ref[...]
    h = _gelu(h, approx)
    acc_ref[...] += jnp.dot(h.astype(w2_ref.dtype), w2_ref[...],
                            preferred_element_type=jnp.float32)

    @pl.when(k == nk - 1)
    def _():
        o_ref[...] = (acc_ref[...] + b2_ref[...]).astype(o_ref.dtype)


def _vmem_cap_bytes():
    try:
        phys = int(pltpu.get_tpu_info().vmem_capacity_bytes)
    except Exception:
        phys = 64 << 20  # assume the smallest generation (v7x) if the query fails
    # ~80% of physical: ~102 MiB on v5e/v6e (128 MiB), ~51 MiB on v7x (64 MiB).
    return max(phys * 4 // 5, 16 << 20)


def _footprint_bytes(tile_m, tile_h, d_in, d_out, xb, wb, ob, chunked):
    """Real per-buffer VMEM footprint (double-buffered where Pallas double-buffers)."""
    f = 2 * tile_m * d_in * xb              # x tile (double-buffered)
    f += 2 * d_in * tile_h * wb             # w1 block (2 bufs; fetched once if index const)
    f += 2 * 8 * max(tile_h, 128) * 4       # b1 (f32, sublane/lane padded)
    f += 2 * tile_h * d_out * wb            # w2 block
    f += 2 * 8 * max(d_out, 128) * 4        # b2 (f32)
    f += 2 * tile_m * d_out * ob            # out tile (double-buffered)
    if chunked:
        f += tile_m * d_out * 4             # f32 accumulator scratch
    return f


def mlp_pallas(x, w1, b1, w2, b2, *, tile_m=None, tile_h=None, approx_gelu=None):
    """Fused ViT MLP.  x: (B, N, D_in); w1: (D_in, H); b1: (H,); w2: (H, D_out); b2: (D_out,)."""
    B, N, D_in = x.shape
    H = w1.shape[1]
    D_out = w2.shape[1]
    M = B * N

    xb = jnp.dtype(x.dtype).itemsize
    wb = jnp.dtype(w1.dtype).itemsize
    ob = xb

    if approx_gelu is None:
        # bf16/fp16 path: tanh GELU (EUP), error < bf16 rounding.  f32 path: exact erf.
        approx_gelu = jnp.dtype(x.dtype).itemsize < 4

    cap = _vmem_cap_bytes()
    headroom = 4 << 20

    # ---- tile_m: big for MXU fill / per-step-overhead amortization, but keep
    # >= 2 tiles on the "parallel" axis so v7x's two TensorCores both get work.
    if tile_m is None:
        tile_m = 512
        while tile_m > 8 and _cdiv(M, tile_m) < 2:
            tile_m //= 2
    tile_m = max(8, (tile_m // 8) * 8)

    # ---- tile_h: prefer the weight-resident configuration (tile_h == H, single
    # reduction step, constant w1/w2 index maps -> fetched once).  Otherwise the
    # largest 256-aligned chunk that fits; shrink tile_m before giving up.
    def fits(tm, th, chunked):
        return _footprint_bytes(tm, th, D_in, D_out, xb, wb, ob, chunked) + headroom <= cap

    if tile_h is None:
        while True:
            if fits(tile_m, H, chunked=False):
                tile_h = H
                break
            th = (H // 256) * 256
            while th > 256 and not fits(tile_m, th, chunked=True):
                th -= 256
            if th >= 256 and fits(tile_m, th, chunked=True):
                tile_h = th
                break
            if tile_m <= 64:
                tile_h = max(256, th)
                break
            tile_m = max(64, (tile_m // 2 // 8) * 8)
    else:
        tile_h = min(tile_h, H)
        if tile_h != H:
            tile_h = max(128, (tile_h // 128) * 128)

    resident = tile_h >= H
    tile_h = H if resident else tile_h
    H_pad = H if resident else _round_up(H, tile_h)

    x2d = x.reshape(M, D_in)                 # ragged M handled by cdiv grid (masked last tile)
    b1r = b1.astype(jnp.float32).reshape(1, H)
    b2r = b2.astype(jnp.float32).reshape(1, D_out)
    if H_pad != H:
        # Zero-padded H tail: zero w1 cols + zero b1 -> gelu(0) == 0 hits zero w2 rows -> 0.
        w1 = jnp.pad(w1, ((0, 0), (0, H_pad - H)))
        b1r = jnp.pad(b1r, ((0, 0), (0, H_pad - H)))
        w2 = jnp.pad(w2, ((0, H_pad - H), (0, 0)))

    grid_m = _cdiv(M, tile_m)
    footprint = _footprint_bytes(tile_m, tile_h, D_in, D_out, xb, wb, ob, not resident)
    vmem_limit = int(min(cap, max(footprint + headroom, 16 << 20)))

    if resident:
        kernel = functools.partial(_mlp_kernel_resident, approx=approx_gelu)
        grid = (grid_m,)
        in_specs = [
            pl.BlockSpec((tile_m, D_in), lambda i: (i, 0)),        # x rows
            # TODO(synk): pipeline_mode=pl.Buffered(1) on these constant-index blocks
            # would halve their VMEM; left at the default double-buffer for portability
            # (the budget above already counts 2 buffers, so residency stays safe).
            pl.BlockSpec((D_in, H), lambda i: (0, 0)),             # w1 (resident)
            pl.BlockSpec((1, H), lambda i: (0, 0)),                # b1
            pl.BlockSpec((H, D_out), lambda i: (0, 0)),            # w2 (resident)
            pl.BlockSpec((1, D_out), lambda i: (0, 0)),            # b2
        ]
        out_specs = pl.BlockSpec((tile_m, D_out), lambda i: (i, 0))
        scratch_shapes = []
        dim_sem = ("parallel",)
    else:
        kernel = functools.partial(_mlp_kernel_chunked, approx=approx_gelu)
        grid = (grid_m, H_pad // tile_h)
        in_specs = [
            pl.BlockSpec((tile_m, D_in), lambda i, k: (i, 0)),     # x rows
            pl.BlockSpec((D_in, tile_h), lambda i, k: (0, k)),     # w1 chunk
            pl.BlockSpec((1, tile_h), lambda i, k: (0, k)),        # b1 chunk
            pl.BlockSpec((tile_h, D_out), lambda i, k: (k, 0)),    # w2 chunk
            pl.BlockSpec((1, D_out), lambda i, k: (0, 0)),         # b2
        ]
        out_specs = pl.BlockSpec((tile_m, D_out), lambda i, k: (i, 0))
        scratch_shapes = [pltpu.VMEM((tile_m, D_out), jnp.float32)]
        dim_sem = ("parallel", "arbitrary")

    out2d = pl.pallas_call(
        kernel,
        out_shape=jax.ShapeDtypeStruct((M, D_out), x.dtype),
        grid_spec=pltpu.PrefetchScalarGridSpec(
            num_scalar_prefetch=0,
            grid=grid,
            in_specs=in_specs,
            out_specs=out_specs,
            scratch_shapes=scratch_shapes,
        ),
        compiler_params=pltpu.CompilerParams(
            dimension_semantics=dim_sem,
            vmem_limit_bytes=vmem_limit),
    )(x2d, w1, b1r, w2, b2r)

    return out2d.reshape(B, N, D_out)


def mlp_reference(x, w1, b1, w2, b2):
    xf = x.astype(jnp.float32)
    h = jnp.einsum("bnd,dh->bnh", xf, w1.astype(jnp.float32)) + b1.astype(jnp.float32)
    h = jax.nn.gelu(h, approximate=False)
    return jnp.einsum("bnh,ho->bno", h, w2.astype(jnp.float32)) + b2.astype(jnp.float32)


if __name__ == "__main__":
    key = jax.random.PRNGKey(0)
    # Small-but-realistic ViT MLP shapes: embed_dim=256, mlp_ratio=4 -> hidden 1024,
    # seq = 197 (14x14 patches + cls token) so the ragged-M masked tile is exercised.
    B, N = 2, 197
    in_features = 256
    hidden_features = 1024
    out_features = in_features   # out_features defaults to in_features in the module

    kx, k1, k2, k3, k4 = jax.random.split(key, 5)
    x = jax.random.normal(kx, (B, N, in_features), dtype=jnp.float32)

    bound1 = 1.0 / math.sqrt(in_features)
    w1 = jax.random.uniform(k1, (in_features, hidden_features),
                            minval=-bound1, maxval=bound1, dtype=jnp.float32)
    b1 = jax.random.uniform(k2, (hidden_features,),
                            minval=-bound1, maxval=bound1, dtype=jnp.float32)
    bound2 = 1.0 / math.sqrt(hidden_features)
    w2 = jax.random.uniform(k3, (hidden_features, out_features),
                            minval=-bound2, maxval=bound2, dtype=jnp.float32)
    b2 = jax.random.uniform(k4, (out_features,),
                            minval=-bound2, maxval=bound2, dtype=jnp.float32)

    ref = mlp_reference(x, w1, b1, w2, b2)

    # --- f32, weight-resident fast path: exact erf GELU, parity with the torch module ---
    out = jax.block_until_ready(mlp_pallas(x, w1, b1, w2, b2))
    assert out.shape == (B, N, out_features)
    assert jnp.allclose(out, ref, atol=1e-3, rtol=1e-3), "f32 resident mismatch vs reference"

    # --- f32, forced H-chunked path (covers the accumulator kernel used for big ViTs) ---
    out_c = jax.block_until_ready(mlp_pallas(x, w1, b1, w2, b2, tile_h=256))
    assert jnp.allclose(out_c, ref, atol=1e-3, rtol=1e-3), "f32 chunked mismatch vs reference"

    # --- bf16 operands (recommended on v6e/v7x): tanh GELU (EUP), f32 accumulation ---
    xb16, w1b16, w2b16 = (t.astype(jnp.bfloat16) for t in (x, w1, w2))
    outb = jax.block_until_ready(mlp_pallas(xb16, w1b16, b1, w2b16, b2))
    refb = mlp_reference(xb16.astype(jnp.float32), w1b16.astype(jnp.float32), b1,
                         w2b16.astype(jnp.float32), b2)
    assert jnp.allclose(outb.astype(jnp.float32), refb, atol=5e-2, rtol=5e-2), \
        "bf16 mismatch vs reference"

    # Dropout with p=0.0 is a no-op in both train and eval; nothing to emulate.
    print("KERNEL_OK")
</pallas_src>

<mosaic_0001>
module attributes {stable_mosaic.version = 11 : i64} {
  func.func @_mlp_kernel_resident(%arg0: i32, %arg1: memref<256x256xf32, #tpu.memory_space<vmem>>, %arg2: memref<256x1024xf32, #tpu.memory_space<vmem>>, %arg3: memref<1x1024xf32, #tpu.memory_space<vmem>>, %arg4: memref<1024x256xf32, #tpu.memory_space<vmem>>, %arg5: memref<1x256xf32, #tpu.memory_space<vmem>>, %arg6: memref<256x256xf32, #tpu.memory_space<vmem>>) attributes {dimension_semantics = [#tpu.dimension_semantics<parallel>], iteration_bounds = array<i64: 2>, scalar_prefetch = 0 : i64, scratch_operands = 0 : i64, tpu.core_type = #tpu.core_type<tc>, window_params = [{transform_indices = @transform_0, window_bounds = array<i64: 256, 256>}, {pipeline_mode = #tpu.pipeline_mode<synchronous>, transform_indices = @transform_1, window_bounds = array<i64: 256, 1024>}, {pipeline_mode = #tpu.pipeline_mode<synchronous>, transform_indices = @transform_2, window_bounds = array<i64: 1, 1024>}, {pipeline_mode = #tpu.pipeline_mode<synchronous>, transform_indices = @transform_3, window_bounds = array<i64: 1024, 256>}, {pipeline_mode = #tpu.pipeline_mode<synchronous>, transform_indices = @transform_4, window_bounds = array<i64: 1, 256>}, {transform_indices = @transform_5, window_bounds = array<i64: 256, 256>}]} {
    %c0 = arith.constant 0 : index
    %c0_0 = arith.constant 0 : index
    %0 = vector.load %arg1[%c0, %c0_0] : memref<256x256xf32, #tpu.memory_space<vmem>>, vector<256x256xf32>
    %c0_1 = arith.constant 0 : index
    %c0_2 = arith.constant 0 : index
    %1 = vector.load %arg2[%c0_1, %c0_2] : memref<256x1024xf32, #tpu.memory_space<vmem>>, vector<256x1024xf32>
    %cst = arith.constant dense<0.000000e+00> : vector<256x1024xf32>
    %2 = tpu.matmul %0, %1, %cst {dimension_numbers = #tpu.dot_dimension_numbers<[1], [0], [0], [1], [0, 0, 1, 1], [], []>} : vector<256x256xf32>, vector<256x1024xf32>, vector<256x1024xf32> -> vector<256x1024xf32>
    %c0_3 = arith.constant 0 : index
    %c0_4 = arith.constant 0 : index
    %3 = vector.load %arg3[%c0_3, %c0_4] : memref<1x1024xf32, #tpu.memory_space<vmem>>, vector<1x1024xf32>
    %4 = vector.broadcast %3 : vector<1x1024xf32> to vector<256x1024xf32>
    %5 = arith.addf %2, %4 : vector<256x1024xf32>
    %cst_5 = arith.constant 5.000000e-01 : f32
    %6 = vector.broadcast %cst_5 : f32 to vector<256x1024xf32>
    %7 = arith.mulf %6, %5 : vector<256x1024xf32>
    %cst_6 = arith.constant 0.707106769 : f32
    %8 = vector.broadcast %cst_6 : f32 to vector<256x1024xf32>
    %9 = arith.mulf %5, %8 : vector<256x1024xf32>
    %10 = math.erf %9 : vector<256x1024xf32>
    %cst_7 = arith.constant 1.000000e+00 : f32
    %11 = vector.broadcast %cst_7 : f32 to vector<256x1024xf32>
    %12 = arith.addf %11, %10 : vector<256x1024xf32>
    %13 = arith.mulf %7, %12 : vector<256x1024xf32>
    %c0_8 = arith.constant 0 : index
    %c0_9 = arith.constant 0 : index
    %14 = vector.load %arg4[%c0_8, %c0_9] : memref<1024x256xf32, #tpu.memory_space<vmem>>, vector<1024x256xf32>
    %cst_10 = arith.constant dense<0.000000e+00> : vector<256x256xf32>
    %15 = tpu.matmul %13, %14, %cst_10 {dimension_numbers = #tpu.dot_dimension_numbers<[1], [0], [0], [1], [0, 0, 1, 1], [], []>} : vector<256x1024xf32>, vector<1024x256xf32>, vector<256x256xf32> -> vector<256x256xf32>
    %c0_11 = arith.constant 0 : index
    %c0_12 = arith.constant 0 : index
    %16 = vector.load %arg5[%c0_11, %c0_12] : memref<1x256xf32, #tpu.memory_space<vmem>>, vector<1x256xf32>
    %17 = vector.broadcast %16 : vector<1x256xf32> to vector<256x256xf32>
    %18 = arith.addf %15, %17 : vector<256x256xf32>
    %c0_13 = arith.constant 0 : index
    %c0_14 = arith.constant 0 : index
    %19 = vector.load %arg6[%c0_13, %c0_14] : memref<256x256xf32, #tpu.memory_space<vmem>>, vector<256x256xf32>
    tpu.vector_store %arg6[%c0_13, %c0_14], %18 {strides = array<i32>} : memref<256x256xf32, #tpu.memory_space<vmem>>, vector<256x256xf32>,
    return
  }
  func.func @transform_0(%arg0: i32) -> (i32, i32) {
    %c0_i32 = arith.constant 0 : i32
    %c0_i32_0 = arith.constant 0 : i32
    return %arg0, %c0_i32 : i32, i32
  }
  func.func @transform_1(%arg0: i32) -> (i32, i32) {
    %c0_i32 = arith.constant 0 : i32
    %c0_i32_0 = arith.constant 0 : i32
    %c0_i32_1 = arith.constant 0 : i32
    return %c0_i32, %c0_i32_0 : i32, i32
  }
  func.func @transform_2(%arg0: i32) -> (i32, i32) {
    %c0_i32 = arith.constant 0 : i32
    %c0_i32_0 = arith.constant 0 : i32
    %c0_i32_1 = arith.constant 0 : i32
    return %c0_i32, %c0_i32_0 : i32, i32
  }
  func.func @transform_3(%arg0: i32) -> (i32, i32) {
    %c0_i32 = arith.constant 0 : i32
    %c0_i32_0 = arith.constant 0 : i32
    %c0_i32_1 = arith.constant 0 : i32
    return %c0_i32, %c0_i32_0 : i32, i32
  }
  func.func @transform_4(%arg0: i32) -> (i32, i32) {
    %c0_i32 = arith.constant 0 : i32
    %c0_i32_0 = arith.constant 0 : i32
    %c0_i32_1 = arith.constant 0 : i32
    return %c0_i32, %c0_i32_0 : i32, i32
  }
  func.func @transform_5(%arg0: i32) -> (i32, i32) {
    %c0_i32 = arith.constant 0 : i32
    %c0_i32_0 = arith.constant 0 : i32
    return %arg0, %c0_i32 : i32, i32
  }
}

</mosaic_0001>

<bundles_post_ra>
// kernel: tpu_custom_call.1
= control target key start
LH: loop header
LB: loop body
LE: loop exit
PB: predicated region body
PF: predicated region fallthrough
CT: control target
= control target key end

     0   :  { %10 = vsyncpa [#allocation3], 0  ;;  %s8559_s0 = inlined_call_operand.hbm [shape: f32[394,256], index: 0, kind: input, shape index: {}]   ;;  %s8560_s1 = inlined_call_operand.hbm [shape: f32[256,1024], index: 1, kind: input, shape index: {}]   ;;  %s8561_s2 = inlined_call_operand.hbm [shape: f32[1,1024], index: 2, kind: input, shape index: {}]   ;;  %s8562_s3 = inlined_call_operand.hbm [shape: f32[1024,256], index: 3, kind: input, shape index: {}]   ;;  %s8563_s4 = inlined_call_operand.vmem [shape: f32[1,256], index: 4, kind: input, shape index: {}]   ;;  %s8564_s5 = inlined_call_operand.hbm [shape: f32[394,256], index: 5, kind: output, shape index: {}]  }
   0x1   :  { %12 = vsyncpa [#allocation3 + $0x1], 0 }
   0x2   :  { %13 = vsyncpa [#allocation6], 0 }
   0x3   :  { %14 = vsyncpa [#allocation9], 0 }
   0x4   :  { %15 = vsyncpa [#allocation4], 0 }
   0x5   :  { %17 = vsyncpa [#allocation4 + $0x1], 0  ;;  %s6217_s18 = smov 0   ;;  %s6219_s19 = smov 0  }
   0x6   :  { %s6221_s20 = smov 0   ;;  %s6223_s21 = smov 0  }
   0x7 LB: > { %s6238_s22 = sadd.s32 4294967295, %s6172_s21   ;;  %s4459_s23 = sadd.s32 4294967294, %s6172_s21   ;;  %s6172_s21 = sphi %s6223_s21, %s8636_s21   ;;  %s6168_s20 = sphi %s6221_s20, %s8640_s20   ;;  %s6164_s19 = sphi %s6219_s19, %s8639_s19   ;;  %s6160_s18 = sphi %s6217_s18, %s8638_s18  }
   0x8   : > { %s6242_s24 = sadd.s32 1, %s6172_s21   ;;  %s30_s25 = sadd.s32 1, %s6168_s20 }
   0x9   : > { %8586 = sst [smem:[#allocation15_spill]] %s6242_s24  ;;  %s27_s26 = ssub.s32 %s6172_s21, %s6242_s24 }
   0xa   : > { %p37_p0 = scmp.ne.s32.totalorder %s6168_s20, %s6164_s19  ;;  %p28_p1 = scmp.eq.s32.totalorder %s27_s26, 0 }
   0xb   : > { %p38_p2 = scmp.eq.s32.totalorder %s6172_s21, 0  ;;  %p43_p3 = scmp.ne.s32.totalorder %s6164_s19, %s6160_s18 }
   0xc   : > { %p8565_p4 = scmp.eq.s32.totalorder %s6238_s22, 0  ;;  %p151_p7 = scmp.eq.s32.totalorder %s6238_s22, 1 }
   0xd   : > { %s6254_s27 = scalar_select %p28_p1, %s6168_s20, %s30_s25  }
   0xe   : > { %p6256_p5 = por %p38_p2, %p37_p0  ;;  %p6262_p6 = por %p8565_p4, %p43_p3 }
   0xf   : > { %8587 = sst [smem:[#allocation16_spill]] %s6254_s27  ;;  %p157_p8 = scmp.eq.s32.totalorder %s4459_s23, 1 }
  0x10   : > { %s8588_s28 = scalar_select %p6256_p5, 1, 0 }
  0x11   : > { %s8589_s29 = scalar_select %p6262_p6, 1, 0 }
  0x12   : > { %p4460_p9 = scmp.ge.s32.totalorder %s6172_s21, 1  ;;  %p164_p10 = scmp.lt.s32.totalorder %s6172_s21, 3 }
  0x13   : > { %p6269_p11 = por %p151_p7, %p37_p0  ;;  %p6273_p12 = por %p157_p8, %p43_p3 }
  0x14   : > { %p6277_p13 = pnand %p4460_p9, %p164_p10  ;;  %s6174_s8 = smov [#allocation5]  }
  0x15   : > { %s8590_s30 = scalar_select %p6269_p11, 1, 0 }
  0x16   : > { %s8591_s6 = scalar_select %p6273_p12, 1, 0 }
  0x17   : > { %s8592_s7 = scalar_select %p6277_p13, 1, 0 }
  0x18   : > { %p5279_p1 = pneg %p6277_p13  ;;  %s176_s9 = sshll.u32 %s6174_s8, 4  ;;  %s177_s9 = int_to_ptr.vmem [resolvable:$true] %s176_s9 }
  0x19   : > { %s6175_s11 = smov [#allocation7]   ;;  %s5986_s15 = scalar_lea.hbm %s8560_s1, 32768 }
  0x1a   : > { %p6285_p2 = pnand %p5279_p1, %p8565_p4  ;;  %s190_s12 = sshll.u32 %s6175_s11, 4  ;;  %s6289_s12 = int_to_ptr.vmem [resolvable:$true] %s190_s12 }
  0x1b   : > { %p5987_p0 = scmp.ne.s32.totalorder %s8560_s1, %s5986_s15  ;;  %p5993_p9 = scmp.lt.u32.totalorder %s5986_s15, %s8560_s1 }
  0x1c   : > { %p6299_p3 = pneg %p6285_p2 }
  0x1e   : > { %p5989_p7 = pnand %p6299_p3, %p5987_p0 }
  0x20   : > { %p5990_p8 = pneg %p5989_p7 }
  0x22   : > { %p5995_p10 = pnand %p5993_p9, %p5990_p8 }
  0x24   : > { %5998 = shalt.err (!%p5995_p10)
}
  0x25   : > { %s5999_s8 = scalar_lea.vmem %s177_s9, 32768  ;;  %p6007_p11 = scmp.lt.s32.totalorder %s177_s9, %s177_s9 }
  0x26   : > { %p6000_p1 = scmp.ne.s32.totalorder %s177_s9, %s5999_s8  ;;  %p6008_p6 = scmp.lt.s32.totalorder %s5999_s8, %s5999_s8 }
  0x28   : > { %p6002_p4 = pnand %p6000_p1, %p6299_p3  ;;  %p6009_p13 = por %p6008_p6, %p6007_p11 }
  0x2a   : > { %p6003_p12 = pneg %p6002_p4 }
  0x2c   : > { %p6010_p5 = pnand %p6009_p13, %p6003_p12 }
  0x2e   : > { %6013 = shalt.err (!%p6010_p5)
}
  0x2f   : > { %s6176_s11 = smov 1024   ;;  %s6177_s13 = smov 64  }
  0x30   : > { %5282 = dma.hbm_to_vmem [thread:$0]  (!%p6285_p2), %s8560_s1, 32768, %s177_s9, [#allocation6], %s6176_s11, %s6176_s11, %s6177_s13  }
  0x31   : > { %s6014_s25 = scalar_lea.hbm %s8561_s2, 128 }
  0x32   : > { %p6015_p4 = scmp.ne.s32.totalorder %s8561_s2, %s6014_s25  ;;  %p6021_p11 = scmp.lt.u32.totalorder %s6014_s25, %s8561_s2 }
  0x34   : > { %p6017_p6 = pnand %p6015_p4, %p6299_p3 }
  0x36   : > { %p6018_p5 = pneg %p6017_p6 }
  0x38   : > { %p6023_p12 = pnand %p6021_p11, %p6018_p5 }
  0x3a   : > { %6026 = shalt.err (!%p6023_p12)
}
  0x3b   : > { %s6027_s9 = scalar_lea.vmem %s6289_s12, 128  ;;  %p6035_p8 = scmp.lt.s32.totalorder %s6289_s12, %s6289_s12 }
  0x3c   : > { %p6028_p13 = scmp.ne.s32.totalorder %s6289_s12, %s6027_s9  ;;  %p6036_p9 = scmp.lt.s32.totalorder %s6027_s9, %s6027_s9 }
  0x3e   : > { %p6030_p0 = pnand %p6028_p13, %p6299_p3  ;;  %p6037_p10 = por %p6036_p9, %p6035_p8 }
  0x40   : > { %p6031_p7 = pneg %p6030_p0 }
  0x42   : > { %p6038_p1 = pnand %p6037_p10, %p6031_p7 }
  0x44   : > { %6041 = shalt.err (!%p6038_p1)
}
  0x45   : > { %5285 = dma.hbm_to_vmem [thread:$0]  (!%p6285_p2), %s8561_s2, 128, %s6289_s12, [#allocation6]  }
  0x46   : > { %s6178_s11 = smov [#allocation8]   ;;  %s6042_s16 = scalar_lea.hbm %s8562_s3, 32768 }
  0x47   : > { %s200_s13 = sshll.u32 %s6178_s11, 4  ;;  %p6043_p4 = scmp.ne.s32.totalorder %s8562_s3, %s6042_s16  ;;  %s201_s13 = int_to_ptr.vmem [resolvable:$true] %s200_s13 }
  0x48   : > { %p6049_p11 = scmp.lt.u32.totalorder %s6042_s16, %s8562_s3 }
  0x49   : > { %p6045_p6 = pnand %p6043_p4, %p6299_p3 }
  0x4b   : > { %p6046_p5 = pneg %p6045_p6 }
  0x4d   : > { %p6051_p12 = pnand %p6049_p11, %p6046_p5 }
  0x4f   : > { %6054 = shalt.err (!%p6051_p12)
}
  0x50   : > { %s6055_s12 = scalar_lea.vmem %s201_s13, 32768  ;;  %p6063_p8 = scmp.lt.s32.totalorder %s201_s13, %s201_s13 }
  0x51   : > { %p6056_p13 = scmp.ne.s32.totalorder %s201_s13, %s6055_s12  ;;  %p6064_p9 = scmp.lt.s32.totalorder %s6055_s12, %s6055_s12 }
  0x53   : > { %p6058_p0 = pnand %p6056_p13, %p6299_p3  ;;  %p6065_p10 = por %p6064_p9, %p6063_p8 }
  0x55   : > { %p6059_p7 = pneg %p6058_p0 }
  0x57   : > { %p6066_p1 = pnand %p6065_p10, %p6059_p7 }
  0x59   : > { %6069 = shalt.err (!%p6066_p1)
}
  0x5a   : > { %s6179_s9 = smov 256   ;;  %s6180_s24 = smov 16  }
  0x5b   : > { %5288 = dma.hbm_to_vmem [thread:$0]  (!%p6285_p2), %s8562_s3, 32768, %s201_s13, [#allocation9], %s6179_s9, %s6179_s9, %s6180_s24  }
  0x5c   : > { %p4464_p4 = scmp.ge.s32.totalorder %s6172_s21, 2 }
  0x5d   : > { %p8595_p3 = scmp.ne.s32.totalorder (!%p4464_p4), %s8588_s28, 0 }
  0x5e   : > { %213 = sbr.rel (%p4464_p4) target bundleno = 136 (0x88), region = 32 }
  0x65   : > { %216 = sbr.rel (!%p8595_p3) target bundleno = 136 (0x88), region = 36  ;;  %s217_s23 = sand.u32 (%p8595_p3), 1, %s6168_s20  }
  0x66   : > { %s4466_s14 = sshll.u32 (%p8595_p3), %s6172_s21, 5  ;;  %s4465_s15 = sshll.u32 (%p8595_p3), %s217_s23, 9 }
  0x67   : > { %s223_s16 = ssub.s32 (%p8595_p3), 50, %s4466_s14  ;;  %s6366_s17 = scalar_lea.sflag (%p8595_p3), [#allocation3], %s217_s23 }
  0x68   : > { %p224_p6 = scmp.lt.s32.totalorder (%p8595_p3), %s223_s16, 32  ;;  %s221_s25 = scalar_lea.vmem (%p8595_p3), [#allocation2], %s4465_s15 }
  0x6c   : > { %s8642_s16 = smov (!%p224_p6, %s223_s16), 32 }
  0x6d   : > { %s6363_s10 = sshll.u32 %s8642_s16, 8 }
  0x6e   : > { %s229_s13 = ssub.s32 8192, %s6363_s10 }
  0x6f   : > { %230 = vsyncadd %s6366_s17, %s229_s13  ;;  %p4469_p2 = scmp.ne.s32.totalorder %s6363_s10, 0  ;;  %s4493_s28 = sshll.u32 %s6172_s21, 13 }
  0x70   : > { %s6374_s12 = scalar_lea.hbm %s8559_s0, %s4493_s28  ;;  %s236_s9 = sshll.u32 %s221_s25, 4  ;;  %s6376_s9 = int_to_ptr.vmem [resolvable:$true] %s236_s9 }
  0x71   : > { %s6070_s24 = scalar_lea.hbm %s6374_s12, %s6363_s10  ;;  %s6074_s23 = scalar_lea.hbm %s8559_s0, 12800 }
  0x72   : > { %p6071_p5 = scmp.ne.s32.totalorder %s6374_s12, %s6070_s24  ;;  %p6075_p13 = scmp.lt.u32.totalorder %s6374_s12, %s8559_s0 }
  0x73   : > { %p6076_p0 = scmp.lt.u32.totalorder %s6074_s23, %s6070_s24  ;;  %p6078_p8 = scmp.lt.u32.totalorder %s6070_s24, %s6374_s12 }
  0x74   : > { %p6072_p11 = pnand %p6071_p5, %p4469_p2 }
  0x75   : > { %p6077_p7 = por %p6076_p0, %p6075_p13 }
  0x76   : > { %p6073_p12 = pneg %p6072_p11 }
  0x77   : > { %p6079_p9 = por %p6078_p8, %p6077_p7 }
  0x79   : > { %p6080_p10 = pnand %p6079_p9, %p6073_p12 }
  0x7b   : > { %6083 = shalt.err (!%p6080_p10)
}
  0x7c   : > { %s6084_s16 = scalar_lea.vmem %s6376_s9, %s6363_s10  ;;  %s6181_s13 = smov [#allocation2]  }
  0x7d   : > { %p6085_p1 = scmp.ne.s32.totalorder %s6376_s9, %s6084_s16  ;;  %s6088_s25 = sshll.u32 %s6181_s13, 4  ;;  %s6089_s25 = int_to_ptr.vmem [resolvable:$false] %s6088_s25 }
  0x7e   : > { %s6090_s28 = scalar_lea.vmem %s6089_s25, 16384  ;;  %p6091_p5 = scmp.lt.s32.totalorder %s6376_s9, %s6089_s25 }
  0x7f   : > { %p6086_p3 = pnand %p6085_p1, %p4469_p2  ;;  %p6092_p11 = scmp.lt.s32.totalorder %s6090_s28, %s6084_s16 }
  0x81   : > { %p6087_p6 = pneg %p6086_p3  ;;  %p6093_p13 = por %p6092_p11, %p6091_p5 }
  0x83   : > { %p6094_p0 = pnand %p6093_p13, %p6087_p6 }
  0x85   : > { %6097 = shalt.err (!%p6094_p0)
}
  0x86   : > { %s6182_s26 = smov 256   ;;  %s6183_s8 = smov 16  }
  0x87   : > { %242 = dma.hbm_to_vmem [thread:$0]  (%p4469_p2), %s6374_s12, %s6363_s10, %s6376_s9, %s6366_s17, %s6182_s26, %s6182_s26, %s6183_s8  }
  0x88 PF: > { %p8596_p12 = scmp.ne.s32.totalorder %s8592_s7, 0 }
  0x8a   : > { %248 = sbr.rel (%p8596_p12) target bundleno = 1208 (0x4b8), region = 40 }
  0x91   : > { %s6406_s24 = sand.u32 1, %s6164_s19   ;;  %p8597_p7 = scmp.ne.s32.totalorder %s8589_s29, 0 }
  0x92   : > { %s4475_s27 = sshll.u32 %s6406_s24, 9  ;;  %s251_s11 = scalar_lea.sflag [#allocation3], %s6406_s24 }
  0x93   : > { %s6412_s23 = scalar_lea.vmem [#allocation2], %s4475_s27 }
  0x94   : > { %6143 = dma.done.wait (%p8597_p7), %s251_s11, 8192  }
  0x95   : > { %6145 = vsyncadd (%p8597_p7), %s251_s11, 4294959104  ;;  %p8598_p2 = scmp.eq.s32.totalorder %s6238_s22, 0 }
  0x97   : > { %6147 = dma.done.wait (%p8598_p2), [#allocation6], 32896   ;;  %p8599_p8 = pmov %p8598_p2 }
  0x98   : > { %p8600_p9 = pmov %p8598_p2 }
  0x99   : > { %6149 = vsyncadd (%p8599_p8), [#allocation6], 4294934400 }
  0x9a   : > { %6151 = dma.done.wait (%p8600_p9), [#allocation9], 32768   ;;  %p8601_p10 = pmov %p8598_p2 }
  0x9b   : > { %v370_v0 = vld [vmem:[#allocation5 + $0x8] sm:$0xff]  ;;  %v369_v2 = vld [vmem:[#allocation5] sm:$0xff]  ;;  %s8368_s10 = scalar_lea.vmem [#allocation10], %s4475_s27  ;;  %s4336_s17 = scalar_lea.sflag [#allocation4], %s6406_s24 }
  0x9c   : > { %6153 = vsyncadd (%p8601_p10), [#allocation9], 4294934528  ;;  %v378_v1 = vld [vmem:[#allocation5 + $0x48] sm:$0xff]  ;;  %v377_v4 = vld [vmem:[#allocation5 + $0x40] sm:$0xff]  ;;  %p8634_p1 = scmp.ne.s32.totalorder %s8590_s30, 0 }
  0x9d   : > { %v4497_v3 = vpack.c.bf16 %v378_v1, %v370_v0  ;;  %v386_v5 = vld [vmem:[#allocation5 + $0x88] sm:$0xff]  ;;  %v4499_v7 = vpack.c.bf16 %v377_v4, %v369_v2  ;;  %v385_v9 = vld [vmem:[#allocation5 + $0x80] sm:$0xff]  ;;  %s4481_s12 = sshll.u32 (%p8634_p1), %s6238_s22, 5 }
  0x9e   : > { %v394_v6 = vld [vmem:[#allocation5 + $0xc8] sm:$0xff]  ;;  %v393_v10 = vld [vmem:[#allocation5 + $0xc0] sm:$0xff]  ;;  %s4344_s9 = ssub.s32 (%p8634_p1), 50, %s4481_s12 }
  0x9f   : > { %v4501_v8 = vpack.c.bf16 %v394_v6, %v386_v5  ;;  %v402_v11 = vld [vmem:[#allocation5 + $0x108] sm:$0xff]  ;;  %4498 = vmatprep.subr.bf16.mxu1 %v4497_v3  ;;  %v4503_v13 = vpack.c.bf16 %v393_v10, %v385_v9  ;;  %v401_v15 = vld [vmem:[#allocation5 + $0x100] sm:$0xff]  ;;  %p4345_p3 = scmp.lt.s32.totalorder (%p8634_p1), %s4344_s9, 32 }
  0xa0   : > { %v410_v12 = vld [vmem:[#allocation5 + $0x148] sm:$0xff]  ;;  %4500 = vmatpush1.bf16.msra.mxu1 %v4499_v7  ;;  %v409_v16 = vld [vmem:[#allocation5 + $0x140] sm:$0xff] }
  0xa1   : > { %4502 = vmatprep.subr.bf16.mxu1 %v4501_v8  ;;  %v4505_v14 = vpack.c.bf16 %v410_v12, %v402_v11  ;;  %v418_v17 = vld [vmem:[#allocation5 + $0x188] sm:$0xff]  ;;  %v4507_v19 = vpack.c.bf16 %v409_v16, %v401_v15  ;;  %v417_v21 = vld [vmem:[#allocation5 + $0x180] sm:$0xff] }
  0xa2   : > { %v426_v18 = vld [vmem:[#allocation5 + $0x1c8] sm:$0xff]  ;;  %v425_v22 = vld [vmem:[#allocation5 + $0x1c0] sm:$0xff] }
  0xa3   : > { %v4509_v20 = vpack.c.bf16 %v426_v18, %v418_v17  ;;  %v434_v23 = vld [vmem:[#allocation5 + $0x208] sm:$0xff]  ;;  %v4511_v25 = vpack.c.bf16 %v425_v22, %v417_v21  ;;  %v433_v27 = vld [vmem:[#allocation5 + $0x200] sm:$0xff] }
  0xa4   : > { %4504 = vmatpush1.bf16.msra.mxu1 %v4503_v13  ;;  %v442_v24 = vld [vmem:[#allocation5 + $0x248] sm:$0xff]  ;;  %v441_v28 = vld [vmem:[#allocation5 + $0x240] sm:$0xff] }
  0xa5   : > { %4506 = vmatprep.subr.bf16.mxu1 %v4505_v14  ;;  %v4513_v26 = vpack.c.bf16 %v442_v24, %v434_v23  ;;  %v450_v29 = vld [vmem:[#allocation5 + $0x288] sm:$0xff]  ;;  %v4515_v31 = vpack.c.bf16 %v441_v28, %v433_v27  ;;  %v449_v33 = vld [vmem:[#allocation5 + $0x280] sm:$0xff] }
  0xa6   : > { %v458_v30 = vld [vmem:[#allocation5 + $0x2c8] sm:$0xff]  ;;  %v457_v34 = vld [vmem:[#allocation5 + $0x2c0] sm:$0xff] }
  0xa7   : > { %v4517_v32 = vpack.c.bf16 %v458_v30, %v450_v29  ;;  %v466_v35 = vld [vmem:[#allocation5 + $0x308] sm:$0xff]  ;;  %v4519_v37 = vpack.c.bf16 %v457_v34, %v449_v33  ;;  %v465_v39 = vld [vmem:[#allocation5 + $0x300] sm:$0xff]  ;;  %v380_v33 = vld [vmem:[#allocation5 + $0x58] sm:$0xff] }
  0xa8   : > { %4508 = vmatpush1.bf16.msra.mxu1 %v4507_v19  ;;  %v474_v36 = vld [vmem:[#allocation5 + $0x348] sm:$0xff]  ;;  %v473_v40 = vld [vmem:[#allocation5 + $0x340] sm:$0xff] }
  0xa9   : > { %4510 = vmatprep.subr.bf16.mxu1 %v4509_v20  ;;  %v4521_v38 = vpack.c.bf16 %v474_v36, %v466_v35  ;;  %v6427_v41 = vld [vmem:[%s6412_s23 + $0x8] sm:$0xff]  ;;  %v4523_v44 = vpack.c.bf16 %v473_v40, %v465_v39  ;;  %v481_v46 = vld [vmem:[#allocation5 + $0x380] sm:$0xff]  ;;  %v371_v36 = vld [vmem:[#allocation5 + $0x10] sm:$0xff] }
  0xaa   : > { %v482_v42 = vld [vmem:[#allocation5 + $0x388] sm:$0xff]  ;;  %731 = vmatprep.mubr.f32.mxu1 %v6427_v41  ;;  %v489_v47 = vld [vmem:[#allocation5 + $0x3c0] sm:$0xff]  ;;  %v396_v39 = vld [vmem:[#allocation5 + $0xd8] sm:$0xff] }
  0xab   : > { %v490_v43 = vld [vmem:[#allocation5 + $0x3c8] sm:$0xff]  ;;  %v4527_v50 = vpack.c.bf16 %v489_v47, %v481_v46  ;;  %v497_v52 = vld [vmem:[#allocation5 + $0x400] sm:$0xff]  ;;  %v395_v46 = vld [vmem:[#allocation5 + $0xd0] sm:$0xff] }
  0xac   : > { %4512 = vmatpush1.bf16.msra.mxu1 %v4511_v25  ;;  %v4525_v45 = vpack.c.bf16 %v490_v43, %v482_v42  ;;  %v498_v48 = vld [vmem:[#allocation5 + $0x408] sm:$0xff]  ;;  %v505_v53 = vld [vmem:[#allocation5 + $0x440] sm:$0xff]  ;;  %v6434_v43 = vld [vmem:[%s6412_s23 + $0x18] sm:$0xff] }
  0xad   : > { %4514 = vmatprep.subr.bf16.mxu1 %v4513_v26  ;;  %v506_v49 = vld [vmem:[#allocation5 + $0x448] sm:$0xff]  ;;  %v4531_v56 = vpack.c.bf16 %v505_v53, %v497_v52  ;;  %v513_v58 = vld [vmem:[#allocation5 + $0x480] sm:$0xff]  ;;  %v404_v47 = vld [vmem:[#allocation5 + $0x118] sm:$0xff] }
  0xae   : > { %v4529_v51 = vpack.c.bf16 %v506_v49, %v498_v48  ;;  %v514_v54 = vld [vmem:[#allocation5 + $0x488] sm:$0xff]  ;;  %v521_v59 = vld [vmem:[#allocation5 + $0x4c0] sm:$0xff]  ;;  %v412_v48 = vld [vmem:[#allocation5 + $0x158] sm:$0xff] }
  0xaf   : > { %v522_v55 = vld [vmem:[#allocation5 + $0x4c8] sm:$0xff]  ;;  %v4535_v62 = vpack.c.bf16 %v521_v59, %v513_v58  ;;  %v529_v0 = vld [vmem:[#allocation5 + $0x500] sm:$0xff]  ;;  %v6439_v49 = vld [vmem:[%s6412_s23 + $0x10] sm:$0xff]  ;;  %v4569_v52 = vpack.c.bf16 %v412_v48, %v404_v47 }
  0xb0   : > { %4516 = vmatpush1.bf16.msra.mxu1 %v4515_v31  ;;  %v4533_v57 = vpack.c.bf16 %v522_v55, %v514_v54  ;;  %v530_v60 = vld [vmem:[#allocation5 + $0x508] sm:$0xff]  ;;  %v537_v1 = vld [vmem:[#allocation5 + $0x540] sm:$0xff]  ;;  %v403_v53 = vld [vmem:[#allocation5 + $0x110] sm:$0xff] }
  0xb1   : > { %4518 = vmatprep.subr.bf16.mxu1 %v4517_v32  ;;  %v538_v61 = vld [vmem:[#allocation5 + $0x548] sm:$0xff]  ;;  %v4539_v4 = vpack.c.bf16 %v537_v1, %v529_v0  ;;  %v545_v6 = vld [vmem:[#allocation5 + $0x580] sm:$0xff]  ;;  %v372_v32 = vld [vmem:[#allocation5 + $0x18] sm:$0xff] }
  0xb2   : > { %v4537_v63 = vpack.c.bf16 %v538_v61, %v530_v60  ;;  %v546_v2 = vld [vmem:[#allocation5 + $0x588] sm:$0xff]  ;;  %v553_v7 = vld [vmem:[#allocation5 + $0x5c0] sm:$0xff]  ;;  %v4561_v35 = vpack.c.bf16 %v380_v33, %v372_v32  ;;  %v411_v54 = vld [vmem:[#allocation5 + $0x150] sm:$0xff] }
  0xb3   : > { %v554_v3 = vld [vmem:[#allocation5 + $0x5c8] sm:$0xff]  ;;  %v4543_v10 = vpack.c.bf16 %v553_v7, %v545_v6  ;;  %v561_v12 = vld [vmem:[#allocation5 + $0x600] sm:$0xff]  ;;  %v420_v55 = vld [vmem:[#allocation5 + $0x198] sm:$0xff]  ;;  %v4571_v58 = vpack.c.bf16 %v411_v54, %v403_v53 }
  0xb4   : > { %4520 = vmatpush1.bf16.msra.mxu1 %v4519_v37  ;;  %v4541_v5 = vpack.c.bf16 %v554_v3, %v546_v2  ;;  %v562_v8 = vld [vmem:[#allocation5 + $0x608] sm:$0xff]  ;;  %v569_v13 = vld [vmem:[#allocation5 + $0x640] sm:$0xff]  ;;  %v379_v37 = vld [vmem:[#allocation5 + $0x50] sm:$0xff] }
  0xb5   : > { %4522 = vmatprep.subr.bf16.mxu1 %v4521_v38  ;;  %v570_v9 = vld [vmem:[#allocation5 + $0x648] sm:$0xff]  ;;  %v4547_v16 = vpack.c.bf16 %v569_v13, %v561_v12  ;;  %v577_v18 = vld [vmem:[#allocation5 + $0x680] sm:$0xff]  ;;  %v388_v38 = vld [vmem:[#allocation5 + $0x98] sm:$0xff]  ;;  %v4563_v42 = vpack.c.bf16 %v379_v37, %v371_v36 }
  0xb6   : > { %v4545_v11 = vpack.c.bf16 %v570_v9, %v562_v8  ;;  %v578_v14 = vld [vmem:[#allocation5 + $0x688] sm:$0xff]  ;;  %v585_v19 = vld [vmem:[#allocation5 + $0x6c0] sm:$0xff]  ;;  %v6450_v59 = vld [vmem:[%s6412_s23 + $0x38] sm:$0xff] }
  0xb7   : > { %v586_v15 = vld [vmem:[#allocation5 + $0x6c8] sm:$0xff]  ;;  %v4551_v22 = vpack.c.bf16 %v585_v19, %v577_v18  ;;  %v593_v24 = vld [vmem:[#allocation5 + $0x700] sm:$0xff]  ;;  %v419_v61 = vld [vmem:[#allocation5 + $0x190] sm:$0xff] }
  0xb8   : > { %4524 = vmatpush1.bf16.msra.mxu1 %v4523_v44  ;;  %v4549_v17 = vpack.c.bf16 %v586_v15, %v578_v14  ;;  %v594_v20 = vld [vmem:[#allocation5 + $0x708] sm:$0xff]  ;;  %v601_v25 = vld [vmem:[#allocation5 + $0x740] sm:$0xff]  ;;  %v4565_v44 = vpack.c.bf16 %v396_v39, %v388_v38  ;;  %v444_v0 = vld [vmem:[#allocation5 + $0x258] sm:$0xff] }
  0xb9   : > { %4526 = vmatprep.subr.bf16.mxu1 %v4525_v45  ;;  %v602_v21 = vld [vmem:[#allocation5 + $0x748] sm:$0xff]  ;;  %v4555_v28 = vpack.c.bf16 %v601_v25, %v593_v24  ;;  %v609_v30 = vld [vmem:[#allocation5 + $0x780] sm:$0xff]  ;;  %v387_v45 = vld [vmem:[#allocation5 + $0x90] sm:$0xff] }
  0xba   : > { %v4553_v23 = vpack.c.bf16 %v602_v21, %v594_v20  ;;  %v610_v26 = vld [vmem:[#allocation5 + $0x788] sm:$0xff]  ;;  %v617_v31 = vld [vmem:[#allocation5 + $0x7c0] sm:$0xff]  ;;  %v6455_v1 = vld [vmem:[%s6412_s23 + $0x30] sm:$0xff] }
  0xbb   : > { %v618_v27 = vld [vmem:[#allocation5 + $0x7c8] sm:$0xff]  ;;  %v4559_v34 = vpack.c.bf16 %v617_v31, %v609_v30  ;;  %v6431_v40 = vld [vmem:[%s6412_s23] sm:$0xff]  ;;  %v443_v6 = vld [vmem:[#allocation5 + $0x250] sm:$0xff] }
  0xbc   : > { %4528 = vmatpush1.bf16.msra.mxu1 %v4527_v50  ;;  %v4557_v29 = vpack.c.bf16 %v618_v27, %v610_v26  ;;  %v4567_v50 = vpack.c.bf16 %v395_v46, %v387_v45  ;;  %v6458_v3 = vld [vmem:[%s6412_s23 + $0x48] sm:$0xff]  ;;  %v452_v7 = vld [vmem:[#allocation5 + $0x298] sm:$0xff]  ;;  %v6463_v9 = vld [vmem:[%s6412_s23 + $0x40] sm:$0xff] }
  0xbd   : > { %4530 = vmatprep.subr.bf16.mxu1 %v4529_v51  ;;  %v6442_v51 = vld [vmem:[%s6412_s23 + $0x28] sm:$0xff]  ;;  %v460_v8 = vld [vmem:[#allocation5 + $0x2d8] sm:$0xff]  ;;  %v451_v13 = vld [vmem:[#allocation5 + $0x290] sm:$0xff] }
  0xbe   : > { %v4581_v12 = vpack.c.bf16 %v460_v8, %v452_v7  ;;  %v459_v14 = vld [vmem:[#allocation5 + $0x2d0] sm:$0xff]  ;;  %v468_v15 = vld [vmem:[#allocation5 + $0x318] sm:$0xff]  ;;  %v6474_v19 = vld [vmem:[%s6412_s23 + $0x68] sm:$0xff] }
  0xbf   : > { %v4583_v18 = vpack.c.bf16 %v459_v14, %v451_v13  ;;  %v467_v21 = vld [vmem:[#allocation5 + $0x310] sm:$0xff]  ;;  %v492_v24 = vld [vmem:[#allocation5 + $0x3d8] sm:$0xff]  ;;  %v6479_v25 = vld [vmem:[%s6412_s23 + $0x60] sm:$0xff] }
  0xc0   : > { %4532 = vmatpush1.bf16.msra.mxu1 %v4531_v56  ;;  %v428_v56 = vld [vmem:[#allocation5 + $0x1d8] sm:$0xff]  ;;  %v491_v30 = vld [vmem:[#allocation5 + $0x3d0] sm:$0xff] }
  0xc1   : > { %4534 = vmatprep.subr.bf16.mxu1 %v4533_v57  ;;  %v6447_v57 = vld [vmem:[%s6412_s23 + $0x20] sm:$0xff]  ;;  %v4573_v60 = vpack.c.bf16 %v428_v56, %v420_v55  ;;  %v6482_v27 = vld [vmem:[%s6412_s23 + $0x78] sm:$0xff]  ;;  %v6487_v33 = vld [vmem:[%s6412_s23 + $0x70] sm:$0xff] }
  0xc2   : > { %v500_v31 = vld [vmem:[#allocation5 + $0x418] sm:$0xff]  ;;  %v499_v37 = vld [vmem:[#allocation5 + $0x410] sm:$0xff]  ;;  %v6506_v56 = vld [vmem:[%s6412_s23 + $0xa8] sm:$0xff] }
  0xc3   : > { %v508_v32 = vld [vmem:[#allocation5 + $0x458] sm:$0xff]  ;;  %v507_v38 = vld [vmem:[#allocation5 + $0x450] sm:$0xff] }
  0xc4   : > { %4536 = vmatpush1.bf16.msra.mxu1 %v4535_v62  ;;  %v427_v62 = vld [vmem:[#allocation5 + $0x1d0] sm:$0xff]  ;;  %v4593_v36 = vpack.c.bf16 %v508_v32, %v500_v31  ;;  %v516_v39 = vld [vmem:[#allocation5 + $0x498] sm:$0xff]  ;;  %v4595_v45 = vpack.c.bf16 %v507_v38, %v499_v37  ;;  %v6526_v37 = vld [vmem:[%s6412_s23 + $0xc0] sm:$0xff] }
  0xc5   : > { %4538 = vmatprep.subr.bf16.mxu1 %v4537_v63  ;;  %v436_v63 = vld [vmem:[#allocation5 + $0x218] sm:$0xff]  ;;  %v4575_v2 = vpack.c.bf16 %v427_v62, %v419_v61  ;;  %v515_v48 = vld [vmem:[#allocation5 + $0x490] sm:$0xff] }
  0xc6   : > { %v6498_v46 = vld [vmem:[%s6412_s23 + $0x98] sm:$0xff]  ;;  %v6503_v54 = vld [vmem:[%s6412_s23 + $0x90] sm:$0xff] }
  0xc7   : > { %v540_v53 = vld [vmem:[#allocation5 + $0x558] sm:$0xff]  ;;  %v539_v61 = vld [vmem:[#allocation5 + $0x550] sm:$0xff] }
  0xc8   : > { %4540 = vmatpush1.bf16.msra.mxu1 %v4539_v4  ;;  %v4577_v4 = vpack.c.bf16 %v444_v0, %v436_v63  ;;  %v548_v62 = vld [vmem:[#allocation5 + $0x598] sm:$0xff]  ;;  %v6510_v0 = vld [vmem:[%s6412_s23 + $0xa0] sm:$0xff] }
  0xc9   : > { %4542 = vmatprep.subr.bf16.mxu1 %v4541_v5  ;;  %v435_v5 = vld [vmem:[#allocation5 + $0x210] sm:$0xff]  ;;  %v556_v63 = vld [vmem:[#allocation5 + $0x5d8] sm:$0xff] }
  0xca   : > { %v4605_v7 = vpack.c.bf16 %v556_v63, %v548_v62  ;;  %v564_v8 = vld [vmem:[#allocation5 + $0x618] sm:$0xff]  ;;  %v6534_v62 = vld [vmem:[%s6412_s23 + $0xd0] sm:$0xff] }
  0xcb   : > { %v572_v13 = vld [vmem:[#allocation5 + $0x658] sm:$0xff] }
  0xcc   : > { %4544 = vmatpush1.bf16.msra.mxu1 %v4543_v10  ;;  %v4579_v10 = vpack.c.bf16 %v443_v6, %v435_v5  ;;  %v547_v5 = vld [vmem:[#allocation5 + $0x590] sm:$0xff]  ;;  %v588_v31 = vld [vmem:[#allocation5 + $0x6d8] sm:$0xff] }
  0xcd   : > { %4546 = vmatprep.subr.bf16.mxu1 %v4545_v11  ;;  %v6466_v11 = vld [vmem:[%s6412_s23 + $0x58] sm:$0xff]  ;;  %v555_v6 = vld [vmem:[#allocation5 + $0x5d0] sm:$0xff] }
  0xd0   : > { %4548 = vmatpush1.bf16.msra.mxu1 %v4547_v16  ;;  %v476_v16 = vld [vmem:[#allocation5 + $0x358] sm:$0xff] }
  0xd1   : > { %4550 = vmatprep.subr.bf16.mxu1 %v4549_v17  ;;  %v6471_v17 = vld [vmem:[%s6412_s23 + $0x50] sm:$0xff]  ;;  %v4585_v20 = vpack.c.bf16 %v476_v16, %v468_v15  ;;  %v2975_v15 = vld [vmem:[#allocation8] sm:$0xff]  ;;  %v2977_v16 = vld [vmem:[#allocation8 + $0x10] sm:$0xff] }
  0xd4   : > { %4552 = vmatpush1.bf16.msra.mxu1 %v4551_v22  ;;  %v475_v22 = vld [vmem:[#allocation5 + $0x350] sm:$0xff] }
  0xd5   : > { %4554 = vmatprep.subr.bf16.mxu1 %v4553_v23  ;;  %v484_v23 = vld [vmem:[#allocation5 + $0x398] sm:$0xff]  ;;  %v4587_v26 = vpack.c.bf16 %v475_v22, %v467_v21  ;;  %v6522_v21 = vld [vmem:[%s6412_s23 + $0xc8] sm:$0xff]  ;;  %v4607_v22 = vpack.c.bf16 %v555_v6, %v547_v5  ;;  %v595_v6 = vld [vmem:[#allocation5 + $0x710] sm:$0xff] }
  0xd8   : > { %4556 = vmatpush1.bf16.msra.mxu1 %v4555_v28  ;;  %v4589_v28 = vpack.c.bf16 %v492_v24, %v484_v23  ;;  %v563_v23 = vld [vmem:[#allocation5 + $0x610] sm:$0xff] }
  0xd9   : > { %4558 = vmatprep.subr.bf16.mxu1 %v4557_v29  ;;  %v483_v29 = vld [vmem:[#allocation5 + $0x390] sm:$0xff] }
  0xda   : > { %v571_v24 = vld [vmem:[#allocation5 + $0x650] sm:$0xff] }
  0xdc   : > { %4560 = vmatpush1.bf16.msra.mxu1 %v4559_v34  ;;  %v4591_v34 = vpack.c.bf16 %v491_v30, %v483_v29  ;;  %v2980_v29 = vld [vmem:[#allocation8 + $0x28] sm:$0xff]  ;;  %v2982_v30 = vld [vmem:[#allocation8 + $0x38] sm:$0xff] }
  0xdd   : > { %4562 = vmatprep.subr.bf16.mxu1 %v4561_v35  ;;  %v6490_v35 = vld [vmem:[%s6412_s23 + $0x88] sm:$0xff]  ;;  %v4757_v32 = vpack.c.bf16 %v2982_v30, %v2980_v29  ;;  %v619_v29 = vld [vmem:[#allocation5 + $0x7d0] sm:$0xff] }
  0xdf   : > { %732 = vmatmul.mubr.f32.vlgmr.msra.gmra.mrb[0].mxu1 %v6431_v40 }
  0xe0   : > { %4564 = vmatpush1.bf16.msra.mxu1 %v4563_v42  ;;  %737 = vmatprep.mubr.f32.mxu1 %v6434_v43  ;;  %v524_v42 = vld [vmem:[#allocation5 + $0x4d8] sm:$0xff] }
  0xe1   : > { %4566 = vmatprep.subr.bf16.mxu1 %v4565_v44  ;;  %v6495_v44 = vld [vmem:[%s6412_s23 + $0x80] sm:$0xff]  ;;  %v4597_v47 = vpack.c.bf16 %v524_v42, %v516_v39  ;;  %v6530_v39 = vld [vmem:[%s6412_s23 + $0xd8] sm:$0xff]  ;;  %v4611_v42 = vpack.c.bf16 %v571_v24, %v563_v23 }
  0xe2   : > { %v6546_v24 = vld [vmem:[%s6412_s23 + $0xf8] sm:$0xff] }
  0xe3   : > { %738 = vmatmul.mubr.f32.gmra.mrb[2].mxu1 %v6439_v49 }
  0xe4   : > { %743 = vmatprep.mubr.f32.mxu1 %v6442_v51  ;;  %4568 = vmatpush1.bf16.msra.mxu1 %v4567_v50  ;;  %v523_v50 = vld [vmem:[#allocation5 + $0x4d0] sm:$0xff] }
  0xe5   : > { %4570 = vmatprep.subr.bf16.mxu1 %v4569_v52  ;;  %v532_v52 = vld [vmem:[#allocation5 + $0x518] sm:$0xff]  ;;  %v4599_v55 = vpack.c.bf16 %v523_v50, %v515_v48 }
  0xe6   : > { %v596_v50 = vld [vmem:[#allocation5 + $0x718] sm:$0xff] }
  0xe7   : > { %744 = vmatmul.mubr.f32.gmra.mrb[4].mxu1 %v6447_v57 }
  0xe8   : > { %749 = vmatprep.mubr.f32.mxu1 %v6450_v59  ;;  %4572 = vmatpush1.bf16.msra.mxu1 %v4571_v58  ;;  %v4601_v58 = vpack.c.bf16 %v540_v53, %v532_v52  ;;  %v2984_v52 = vld [vmem:[#allocation8 + $0x48] sm:$0xff]  ;;  %v2986_v53 = vld [vmem:[#allocation8 + $0x58] sm:$0xff] }
  0xe9   : > { %4574 = vmatprep.subr.bf16.mxu1 %v4573_v60  ;;  %v531_v60 = vld [vmem:[#allocation5 + $0x510] sm:$0xff] }
  0xeb   : > { %750 = vmatmul.mubr.f32.gmra.mrb[6].mxu1 %v6455_v1 }
  0xec   : > { %755 = vmatprep.mubr.f32.mxu1 %v6458_v3  ;;  %4576 = vmatpush1.bf16.msra.mxu1 %v4575_v2  ;;  %v6514_v2 = vld [vmem:[%s6412_s23 + $0xb8] sm:$0xff] }
  0xed   : > { %4578 = vmatprep.subr.bf16.mxu1 %v4577_v4  ;;  %v4603_v4 = vpack.c.bf16 %v539_v61, %v531_v60  ;;  %v2983_v60 = vld [vmem:[#allocation8 + $0x40] sm:$0xff]  ;;  %v2985_v61 = vld [vmem:[#allocation8 + $0x50] sm:$0xff] }
  0xee   : > { %v4763_v63 = vpack.c.bf16 %v2985_v61, %v2983_v60  ;;  %v2995_v61 = vld [vmem:[#allocation8 + $0xa0] sm:$0xff] }
  0xef   : > { %756 = vmatmul.mubr.f32.gmra.mrb[8].mxu1 %v6463_v9 }
  0xf0   : > { %761 = vmatprep.mubr.f32.mxu1 %v6466_v11  ;;  %4580 = vmatpush1.bf16.msra.mxu1 %v4579_v10  ;;  %v2976_v10 = vld [vmem:[#allocation8 + $0x8] sm:$0xff] }
  0xf1   : > { %4582 = vmatprep.subr.bf16.mxu1 %v4581_v12  ;;  %v2978_v12 = vld [vmem:[#allocation8 + $0x18] sm:$0xff] }
  0xf2   : > { %v4753_v14 = vpack.c.bf16 %v2978_v12, %v2976_v10  ;;  %v612_v10 = vld [vmem:[#allocation5 + $0x798] sm:$0xff]  ;;  %v2988_v12 = vld [vmem:[#allocation8 + $0x68] sm:$0xff] }
  0xf3   : > { %762 = vmatmul.mubr.f32.gmra.mrb[10].mxu1 %v6471_v17 }
  0xf4   : > { %767 = vmatprep.mubr.f32.mxu1 %v6474_v19  ;;  %4584 = vmatpush1.bf16.msra.mxu1 %v4583_v18  ;;  %v6518_v18 = vld [vmem:[%s6412_s23 + $0xb0] sm:$0xff] }
  0xf5   : > { %4586 = vmatprep.subr.bf16.mxu1 %v4585_v20  ;;  %v4755_v20 = vpack.c.bf16 %v2977_v16, %v2975_v15  ;;  %4754 = vmatprep.subr.bf16.mxu0 %v4753_v14  ;;  %v620_v14 = vld [vmem:[#allocation5 + $0x7d8] sm:$0xff]  ;;  %v2987_v16 = vld [vmem:[#allocation8 + $0x60] sm:$0xff] }
  0xf6   : > { %v4621_v30 = vpack.c.bf16 %v620_v14, %v612_v10  ;;  %v3002_v10 = vld [vmem:[#allocation8 + $0xd8] sm:$0xff]  ;;  %v3001_v14 = vld [vmem:[#allocation8 + $0xd0] sm:$0xff] }
  0xf7   : > { %768 = vmatmul.mubr.f32.gmra.mrb[12].mxu1 %v6479_v25  ;;  %4756 = vmatpush1.bf16.msra.mxu0 %v4755_v20  ;;  %v2989_v20 = vld [vmem:[#allocation8 + $0x70] sm:$0xff] }
  0xf8   : > { %773 = vmatprep.mubr.f32.mxu1 %v6482_v27  ;;  %4588 = vmatpush1.bf16.msra.mxu1 %v4587_v26  ;;  %v4609_v26 = vpack.c.bf16 %v572_v13, %v564_v8  ;;  %v2990_v13 = vld [vmem:[#allocation8 + $0x78] sm:$0xff]  ;;  %v4767_v23 = vpack.c.bf16 %v2989_v20, %v2987_v16  ;;  %v6567_v16 = vld [vmem:[%s6412_s23 + $0x110] sm:$0xff]  ;;  %v6570_v20 = vld [vmem:[%s6412_s23 + $0x128] sm:$0xff] }
  0xf9   : > { %4590 = vmatprep.subr.bf16.mxu1 %v4589_v28  ;;  %v580_v28 = vld [vmem:[#allocation5 + $0x698] sm:$0xff]  ;;  %4758 = vmatprep.subr.bf16.mxu0 %v4757_v32  ;;  %v4765_v15 = vpack.c.bf16 %v2990_v13, %v2988_v12  ;;  %v2992_v32 = vld [vmem:[#allocation8 + $0x88] sm:$0xff]  ;;  %v2999_v13 = vld [vmem:[#allocation8 + $0xc0] sm:$0xff] }
  0xfa   : > { %v4613_v48 = vpack.c.bf16 %v588_v31, %v580_v28  ;;  %v611_v28 = vld [vmem:[#allocation5 + $0x790] sm:$0xff]  ;;  %v374_v31 = vld [vmem:[#allocation5 + $0x28] sm:$0xff] }
  0xfb   : > { %774 = vmatmul.mubr.f32.gmra.mrb[14].mxu1 %v6487_v33 }
  0xfc   : > { %779 = vmatprep.mubr.f32.mxu1 %v6490_v35  ;;  %4592 = vmatpush1.bf16.msra.mxu1 %v4591_v34  ;;  %v2979_v34 = vld [vmem:[#allocation8 + $0x20] sm:$0xff] }
  0xfd   : > { %4594 = vmatprep.subr.bf16.mxu1 %v4593_v36  ;;  %v2981_v36 = vld [vmem:[#allocation8 + $0x30] sm:$0xff] }
  0xfe   : > { %v4759_v38 = vpack.c.bf16 %v2981_v36, %v2979_v34  ;;  %v2994_v34 = vld [vmem:[#allocation8 + $0x98] sm:$0xff]  ;;  %v382_v36 = vld [vmem:[#allocation5 + $0x68] sm:$0xff] }
  0xff   : > { %780 = vmatmul.mubr.f32.gmra.mrb[16].mxu1 %v6495_v44 }
 0x100   : > { %785 = vmatprep.mubr.f32.mxu1 %v6498_v46  ;;  %4596 = vmatpush1.bf16.msra.mxu1 %v4595_v45  ;;  %v579_v45 = vld [vmem:[#allocation5 + $0x690] sm:$0xff] }
 0x101   : > { %4598 = vmatprep.subr.bf16.mxu1 %v4597_v47  ;;  %v587_v47 = vld [vmem:[#allocation5 + $0x6d0] sm:$0xff]  ;;  %4760 = vmatpush1.bf16.msra.mxu0 %v4759_v38  ;;  %v4769_v38 = vpack.c.bf16 %v2994_v34, %v2992_v32  ;;  %v6575_v32 = vld [vmem:[%s6412_s23 + $0x120] sm:$0xff]  ;;  %v6578_v34 = vld [vmem:[%s6412_s23 + $0x138] sm:$0xff] }
 0x102   : > { %v4615_v5 = vpack.c.bf16 %v587_v47, %v579_v45  ;;  %v2993_v45 = vld [vmem:[#allocation8 + $0x90] sm:$0xff] }
 0x103   : > { %786 = vmatmul.mubr.f32.gmra.mrb[18].mxu1 %v6503_v54 }
 0x104   : > { %791 = vmatprep.mubr.f32.mxu1 %v6506_v56  ;;  %4600 = vmatpush1.bf16.msra.mxu1 %v4599_v55  ;;  %v604_v55 = vld [vmem:[#allocation5 + $0x758] sm:$0xff] }
 0x105   : > { %4602 = vmatprep.subr.bf16.mxu1 %v4601_v58  ;;  %v4761_v58 = vpack.c.bf16 %v2986_v53, %v2984_v52  ;;  %v4617_v8 = vpack.c.bf16 %v604_v55, %v596_v50  ;;  %v4623_v50 = vpack.c.bf16 %v619_v29, %v611_v28  ;;  %v6554_v52 = vld [vmem:[%s6412_s23 + $0x108] sm:$0xff]  ;;  %v4625_v53 = vpack.c.bf16 %v382_v36, %v374_v31  ;;  %v2996_v55 = vld [vmem:[#allocation8 + $0xa8] sm:$0xff] }
 0x106   : > { %v3003_v29 = vld [vmem:[#allocation8 + $0xe0] sm:$0xff]  ;;  %v3008_v36 = vld [vmem:[#allocation8 + $0x108] sm:$0xff] }
 0x107   : > { %792 = vmatmul.mubr.f32.gmra.mrb[20].mxu1 %v6510_v0  ;;  %4762 = vmatprep.subr.bf16.mxu0 %v4761_v58  ;;  %v2998_v58 = vld [vmem:[#allocation8 + $0xb8] sm:$0xff] }
 0x108   : > { %797 = vmatprep.mubr.f32.mxu1 %v6514_v2  ;;  %4604 = vmatpush1.bf16.msra.mxu1 %v4603_v4  ;;  %v6538_v4 = vld [vmem:[%s6412_s23 + $0xe8] sm:$0xff]  ;;  %v4773_v60 = vpack.c.bf16 %v2998_v58, %v2996_v55  ;;  %v3012_v58 = vld [vmem:[#allocation8 + $0x128] sm:$0xff] }
 0x109   : > { %4606 = vmatprep.subr.bf16.mxu1 %v4605_v7  ;;  %v603_v7 = vld [vmem:[#allocation5 + $0x750] sm:$0xff]  ;;  %4764 = vmatpush1.bf16.msra.mxu0 %v4763_v63  ;;  %v2997_v63 = vld [vmem:[#allocation8 + $0xb0] sm:$0xff]  ;;  %v6586_v55 = vld [vmem:[%s6412_s23 + $0x148] sm:$0xff] }
 0x10a   : > { %4766 = vmatprep.subr.bf16.mxu0 %v4765_v15  ;;  %v4779_v15 = vpack.c.bf16 %v3001_v14, %v2999_v13  ;;  %v3016_v13 = vld [vmem:[#allocation8 + $0x148] sm:$0xff]  ;;  %v3018_v14 = vld [vmem:[#allocation8 + $0x158] sm:$0xff] }
 0x10b   : > { %798 = vmatmul.mubr.f32.gmra.mrb[22].mxu1 %v6518_v18 }
 0x10c   : > { %803 = vmatprep.mubr.f32.mxu1 %v6522_v21  ;;  %4608 = vmatpush1.bf16.msra.mxu1 %v4607_v22  ;;  %v6542_v22 = vld [vmem:[%s6412_s23 + $0xe0] sm:$0xff] }
 0x10d   : > { %4610 = vmatprep.subr.bf16.mxu1 %v4609_v26  ;;  %v4619_v26 = vpack.c.bf16 %v603_v7, %v595_v6  ;;  %4768 = vmatpush1.bf16.msra.mxu0 %v4767_v23  ;;  %v6559_v6 = vld [vmem:[%s6412_s23 + $0x100] sm:$0xff]  ;;  %v6562_v7 = vld [vmem:[%s6412_s23 + $0x118] sm:$0xff]  ;;  %v3004_v23 = vld [vmem:[#allocation8 + $0xe8] sm:$0xff] }
 0x10e   : > { %4770 = vmatprep.subr.bf16.mxu0 %v4769_v38  ;;  %v3010_v38 = vld [vmem:[#allocation8 + $0x118] sm:$0xff] }
 0x10f   : > { %804 = vmatmul.mubr.f32.gmra.mrb[24].mxu1 %v6526_v37 }
 0x110   : > { %809 = vmatprep.mubr.f32.mxu1 %v6530_v39  ;;  %4612 = vmatpush1.bf16.msra.mxu1 %v4611_v42  ;;  %v2991_v42 = vld [vmem:[#allocation8 + $0x80] sm:$0xff] }
 0x111   : > { %4614 = vmatprep.subr.bf16.mxu1 %v4613_v48  ;;  %v4771_v47 = vpack.c.bf16 %v2993_v45, %v2991_v42  ;;  %v6551_v48 = vld [vmem:[%s6412_s23 + $0xf0] sm:$0xff]  ;;  %v4785_v42 = vpack.c.bf16 %v3010_v38, %v3008_v36  ;;  %v3007_v45 = vld [vmem:[#allocation8 + $0x100] sm:$0xff]  ;;  %v3022_v36 = vld [vmem:[#allocation8 + $0x178] sm:$0xff] }
 0x113   : > { %810 = vmatmul.mubr.f32.gmra.mrb[26].mxu1 %v6534_v62  ;;  %4772 = vmatpush1.bf16.msra.mxu0 %v4771_v47  ;;  %v3009_v47 = vld [vmem:[#allocation8 + $0x110] sm:$0xff] }
 0x114   : > { %815 = vmatprep.mubr.f32.mxu1 %v6538_v4  ;;  %4616 = vmatpush1.bf16.msra.mxu1 %v4615_v5  ;;  %v4775_v5 = vpack.c.bf16 %v2997_v63, %v2995_v61  ;;  %v3011_v63 = vld [vmem:[#allocation8 + $0x120] sm:$0xff] }
 0x115   : > { %4618 = vmatprep.subr.bf16.mxu1 %v4617_v8  ;;  %4774 = vmatprep.subr.bf16.mxu0 %v4773_v60  ;;  %v3000_v8 = vld [vmem:[#allocation8 + $0xc8] sm:$0xff]  ;;  %v3014_v60 = vld [vmem:[#allocation8 + $0x138] sm:$0xff] }
 0x116   : > { %v4777_v12 = vpack.c.bf16 %v3002_v10, %v3000_v8  ;;  %v4789_v61 = vpack.c.bf16 %v3014_v60, %v3012_v58  ;;  %v6591_v10 = vld [vmem:[%s6412_s23 + $0x140] sm:$0xff]  ;;  %v6610_v58 = vld [vmem:[%s6412_s23 + $0x178] sm:$0xff]  ;;  %v3024_v60 = vld [vmem:[#allocation8 + $0x188] sm:$0xff] }
 0x117   : > { %816 = vmatmul.mubr.f32.gmra.mrb[28].mxu1 %v6542_v22  ;;  %4776 = vmatpush1.bf16.msra.mxu0 %v4775_v5  ;;  %v3013_v5 = vld [vmem:[#allocation8 + $0x130] sm:$0xff] }
 0x118   : > { %821 = vmatprep.mubr.f32.mxu1 %v6546_v24  ;;  %4620 = vmatpush1.bf16.msra.mxu1 %v4619_v26  ;;  %v3006_v26 = vld [vmem:[#allocation8 + $0xf8] sm:$0xff]  ;;  %v4791_v8 = vpack.c.bf16 %v3013_v5, %v3011_v63  ;;  %v3023_v5 = vld [vmem:[#allocation8 + $0x180] sm:$0xff] }
 0x119   : > { %4622 = vmatprep.subr.bf16.mxu1 %v4621_v30  ;;  %4778 = vmatprep.subr.bf16.mxu0 %v4777_v12  ;;  %v4781_v28 = vpack.c.bf16 %v3006_v26, %v3004_v23  ;;  %v3005_v30 = vld [vmem:[#allocation8 + $0xf0] sm:$0xff]  ;;  %v3015_v23 = vld [vmem:[#allocation8 + $0x140] sm:$0xff] }
 0x11a   : > { %v4783_v31 = vpack.c.bf16 %v3005_v30, %v3003_v29  ;;  %v6594_v12 = vld [vmem:[%s6412_s23 + $0x158] sm:$0xff]  ;;  %v6599_v29 = vld [vmem:[%s6412_s23 + $0x150] sm:$0xff]  ;;  %v6602_v30 = vld [vmem:[%s6412_s23 + $0x168] sm:$0xff] }
 0x11b   : > { %822 = vmatmul.mubr.f32.gmra.mrb[30].mxu1 %v6551_v48  ;;  %4780 = vmatpush1.bf16.msra.mxu0 %v4779_v15  ;;  %v4793_v15 = vpack.c.bf16 %v3018_v14, %v3016_v13  ;;  %v3017_v26 = vld [vmem:[#allocation8 + $0x150] sm:$0xff]  ;;  %v6615_v14 = vld [vmem:[%s6412_s23 + $0x170] sm:$0xff] }
 0x11c   : > { %827 = vmatprep.mubr.f32.mxu1 %v6554_v52  ;;  %4624 = vmatpush1.bf16.msra.mxu1 %v4623_v50  ;;  %v4787_v50 = vpack.c.bf16 %v3009_v47, %v3007_v45  ;;  %v3021_v45 = vld [vmem:[#allocation8 + $0x170] sm:$0xff] }
 0x11d   : > { %4626 = vmatprep.subr.bf16.mxu1 %v4625_v53  ;;  %4782 = vmatprep.subr.bf16.mxu0 %v4781_v28  ;;  %v6583_v53 = vld [vmem:[%s6412_s23 + $0x130] sm:$0xff]  ;;  %v4795_v28 = vpack.c.bf16 %v3017_v26, %v3015_v23  ;;  %v3030_v26 = vld [vmem:[#allocation8 + $0x1b8] sm:$0xff] }
 0x11e   : > { %v3028_v23 = vld [vmem:[#allocation8 + $0x1a8] sm:$0xff] }
 0x11f   : > { %828 = vmatmul.mubr.f32.gmra.mrb[32].mxu1 %v6559_v6  ;;  %4784 = vmatpush1.bf16.msra.mxu0 %v4783_v31  ;;  %v3020_v31 = vld [vmem:[#allocation8 + $0x168] sm:$0xff] }
 0x120   : > { %833 = vmatprep.mubr.f32.mxu1 %v6562_v7  ;;  %4786 = vmatprep.subr.bf16.mxu0 %v4785_v42  ;;  %v4797_v38 = vpack.c.bf16 %v3022_v36, %v3020_v31  ;;  %v3019_v42 = vld [vmem:[#allocation8 + $0x160] sm:$0xff]  ;;  %v3029_v36 = vld [vmem:[#allocation8 + $0x1b0] sm:$0xff] }
 0x121   : > { %v4799_v47 = vpack.c.bf16 %v3021_v45, %v3019_v42  ;;  %v3027_v31 = vld [vmem:[#allocation8 + $0x1a0] sm:$0xff]  ;;  %v6623_v42 = vld [vmem:[%s6412_s23 + $0x180] sm:$0xff]  ;;  %v6626_v45 = vld [vmem:[%s6412_s23 + $0x198] sm:$0xff] }
 0x122   : > { %8603 = vst [vmem:[#allocation18_spill] sm:$0xff] %v6623_v42  ;;  %8604 = vst [vmem:[#allocation19_spill] sm:$0xff] %v6626_v45 }
 0x123   : > { %834 = vmatmul.mubr.f32.gmra.mrb[34].mxu1 %v6567_v16  ;;  %4788 = vmatpush1.bf16.msra.mxu0 %v4787_v50  ;;  %v6607_v50 = vld [vmem:[%s6412_s23 + $0x160] sm:$0xff] }
 0x124   : > { %839 = vmatprep.mubr.f32.mxu1 %v6570_v20  ;;  %4790 = vmatprep.subr.bf16.mxu0 %v4789_v61  ;;  %v3026_v61 = vld [vmem:[#allocation8 + $0x198] sm:$0xff] }
 0x125   : > { %v4801_v63 = vpack.c.bf16 %v3026_v61, %v3024_v60  ;;  %v3034_v60 = vld [vmem:[#allocation8 + $0x1d8] sm:$0xff] }
 0x127   : > { %840 = vmatmul.mubr.f32.gmra.mrb[36].mxu1 %v6575_v32  ;;  %4792 = vmatpush1.bf16.msra.mxu0 %v4791_v8  ;;  %v3025_v8 = vld [vmem:[#allocation8 + $0x190] sm:$0xff] }
 0x128   : > { %845 = vmatprep.mubr.f32.mxu1 %v6578_v34  ;;  %4794 = vmatprep.subr.bf16.mxu0 %v4793_v15  ;;  %v4803_v13 = vpack.c.bf16 %v3025_v8, %v3023_v5  ;;  %v6618_v15 = vld [vmem:[%s6412_s23 + $0x188] sm:$0xff]  ;;  %v3033_v5 = vld [vmem:[#allocation8 + $0x1d0] sm:$0xff] }
 0x129   : > { %8602 = vst [vmem:[#allocation17_spill] sm:$0xff] %v6618_v15 }
 0x12b   : > { %846 = vmatmul.mubr.f32.gmra.mrb[38].mxu1 %v6583_v53  ;;  %4796 = vmatpush1.bf16.msra.mxu0 %v4795_v28  ;;  %v4805_v28 = vpack.c.bf16 %v3030_v26, %v3028_v23  ;;  %v6634_v23 = vld [vmem:[%s6412_s23 + $0x1a8] sm:$0xff]  ;;  %v3036_v26 = vld [vmem:[#allocation8 + $0x1e8] sm:$0xff] }
 0x12c   : > { %851 = vmatprep.mubr.f32.mxu1 %v6586_v55  ;;  %4798 = vmatprep.subr.bf16.mxu0 %v4797_v38  ;;  %v4807_v38 = vpack.c.bf16 %v3029_v36, %v3027_v31  ;;  %8606 = vst [vmem:[#allocation21_spill] sm:$0xff] %v6634_v23  ;;  %v3035_v36 = vld [vmem:[#allocation8 + $0x1e0] sm:$0xff] }
 0x12f   : > { %852 = vmatmul.mubr.f32.gmra.mrb[40].mxu1 %v6591_v10  ;;  %4800 = vmatpush1.bf16.msra.mxu0 %v4799_v47  ;;  %v3032_v47 = vld [vmem:[#allocation8 + $0x1c8] sm:$0xff] }
 0x130   : > { %857 = vmatprep.mubr.f32.mxu1 %v6594_v12  ;;  %4802 = vmatprep.subr.bf16.mxu0 %v4801_v63  ;;  %v4809_v61 = vpack.c.bf16 %v3034_v60, %v3032_v47  ;;  %v3031_v63 = vld [vmem:[#allocation8 + $0x1c0] sm:$0xff]  ;;  %v6639_v60 = vld [vmem:[%s6412_s23 + $0x1a0] sm:$0xff] }
 0x131   : > { %v4811_v8 = vpack.c.bf16 %v3033_v5, %v3031_v63  ;;  %8607 = vst [vmem:[#allocation22_spill] sm:$0xff] %v6639_v60  ;;  %v6647_v63 = vld [vmem:[%s6412_s23 + $0x1b0] sm:$0xff]  ;;  %v6650_v5 = vld [vmem:[%s6412_s23 + $0x1c8] sm:$0xff] }
 0x132   : > { %8609 = vst [vmem:[#allocation24_spill] sm:$0xff] %v6647_v63  ;;  %8610 = vst [vmem:[#allocation25_spill] sm:$0xff] %v6650_v5 }
 0x133   : > { %858 = vmatmul.mubr.f32.gmra.mrb[42].mxu1 %v6599_v29  ;;  %4804 = vmatpush1.bf16.msra.mxu0 %v4803_v13  ;;  %v6631_v13 = vld [vmem:[%s6412_s23 + $0x190] sm:$0xff] }
 0x134   : > { %863 = vmatprep.mubr.f32.mxu1 %v6602_v30  ;;  %4806 = vmatprep.subr.bf16.mxu0 %v4805_v28  ;;  %8605 = vst [vmem:[#allocation20_spill] sm:$0xff] %v6631_v13  ;;  %v3038_v28 = vld [vmem:[#allocation8 + $0x1f8] sm:$0xff] }
 0x135   : > { %v4813_v31 = vpack.c.bf16 %v3038_v28, %v3036_v26  ;;  %v6658_v26 = vld [vmem:[%s6412_s23 + $0x1d8] sm:$0xff]  ;;  %v6663_v28 = vld [vmem:[%s6412_s23 + $0x1d0] sm:$0xff] }
 0x136   : > { %8612 = vst [vmem:[#allocation27_spill] sm:$0xff] %v6658_v26  ;;  %8613 = vst [vmem:[#allocation28_spill] sm:$0xff] %v6663_v28 }
 0x137   : > { %864 = vmatmul.mubr.f32.gmra.mrb[44].mxu1 %v6607_v50  ;;  %4808 = vmatpush1.bf16.msra.mxu0 %v4807_v38  ;;  %v3037_v38 = vld [vmem:[#allocation8 + $0x1f0] sm:$0xff] }
 0x138   : > { %869 = vmatprep.mubr.f32.mxu1 %v6610_v58  ;;  %4810 = vmatprep.subr.bf16.mxu0 %v4809_v61  ;;  %v4815_v47 = vpack.c.bf16 %v3037_v38, %v3035_v36  ;;  %v6642_v61 = vld [vmem:[%s6412_s23 + $0x1b8] sm:$0xff]  ;;  %v6671_v36 = vld [vmem:[%s6412_s23 + $0x1e0] sm:$0xff] }
 0x139   : > { %8608 = vst [vmem:[#allocation23_spill] sm:$0xff] %v6642_v61  ;;  %8615 = vst [vmem:[#allocation30_spill] sm:$0xff] %v6671_v36  ;;  %v6674_v38 = vld [vmem:[%s6412_s23 + $0x1f8] sm:$0xff] }
 0x13a   : > { %8616 = vst [vmem:[#allocation31_spill] sm:$0xff] %v6674_v38 }
 0x13b   : > { %870 = vmatmul.mubr.f32.gmra.mrb[46].mxu1 %v6615_v14  ;;  %4812 = vmatpush1.bf16.msra.mxu0 %v4811_v8  ;;  %v6655_v8 = vld [vmem:[%s6412_s23 + $0x1c0] sm:$0xff] }
 0x13c   : > { %875 = vmatprep.mubr.f32.mxu1 %v6618_v15  ;;  %4814 = vmatprep.subr.bf16.mxu0 %v4813_v31  ;;  %8611 = vst [vmem:[#allocation26_spill] sm:$0xff] %v6655_v8  ;;  %v6666_v31 = vld [vmem:[%s6412_s23 + $0x1e8] sm:$0xff] }
 0x13d   : > { %8614 = vst [vmem:[#allocation29_spill] sm:$0xff] %v6666_v31  ;;  %v422_v15 = vld [vmem:[#allocation5 + $0x1a8] sm:$0xff] }
 0x13f   : > { %876 = vmatmul.mubr.f32.gmra.mrb[48].mxu1 %v6623_v42  ;;  %4816 = vmatpush1.bf16.msra.mxu0 %v4815_v47  ;;  %v3040_v47 = vld [vmem:[#allocation8 + $0x208] sm:$0xff]  ;;  %v414_v42 = vld [vmem:[#allocation5 + $0x168] sm:$0xff] }
 0x140   : > { %881 = vmatprep.mubr.f32.mxu1 %v6626_v45  ;;  %v406_v45 = vld [vmem:[#allocation5 + $0x128] sm:$0xff] }
 0x143   : > { %882 = vmatmul.mubr.f32.gmra.mrb[50].mxu1 %v6631_v13  ;;  %v389_v13 = vld [vmem:[#allocation5 + $0xa0] sm:$0xff] }
 0x144   : > { %887 = vmatprep.mubr.f32.mxu1 %v6634_v23  ;;  %v398_v23 = vld [vmem:[#allocation5 + $0xe8] sm:$0xff] }
 0x147   : > { %888 = vmatmul.mubr.f32.gmra.mrb[52].mxu1 %v6639_v60  ;;  %v390_v60 = vld [vmem:[#allocation5 + $0xa8] sm:$0xff] }
 0x148   : > { %893 = vmatprep.mubr.f32.mxu1 %v6642_v61  ;;  %v381_v61 = vld [vmem:[#allocation5 + $0x60] sm:$0xff] }
 0x14b   : > { %894 = vmatmul.mubr.f32.gmra.mrb[54].mxu1 %v6647_v63  ;;  %v373_v63 = vld [vmem:[#allocation5 + $0x20] sm:$0xff] }
 0x14c   : > { %899 = vmatprep.mubr.f32.mxu1 %v6650_v5  ;;  %v3042_v5 = vld [vmem:[#allocation8 + $0x218] sm:$0xff] }
 0x14f   : > { %900 = vmatmul.mubr.f32.gmra.mrb[56].mxu1 %v6655_v8  ;;  %v6679_v8 = vld [vmem:[%s6412_s23 + $0x1f0] sm:$0xff] }
 0x150   : > { %905 = vmatprep.mubr.f32.mxu1 %v6658_v26  ;;  %8617 = vst [vmem:[#allocation32_spill] sm:$0xff] %v6679_v8  ;;  %v4817_v26 = vpack.c.bf16 %v3042_v5, %v3040_v47  ;;  %v4633_v47 = vpack.c.bf16 %v414_v42, %v406_v45  ;;  %v437_v45 = vld [vmem:[#allocation5 + $0x220] sm:$0xff] }
 0x152   : > { %4818 = vmatprep.subr.bf16.mxu0 %v4817_v26  ;;  %v413_v26 = vld [vmem:[#allocation5 + $0x160] sm:$0xff] }
 0x153   : > { %906 = vmatmul.mubr.f32.gmra.mrb[58].mxu1 %v6663_v28  ;;  %v4629_v28 = vpack.c.bf16 %v398_v23, %v390_v60  ;;  %v421_v60 = vld [vmem:[#allocation5 + $0x1a0] sm:$0xff] }
 0x154   : > { %911 = vmatprep.mubr.f32.mxu1 %v6666_v31  ;;  %v4627_v31 = vpack.c.bf16 %v381_v61, %v373_v63  ;;  %v438_v61 = vld [vmem:[#allocation5 + $0x228] sm:$0xff] }
 0x155   : > { %v446_v63 = vld [vmem:[#allocation5 + $0x268] sm:$0xff] }
 0x156   : > { %v4641_v42 = vpack.c.bf16 %v446_v63, %v438_v61  ;;  %v501_v63 = vld [vmem:[#allocation5 + $0x420] sm:$0xff] }
 0x157   : > { %912 = vmatmul.mubr.f32.gmra.mrb[60].mxu1 %v6671_v36  ;;  %v397_v36 = vld [vmem:[#allocation5 + $0xe0] sm:$0xff] }
 0x158   : > { %917 = vmatprep.mubr.f32.mxu1 %v6674_v38  ;;  %v4631_v5 = vpack.c.bf16 %v397_v36, %v389_v13  ;;  %v405_v38 = vld [vmem:[#allocation5 + $0x120] sm:$0xff]  ;;  %v454_v13 = vld [vmem:[#allocation5 + $0x2a8] sm:$0xff] }
 0x15b   : > { %918 = vmatmul.mubr.f32.gmra.mrb[62].mxu1 %v6679_v8  ;;  %v430_v8 = vld [vmem:[#allocation5 + $0x1e8] sm:$0xff] }
 0x15c   : > { %988 = vmatprep.mubr.f32.mxu1 %v6427_v41  ;;  %v4635_v41 = vpack.c.bf16 %v413_v26, %v405_v38  ;;  %v4637_v23 = vpack.c.bf16 %v430_v8, %v422_v15 }
 0x15f   : > { %989 = vmatmul.mubr.f32.vlgmr.msra.gmra.mrb[64].mxu1 %v6431_v40  ;;  %v429_v40 = vld [vmem:[#allocation5 + $0x1e0] sm:$0xff] }
 0x160   : > { %4628 = vmatpush1.bf16.msra.mxu1 %v4627_v31  ;;  %994 = vmatprep.mubr.f32.mxu1 %v6434_v43  ;;  %v4639_v43 = vpack.c.bf16 %v429_v40, %v421_v60  ;;  %v470_v31 = vld [vmem:[#allocation5 + $0x328] sm:$0xff] }
 0x161   : > { %4630 = vmatprep.subr.bf16.mxu1 %v4629_v28  ;;  %v453_v28 = vld [vmem:[#allocation5 + $0x2a0] sm:$0xff]  ;;  %v502_v60 = vld [vmem:[#allocation5 + $0x428] sm:$0xff] }
 0x163   : > { %995 = vmatmul.mubr.f32.gmra.mrb[66].mxu1 %v6439_v49  ;;  %v445_v49 = vld [vmem:[#allocation5 + $0x260] sm:$0xff] }
 0x164   : > { %1000 = vmatprep.mubr.f32.mxu1 %v6442_v51  ;;  %4632 = vmatpush1.bf16.msra.mxu1 %v4631_v5  ;;  %v462_v51 = vld [vmem:[#allocation5 + $0x2e8] sm:$0xff]  ;;  %v4643_v15 = vpack.c.bf16 %v445_v49, %v437_v45  ;;  %v469_v5 = vld [vmem:[#allocation5 + $0x320] sm:$0xff] }
 0x165   : > { %4634 = vmatprep.subr.bf16.mxu1 %v4633_v47  ;;  %v4645_v8 = vpack.c.bf16 %v462_v51, %v454_v13  ;;  %v486_v47 = vld [vmem:[#allocation5 + $0x3a8] sm:$0xff]  ;;  %v517_v49 = vld [vmem:[#allocation5 + $0x4a0] sm:$0xff] }
 0x166   : > { %v534_v13 = vld [vmem:[#allocation5 + $0x528] sm:$0xff] }
 0x167   : > { %1001 = vmatmul.mubr.f32.gmra.mrb[68].mxu1 %v6447_v57  ;;  %v461_v57 = vld [vmem:[#allocation5 + $0x2e0] sm:$0xff] }
 0x168   : > { %1006 = vmatprep.mubr.f32.mxu1 %v6450_v59  ;;  %4636 = vmatpush1.bf16.msra.mxu1 %v4635_v41  ;;  %v478_v59 = vld [vmem:[#allocation5 + $0x368] sm:$0xff]  ;;  %v4647_v36 = vpack.c.bf16 %v461_v57, %v453_v28 }
 0x169   : > { %4638 = vmatprep.subr.bf16.mxu1 %v4637_v23  ;;  %v4649_v38 = vpack.c.bf16 %v478_v59, %v470_v31  ;;  %v485_v23 = vld [vmem:[#allocation5 + $0x3a0] sm:$0xff]  ;;  %v550_v28 = vld [vmem:[#allocation5 + $0x5a8] sm:$0xff] }
 0x16a   : > { %v549_v59 = vld [vmem:[#allocation5 + $0x5a0] sm:$0xff] }
 0x16b   : > { %1007 = vmatmul.mubr.f32.gmra.mrb[70].mxu1 %v6455_v1  ;;  %v477_v1 = vld [vmem:[#allocation5 + $0x360] sm:$0xff] }
 0x16c   : > { %1012 = vmatprep.mubr.f32.mxu1 %v6458_v3  ;;  %4640 = vmatpush1.bf16.msra.mxu1 %v4639_v43  ;;  %v494_v3 = vld [vmem:[#allocation5 + $0x3e8] sm:$0xff]  ;;  %v4651_v26 = vpack.c.bf16 %v477_v1, %v469_v5  ;;  %v565_v1 = vld [vmem:[#allocation5 + $0x620] sm:$0xff] }
 0x16d   : > { %4642 = vmatprep.subr.bf16.mxu1 %v4641_v42  ;;  %v4653_v41 = vpack.c.bf16 %v494_v3, %v486_v47  ;;  %v518_v43 = vld [vmem:[#allocation5 + $0x4a8] sm:$0xff] }
 0x16e   : > { %v582_v47 = vld [vmem:[#allocation5 + $0x6a8] sm:$0xff] }
 0x16f   : > { %1013 = vmatmul.mubr.f32.gmra.mrb[72].mxu1 %v6463_v9  ;;  %v493_v9 = vld [vmem:[#allocation5 + $0x3e0] sm:$0xff] }
 0x170   : > { %1018 = vmatprep.mubr.f32.mxu1 %v6466_v11  ;;  %4644 = vmatpush1.bf16.msra.mxu1 %v4643_v15  ;;  %v510_v11 = vld [vmem:[#allocation5 + $0x468] sm:$0xff]  ;;  %v4655_v40 = vpack.c.bf16 %v493_v9, %v485_v23 }
 0x171   : > { %4646 = vmatprep.subr.bf16.mxu1 %v4645_v8  ;;  %v4657_v61 = vpack.c.bf16 %v510_v11, %v502_v60  ;;  %v533_v8 = vld [vmem:[#allocation5 + $0x520] sm:$0xff]  ;;  %v598_v23 = vld [vmem:[#allocation5 + $0x728] sm:$0xff] }
 0x172   : > { %v597_v11 = vld [vmem:[#allocation5 + $0x720] sm:$0xff] }
 0x173   : > { %1019 = vmatmul.mubr.f32.gmra.mrb[74].mxu1 %v6471_v17  ;;  %v509_v17 = vld [vmem:[#allocation5 + $0x460] sm:$0xff] }
 0x174   : > { %1024 = vmatprep.mubr.f32.mxu1 %v6474_v19  ;;  %4648 = vmatpush1.bf16.msra.mxu1 %v4647_v36  ;;  %v526_v19 = vld [vmem:[#allocation5 + $0x4e8] sm:$0xff]  ;;  %v4659_v42 = vpack.c.bf16 %v509_v17, %v501_v63  ;;  %v613_v17 = vld [vmem:[#allocation5 + $0x7a0] sm:$0xff] }
 0x175   : > { %4650 = vmatprep.subr.bf16.mxu1 %v4649_v38  ;;  %v4661_v45 = vpack.c.bf16 %v526_v19, %v518_v43  ;;  %v566_v36 = vld [vmem:[#allocation5 + $0x628] sm:$0xff]  ;;  %v376_v43 = vld [vmem:[#allocation5 + $0x38] sm:$0xff] }
 0x177   : > { %1025 = vmatmul.mubr.f32.gmra.mrb[76].mxu1 %v6479_v25  ;;  %v525_v25 = vld [vmem:[#allocation5 + $0x4e0] sm:$0xff] }
 0x178   : > { %1030 = vmatprep.mubr.f32.mxu1 %v6482_v27  ;;  %4652 = vmatpush1.bf16.msra.mxu1 %v4651_v26  ;;  %v542_v27 = vld [vmem:[#allocation5 + $0x568] sm:$0xff]  ;;  %v4663_v51 = vpack.c.bf16 %v525_v25, %v517_v49 }
 0x179   : > { %4654 = vmatprep.subr.bf16.mxu1 %v4653_v41  ;;  %v4665_v15 = vpack.c.bf16 %v542_v27, %v534_v13  ;;  %v581_v41 = vld [vmem:[#allocation5 + $0x6a0] sm:$0xff] }
 0x17b   : > { %1031 = vmatmul.mubr.f32.gmra.mrb[78].mxu1 %v6487_v33  ;;  %v541_v33 = vld [vmem:[#allocation5 + $0x560] sm:$0xff] }
 0x17c   : > { %1036 = vmatprep.mubr.f32.mxu1 %v6490_v35  ;;  %4656 = vmatpush1.bf16.msra.mxu1 %v4655_v40  ;;  %v558_v35 = vld [vmem:[#allocation5 + $0x5e8] sm:$0xff]  ;;  %v4667_v57 = vpack.c.bf16 %v541_v33, %v533_v8 }
 0x17d   : > { %4658 = vmatprep.subr.bf16.mxu1 %v4657_v61  ;;  %v4669_v31 = vpack.c.bf16 %v558_v35, %v550_v28  ;;  %v614_v40 = vld [vmem:[#allocation5 + $0x7a8] sm:$0xff]  ;;  %v8619_v28 = vld [vmem:[#allocation18_spill] sm:$0xff]  ;;  %v8620_v35 = vld [vmem:[#allocation19_spill] sm:$0xff] }
 0x17f   : > { %1037 = vmatmul.mubr.f32.gmra.mrb[80].mxu1 %v6495_v44  ;;  %v557_v44 = vld [vmem:[#allocation5 + $0x5e0] sm:$0xff] }
 0x180   : > { %1042 = vmatprep.mubr.f32.mxu1 %v6498_v46  ;;  %4660 = vmatpush1.bf16.msra.mxu1 %v4659_v42  ;;  %v574_v46 = vld [vmem:[#allocation5 + $0x668] sm:$0xff]  ;;  %v4671_v38 = vpack.c.bf16 %v557_v44, %v549_v59 }
 0x181   : > { %4662 = vmatprep.subr.bf16.mxu1 %v4661_v45  ;;  %v4673_v5 = vpack.c.bf16 %v574_v46, %v566_v36 }
 0x183   : > { %1043 = vmatmul.mubr.f32.gmra.mrb[82].mxu1 %v6503_v54  ;;  %v573_v54 = vld [vmem:[#allocation5 + $0x660] sm:$0xff] }
 0x184   : > { %1048 = vmatprep.mubr.f32.mxu1 %v6506_v56  ;;  %4664 = vmatpush1.bf16.msra.mxu1 %v4663_v51  ;;  %v590_v56 = vld [vmem:[#allocation5 + $0x6e8] sm:$0xff]  ;;  %v4675_v3 = vpack.c.bf16 %v573_v54, %v565_v1 }
 0x185   : > { %4666 = vmatprep.subr.bf16.mxu1 %v4665_v15  ;;  %v4677_v26 = vpack.c.bf16 %v590_v56, %v582_v47  ;;  %v8621_v47 = vld [vmem:[#allocation20_spill] sm:$0xff] }
 0x187   : > { %1049 = vmatmul.mubr.f32.gmra.mrb[84].mxu1 %v6510_v0  ;;  %v589_v0 = vld [vmem:[#allocation5 + $0x6e0] sm:$0xff] }
 0x188   : > { %1054 = vmatprep.mubr.f32.mxu1 %v6514_v2  ;;  %4668 = vmatpush1.bf16.msra.mxu1 %v4667_v57  ;;  %v606_v2 = vld [vmem:[#allocation5 + $0x768] sm:$0xff]  ;;  %v4679_v9 = vpack.c.bf16 %v589_v0, %v581_v41  ;;  %v3046_v41 = vld [vmem:[#allocation8 + $0x238] sm:$0xff] }
 0x189   : > { %4670 = vmatprep.subr.bf16.mxu1 %v4669_v31  ;;  %v4681_v60 = vpack.c.bf16 %v606_v2, %v598_v23  ;;  %v8622_v2 = vld [vmem:[#allocation21_spill] sm:$0xff] }
 0x18b   : > { %1055 = vmatmul.mubr.f32.gmra.mrb[86].mxu1 %v6518_v18  ;;  %v605_v18 = vld [vmem:[#allocation5 + $0x760] sm:$0xff] }
 0x18c   : > { %1060 = vmatprep.mubr.f32.mxu1 %v6522_v21  ;;  %4672 = vmatpush1.bf16.msra.mxu1 %v4671_v38  ;;  %v622_v21 = vld [vmem:[#allocation5 + $0x7e8] sm:$0xff]  ;;  %v4683_v61 = vpack.c.bf16 %v605_v18, %v597_v11 }
 0x18d   : > { %4674 = vmatprep.subr.bf16.mxu1 %v4673_v5  ;;  %v4685_v63 = vpack.c.bf16 %v622_v21, %v614_v40  ;;  %v3039_v38 = vld [vmem:[#allocation8 + $0x200] sm:$0xff]  ;;  %v3041_v5 = vld [vmem:[#allocation8 + $0x210] sm:$0xff] }
 0x18e   : > { %v4819_v18 = vpack.c.bf16 %v3041_v5, %v3039_v38  ;;  %v8626_v38 = vld [vmem:[#allocation25_spill] sm:$0xff] }
 0x18f   : > { %1061 = vmatmul.mubr.f32.gmra.mrb[88].mxu1 %v6526_v37  ;;  %v621_v37 = vld [vmem:[#allocation5 + $0x7e0] sm:$0xff] }
 0x190   : > { %1066 = vmatprep.mubr.f32.mxu1 %v6530_v39  ;;  %4676 = vmatpush1.bf16.msra.mxu1 %v4675_v3  ;;  %v384_v39 = vld [vmem:[#allocation5 + $0x78] sm:$0xff]  ;;  %v4687_v19 = vpack.c.bf16 %v621_v37, %v613_v17 }
 0x191   : > { %4678 = vmatprep.subr.bf16.mxu1 %v4677_v26  ;;  %v4689_v42 = vpack.c.bf16 %v384_v39, %v376_v43  ;;  %v3044_v26 = vld [vmem:[#allocation8 + $0x228] sm:$0xff]  ;;  %v3043_v43 = vld [vmem:[#allocation8 + $0x220] sm:$0xff]  ;;  %v3045_v39 = vld [vmem:[#allocation8 + $0x230] sm:$0xff] }
 0x192   : > { %v4821_v37 = vpack.c.bf16 %v3046_v41, %v3044_v26 }
 0x193   : > { %1067 = vmatmul.mubr.f32.gmra.mrb[90].mxu1 %v6534_v62  ;;  %v627_v62 = vlaneseq }
 0x194   : > { %1072 = vmatprep.mubr.f32.mxu1 %v6538_v4  ;;  %4680 = vmatpush1.bf16.msra.mxu1 %v4679_v9 }
 0x195   : > { %4682 = vmatprep.subr.bf16.mxu1 %v4681_v60  ;;  %v6720_v4 = vshrl.u32 %v627_v62, 7 }
 0x197   : > { %1073 = vmatmul.mubr.f32.gmra.mrb[92].mxu1 %v6542_v22  ;;  %v629_v22 = vsub.s32 0, %v6720_v4 }
 0x198   : > { %1078 = vmatprep.mubr.f32.mxu1 %v6546_v24  ;;  %4684 = vmatpush1.bf16.msra.mxu1 %v4683_v61  ;;  %v625_v24 = vld [vmem:[#allocation7] sm:$0xff] }
 0x199   : > { %4686 = vmatprep.subr.bf16.mxu1 %v4685_v63 }
 0x19b   : > { %1079 = vmatmul.mubr.f32.gmra.mrb[94].mxu1 %v6551_v48  ;;  %v633_v48 = vsub.s32 1, %v6720_v4 }
 0x19c   : > { %1084 = vmatprep.mubr.f32.mxu1 %v6554_v52  ;;  %4688 = vmatpush1.bf16.msra.mxu1 %v4687_v19  ;;  %v6730_v52 = vrot.slane %v625_v24, %v629_v22 }
 0x19d   : > { %4690 = vmatprep.subr.bf16.mxu1 %v4689_v42 }
 0x19f   : > { %1085 = vmatmul.mubr.f32.gmra.mrb[96].mxu1 %v6559_v6  ;;  %v6735_v6 = vrot.slane %v625_v24, %v633_v48 }
 0x1a0   : > { %1090 = vmatprep.mubr.f32.mxu1 %v6562_v7 }
 0x1a3   : > { %1091 = vmatmul.mubr.f32.gmra.mrb[98].mxu1 %v6567_v16 }
 0x1a4   : > { %1096 = vmatprep.mubr.f32.mxu1 %v6570_v20 }
 0x1a7   : > { %1097 = vmatmul.mubr.f32.gmra.mrb[100].mxu1 %v6575_v32 }
 0x1a8   : > { %1102 = vmatprep.mubr.f32.mxu1 %v6578_v34 }
 0x1ab   : > { %1103 = vmatmul.mubr.f32.gmra.mrb[102].mxu1 %v6583_v53 }
 0x1ac   : > { %1108 = vmatprep.mubr.f32.mxu1 %v6586_v55 }
 0x1af   : > { %1109 = vmatmul.mubr.f32.gmra.mrb[104].mxu1 %v6591_v10 }
 0x1b0   : > { %1114 = vmatprep.mubr.f32.mxu1 %v6594_v12 }
 0x1b2   : > { %v733_v7 = vpop.f32.mrb[0].mxu1 }
 0x1b3   : > { %v734_v16 = vadd.f32 %v733_v7, %v6730_v52  ;;  %v735_v20 = vpop.f32.mrb[1].mxu1  ;;  %1115 = vmatmul.mubr.f32.gmra.mrb[106].mxu1 %v6599_v29  ;;  %v8623_v7 = vld [vmem:[#allocation22_spill] sm:$0xff] }
 0x1b4   : > { %v736_v32 = vadd.f32 %v735_v20, %v6735_v6  ;;  %1120 = vmatprep.mubr.f32.mxu1 %v6602_v30  ;;  %v3050_v20 = vld [vmem:[#allocation8 + $0x258] sm:$0xff] }
 0x1b5   : > { %v1951_v34 = vmul.f32 0.70710677, %v734_v16  ;;  %v1695_v0 = vmul.f32 0.5, %v734_v16  ;;  %v3048_v16 = vld [vmem:[#allocation8 + $0x248] sm:$0xff] }
 0x1b6   : > { %v1952_v53 = vmul.f32 0.70710677, %v736_v32  ;;  %v739_v55 = vpop.f32.mrb[2].mxu1  ;;  %v1696_v56 = vmul.f32 0.5, %v736_v32 }
 0x1b7   : > { %5343 = verf.f32 %v1951_v34  ;;  %v6742_v10 = vadd.f32 %v739_v55, %v6730_v52  ;;  %v741_v12 = vpop.f32.mrb[3].mxu1  ;;  %1121 = vmatmul.mubr.f32.gmra.mrb[108].mxu1 %v6607_v50  ;;  %v8618_v50 = vld [vmem:[#allocation17_spill] sm:$0xff] }
 0x1b8   : > { %5345 = verf.f32 %v1952_v53  ;;  %v742_v45 = vadd.f32 %v741_v12, %v6735_v6  ;;  %1126 = vmatprep.mubr.f32.mxu1 %v6610_v58  ;;  %v8624_v53 = vld [vmem:[#allocation23_spill] sm:$0xff] }
 0x1b9   : > { %v1959_v29 = vmul.f32 0.70710677, %v6742_v10  ;;  %v1703_v32 = vmul.f32 0.5, %v6742_v10  ;;  %v4825_v10 = vpack.c.bf16 %v3050_v20, %v3048_v16 }
 0x1ba   : > { %v1960_v49 = vmul.f32 0.70710677, %v742_v45  ;;  %v745_v25 = vpop.f32.mrb[4].mxu1  ;;  %v1704_v19 = vmul.f32 0.5, %v742_v45 }
 0x1bb   : > { %5347 = verf.f32 %v1959_v29  ;;  %v6749_v30 = vadd.f32 %v745_v25, %v6730_v52  ;;  %v747_v13 = vpop.f32.mrb[5].mxu1  ;;  %1127 = vmatmul.mubr.f32.gmra.mrb[110].mxu1 %v6615_v14  ;;  %v4823_v29 = vpack.c.bf16 %v3045_v39, %v3043_v43  ;;  %v8628_v43 = vld [vmem:[#allocation27_spill] sm:$0xff] }
 0x1bc   : > { %5349 = verf.f32 %v1960_v49  ;;  %v6753_v27 = vadd.f32 %v747_v13, %v6735_v6  ;;  %1132 = vmatprep.mubr.f32.mxu1 %v8618_v50 }
 0x1bd   : > { %v1967_v51 = vmul.f32 0.70710677, %v6749_v30 }
 0x1be   : > { %v1968_v58 = vmul.f32 0.70710677, %v6753_v27  ;;  %v751_v15 = vpop.f32.mrb[6].mxu1 }
 0x1bf   : > { %5351 = verf.f32 %v1967_v51  ;;  %v6759_v8 = vadd.f32 %v751_v15, %v6730_v52  ;;  %v753_v33 = vpop.f32.mrb[7].mxu1  ;;  %1133 = vmatmul.mubr.f32.gmra.mrb[112].mxu1 %v8619_v28  ;;  %v3049_v15 = vld [vmem:[#allocation8 + $0x250] sm:$0xff] }
 0x1c0   : > { %5353 = verf.f32 %v1968_v58  ;;  %v6763_v14 = vadd.f32 %v753_v33, %v6735_v6  ;;  %1138 = vmatprep.mubr.f32.mxu1 %v8620_v35  ;;  %v3047_v58 = vld [vmem:[#allocation8 + $0x240] sm:$0xff]  ;;  %v1712_v33 = vmul.f32 0.5, %v6753_v27 }
 0x1c1   : > { %v5344_v57 = vpop.eup %5343  ;;  %v1975_v31 = vmul.f32 0.70710677, %v6759_v8 }
 0x1c2   : > { %v5346_v59 = vpop.eup %5345  ;;  %v2463_v44 = vadd.f32 1.0, %v5344_v57  ;;  %v1976_v36 = vmul.f32 0.70710677, %v6763_v14  ;;  %v757_v46 = vpop.f32.mrb[8].mxu1 }
 0x1c3   : > { %5355 = verf.f32 %v1975_v31  ;;  %v6769_v1 = vadd.f32 %v757_v46, %v6730_v52  ;;  %v759_v54 = vpop.f32.mrb[9].mxu1  ;;  %1139 = vmatmul.mubr.f32.gmra.mrb[114].mxu1 %v8621_v47  ;;  %v2464_v3 = vadd.f32 1.0, %v5346_v59  ;;  %v8625_v31 = vld [vmem:[#allocation24_spill] sm:$0xff]  ;;  %v3052_v59 = vld [vmem:[#allocation8 + $0x268] sm:$0xff]  ;;  %v4827_v47 = vpack.c.bf16 %v3049_v15, %v3047_v58  ;;  %v8630_v58 = vld [vmem:[#allocation29_spill] sm:$0xff] }
 0x1c4   : > { %5357 = verf.f32 %v1976_v36  ;;  %v6773_v23 = vadd.f32 %v759_v54, %v6735_v6  ;;  %1144 = vmatprep.mubr.f32.mxu1 %v8622_v2  ;;  %v2719_v17 = vmul.f32 %v2463_v44, %v1695_v0  ;;  %v3054_v44 = vld [vmem:[#allocation8 + $0x278] sm:$0xff]  ;;  %v1711_v36 = vmul.f32 0.5, %v6749_v30  ;;  %v3051_v2 = vld [vmem:[#allocation8 + $0x260] sm:$0xff] }
 0x1c5   : > { %v5348_v9 = vpop.eup %5347  ;;  %v1983_v60 = vmul.f32 0.70710677, %v6769_v1  ;;  %v2720_v11 = vmul.f32 %v2464_v3, %v1696_v56  ;;  %v4829_v30 = vpack.c.bf16 %v3054_v44, %v3052_v59 }
 0x1c6   : > { %v5350_v40 = vpop.eup %5349  ;;  %v2471_v21 = vadd.f32 1.0, %v5348_v9  ;;  %v1984_v61 = vmul.f32 0.70710677, %v6773_v23  ;;  %v763_v63 = vpop.f32.mrb[10].mxu1  ;;  %v3053_v9 = vld [vmem:[#allocation8 + $0x270] sm:$0xff] }
 0x1c7   : > { %v2472_v42 = vadd.f32 1.0, %v5350_v40  ;;  %5359 = verf.f32 %v1983_v60  ;;  %v6779_v62 = vadd.f32 %v763_v63, %v6730_v52  ;;  %v765_v24 = vpop.f32.mrb[11].mxu1  ;;  %1145 = vmatmul.mubr.f32.gmra.mrb[116].mxu1 %v8623_v7  ;;  %3307 = vmatprep.mubr.f32.mxu0 %v2720_v11  ;;  %v1720_v60 = vmul.f32 0.5, %v6763_v14  ;;  %v3058_v63 = vld [vmem:[#allocation8 + $0x298] sm:$0xff] }
 0x1c8   : > { %5361 = verf.f32 %v1984_v61  ;;  %v6784_v34 = vadd.f32 %v765_v24, %v6735_v6  ;;  %3308 = vmatmul.mubr.f32.vlgmr.msra.gmra.mrb[0].mxu0 %v2719_v17  ;;  %1150 = vmatprep.mubr.f32.mxu1 %v8624_v53  ;;  %v2727_v51 = vmul.f32 %v2471_v21, %v1703_v32  ;;  %v8627_v21 = vld [vmem:[#allocation26_spill] sm:$0xff]  ;;  %v1719_v17 = vmul.f32 0.5, %v6759_v8  ;;  %v3055_v53 = vld [vmem:[#allocation8 + $0x280] sm:$0xff] }
 0x1c9   : > { %v5352_v55 = vpop.eup %5351  ;;  %v1991_v12 = vmul.f32 0.70710677, %v6779_v62  ;;  %4820 = vmatpush1.bf16.msra.mxu0 %v4819_v18  ;;  %v2728_v45 = vmul.f32 %v2472_v42, %v1704_v19  ;;  %v3056_v61 = vld [vmem:[#allocation8 + $0x288] sm:$0xff]  ;;  %v4831_v42 = vpack.c.bf16 %v3053_v9, %v3051_v2  ;;  %v8632_v2 = vld [vmem:[#allocation31_spill] sm:$0xff] }
 0x1ca   : > { %v5354_v49 = vpop.eup %5353  ;;  %v2479_v25 = vadd.f32 1.0, %v5352_v55  ;;  %v1992_v13 = vmul.f32 0.70710677, %v6784_v34  ;;  %v769_v50 = vpop.f32.mrb[12].mxu1  ;;  %4822 = vmatprep.subr.bf16.mxu0 %v4821_v37  ;;  %v4833_v8 = vpack.c.bf16 %v3058_v63, %v3056_v61  ;;  %v3057_v55 = vld [vmem:[#allocation8 + $0x290] sm:$0xff] }
 0x1cb   : > { %v2480_v28 = vadd.f32 1.0, %v5354_v49  ;;  %5363 = verf.f32 %v1991_v12  ;;  %v6791_v35 = vadd.f32 %v769_v50, %v6730_v52  ;;  %v771_v57 = vpop.f32.mrb[13].mxu1  ;;  %1151 = vmatmul.mubr.f32.gmra.mrb[118].mxu1 %v8625_v31  ;;  %3313 = vmatprep.mubr.f32.mxu0 %v2728_v45  ;;  %v1728_v12 = vmul.f32 0.5, %v6773_v23  ;;  %v3062_v50 = vld [vmem:[#allocation8 + $0x2b8] sm:$0xff] }
 0x1cc   : > { %5365 = verf.f32 %v1992_v13  ;;  %v6796_v46 = vadd.f32 %v771_v57, %v6735_v6  ;;  %3314 = vmatmul.mubr.f32.gmra.mrb[2].mxu0 %v2727_v51  ;;  %1156 = vmatprep.mubr.f32.mxu1 %v8626_v38  ;;  %v2735_v0 = vmul.f32 %v2479_v25, %v1711_v36  ;;  %v8629_v25 = vld [vmem:[#allocation28_spill] sm:$0xff]  ;;  %v3060_v13 = vld [vmem:[#allocation8 + $0x2a8] sm:$0xff]  ;;  %v1727_v51 = vmul.f32 0.5, %v6769_v1  ;;  %v3059_v38 = vld [vmem:[#allocation8 + $0x2a0] sm:$0xff] }
 0x1cd   : > { %v5356_v27 = vpop.eup %5355  ;;  %v1999_v5 = vmul.f32 0.70710677, %v6791_v35  ;;  %v2736_v54 = vmul.f32 %v2480_v28, %v1712_v33  ;;  %4824 = vmatpush1.bf16.msra.mxu0 %v4823_v29  ;;  %v4835_v28 = vpack.c.bf16 %v3057_v55, %v3055_v53  ;;  %v4837_v1 = vpack.c.bf16 %v3062_v50, %v3060_v13 }
 0x1ce   : > { %v5358_v56 = vpop.eup %5357  ;;  %v2487_v3 = vadd.f32 1.0, %v5356_v27  ;;  %v2000_v26 = vmul.f32 0.70710677, %v6796_v46  ;;  %v775_v41 = vpop.f32.mrb[14].mxu1  ;;  %4826 = vmatprep.subr.bf16.mxu0 %v4825_v10  ;;  %v3061_v27 = vld [vmem:[#allocation8 + $0x2b0] sm:$0xff]  ;;  %v1743_v53 = vmul.f32 0.5, %v6791_v35 }
 0x1cf   : > { %v2488_v11 = vadd.f32 1.0, %v5358_v56  ;;  %5367 = verf.f32 %v1999_v5  ;;  %v6803_v18 = vadd.f32 %v775_v41, %v6730_v52  ;;  %v777_v40 = vpop.f32.mrb[15].mxu1  ;;  %1157 = vmatmul.mubr.f32.gmra.mrb[120].mxu1 %v8627_v21  ;;  %3319 = vmatprep.mubr.f32.mxu0 %v2736_v54  ;;  %v1736_v5 = vmul.f32 0.5, %v6784_v34  ;;  %v3066_v41 = vld [vmem:[#allocation8 + $0x2d8] sm:$0xff]  ;;  %v6854_v35 = vld [vmem:[#allocation5 + $0x178] sm:$0xff] }
 0x1d0   : > { %5369 = verf.f32 %v2000_v26  ;;  %v6808_v37 = vadd.f32 %v777_v40, %v6735_v6  ;;  %3320 = vmatmul.mubr.f32.gmra.mrb[4].mxu0 %v2735_v0  ;;  %1162 = vmatprep.mubr.f32.mxu1 %v8628_v43  ;;  %v2743_v32 = vmul.f32 %v2487_v3, %v1719_v17  ;;  %v8631_v3 = vld [vmem:[#allocation30_spill] sm:$0xff]  ;;  %v1735_v0 = vmul.f32 0.5, %v6779_v62 }
 0x1d1   : > { %v5360_v14 = vpop.eup %5359  ;;  %v2007_v39 = vmul.f32 0.70710677, %v6803_v18  ;;  %v2744_v19 = vmul.f32 %v2488_v11, %v1720_v60  ;;  %4828 = vmatpush1.bf16.msra.mxu0 %v4827_v47  ;;  %v3064_v26 = vld [vmem:[#allocation8 + $0x2c8] sm:$0xff]  ;;  %v4839_v21 = vpack.c.bf16 %v3061_v27, %v3059_v38 }
 0x1d2   : > { %v5362_v24 = vpop.eup %5361  ;;  %v2495_v7 = vadd.f32 1.0, %v5360_v14  ;;  %v2008_v16 = vmul.f32 0.70710677, %v6808_v37  ;;  %v781_v20 = vpop.f32.mrb[16].mxu1  ;;  %4830 = vmatprep.subr.bf16.mxu0 %v4829_v30  ;;  %v375_v11 = vld [vmem:[#allocation5 + $0x30] sm:$0xff]  ;;  %v392_v14 = vld [vmem:[#allocation5 + $0xb8] sm:$0xff] }
 0x1d3   : > { %v2496_v45 = vadd.f32 1.0, %v5362_v24  ;;  %5371 = verf.f32 %v2007_v39  ;;  %v6815_v29 = vadd.f32 %v781_v20, %v6730_v52  ;;  %v783_v49 = vpop.f32.mrb[17].mxu1  ;;  %1163 = vmatmul.mubr.f32.gmra.mrb[122].mxu1 %v8629_v25  ;;  %3325 = vmatprep.mubr.f32.mxu0 %v2744_v19  ;;  %v383_v40 = vld [vmem:[#allocation5 + $0x70] sm:$0xff]  ;;  %v400_v39 = vld [vmem:[#allocation5 + $0xf8] sm:$0xff]  ;;  %v4841_v19 = vpack.c.bf16 %v3066_v41, %v3064_v26  ;;  %v8633_v20 = vld [vmem:[#allocation32_spill] sm:$0xff] }
 0x1d4   : > { %5373 = verf.f32 %v2008_v16  ;;  %v6820_v10 = vadd.f32 %v783_v49, %v6735_v6  ;;  %3326 = vmatmul.mubr.f32.gmra.mrb[6].mxu0 %v2743_v32  ;;  %1168 = vmatprep.mubr.f32.mxu1 %v8630_v58  ;;  %v2751_v36 = vmul.f32 %v2495_v7, %v1727_v51  ;;  %v3063_v32 = vld [vmem:[#allocation8 + $0x2c0] sm:$0xff]  ;;  %v4693_v50 = vpack.c.bf16 %v400_v39, %v392_v14  ;;  %v6850_v51 = vld [vmem:[#allocation5 + $0xf0] sm:$0xff]  ;;  %v6852_v58 = vld [vmem:[#allocation5 + $0x138] sm:$0xff] }
 0x1d5   : > { %v5364_v23 = vpop.eup %5363  ;;  %v2015_v15 = vmul.f32 0.70710677, %v6815_v29  ;;  %v2752_v33 = vmul.f32 %v2496_v45, %v1728_v12  ;;  %4832 = vmatpush1.bf16.msra.mxu0 %v4831_v42  ;;  %v1744_v42 = vmul.f32 0.5, %v6796_v46  ;;  %v5855_v12 = vld [vmem:[%s6412_s23 + $0x8] sm:$0xff]  ;;  %v4691_v46 = vpack.c.bf16 %v383_v40, %v375_v11  ;;  %v6847_v45 = vld [vmem:[#allocation5 + $0xb0] sm:$0xff]  ;;  %v6882_v11 = vld [vmem:[#allocation5 + $0x1b8] sm:$0xff] }
 0x1d6   : > { %v5366_v57 = vpop.eup %5365  ;;  %v2503_v31 = vadd.f32 1.0, %v5364_v23  ;;  %v2016_v59 = vmul.f32 0.70710677, %v6820_v10  ;;  %v787_v44 = vpop.f32.mrb[18].mxu1  ;;  %4834 = vmatprep.subr.bf16.mxu0 %v4833_v8  ;;  %v3065_v8 = vld [vmem:[#allocation8 + $0x2d0] sm:$0xff]  ;;  %v6874_v41 = vld [vmem:[#allocation5 + $0x130] sm:$0xff] }
 0x1d7   : > { %v2504_v54 = vadd.f32 1.0, %v5366_v57  ;;  %5375 = verf.f32 %v2015_v15  ;;  %v6827_v47 = vadd.f32 %v787_v44, %v6730_v52  ;;  %v789_v56 = vpop.f32.mrb[19].mxu1  ;;  %1169 = vmatmul.mubr.f32.gmra.mrb[124].mxu1 %v8631_v3  ;;  %3331 = vmatprep.mubr.f32.mxu0 %v2752_v33  ;;  %v6859_v44 = vld [vmem:[#allocation8 + $0x2f8] sm:$0xff]  ;;  %v1751_v3 = vmul.f32 0.5, %v6803_v18  ;;  %v6884_v40 = vld [vmem:[#allocation5 + $0x1f8] sm:$0xff]  ;;  %v6890_v39 = vld [vmem:[#allocation8 + $0x308] sm:$0xff] }
 0x1d8   : > { %5377 = verf.f32 %v2016_v59  ;;  %v6832_v30 = vadd.f32 %v789_v56, %v6735_v6  ;;  %3332 = vmatmul.mubr.f32.gmra.mrb[8].mxu0 %v2751_v36  ;;  %1174 = vmatprep.mubr.f32.mxu1 %v8632_v2  ;;  %v2759_v43 = vmul.f32 %v2503_v31, %v1735_v0  ;;  %v4843_v31 = vpack.c.bf16 %v3065_v8, %v3063_v32  ;;  %v6857_v59 = vld [vmem:[#allocation8 + $0x2e8] sm:$0xff]  ;;  %v3069_v56 = vld [vmem:[#allocation8 + $0x2f0] sm:$0xff]  ;;  %v6899_v8 = vld [vmem:[#allocation8 + $0x300] sm:$0xff] }
 0x1d9   : > { %v5368_v34 = vpop.eup %5367  ;;  %v2023_v9 = vmul.f32 0.70710677, %v6827_v47  ;;  %v2760_v60 = vmul.f32 %v2504_v54, %v1736_v5  ;;  %4836 = vmatpush1.bf16.msra.mxu0 %v4835_v28  ;;  %v1752_v36 = vmul.f32 0.5, %v6808_v37  ;;  %v5856_v5 = vld [vmem:[%s6412_s23] sm:$0xff]  ;;  %v6866_v54 = vld [vmem:[#allocation8 + $0x2e0] sm:$0xff]  ;;  %v4695_v37 = vpack.c.bf16 %v6850_v51, %v6847_v45  ;;  %v5858_v32 = vld [vmem:[%s6412_s23 + $0x10] sm:$0xff] }
 0x1da   : > { %v5370_v61 = vpop.eup %5369  ;;  %v2511_v63 = vadd.f32 1.0, %v5368_v34  ;;  %v2024_v17 = vmul.f32 0.70710677, %v6832_v30  ;;  %v793_v62 = vpop.f32.mrb[20].mxu1  ;;  %4838 = vmatprep.subr.bf16.mxu0 %v4837_v1  ;;  %v5857_v34 = vld [vmem:[%s6412_s23 + $0x18] sm:$0xff]  ;;  %v4697_v18 = vpack.c.bf16 %v6854_v35, %v6852_v58  ;;  %v4847_v14 = vpack.c.bf16 %v3069_v56, %v6866_v54  ;;  %v6915_v51 = vld [vmem:[#allocation5 + $0x1f0] sm:$0xff] }
 0x1db   : > { %v2512_v24 = vadd.f32 1.0, %v5370_v61  ;;  %5379 = verf.f32 %v2023_v9  ;;  %v6839_v7 = vadd.f32 %v793_v62, %v6730_v52  ;;  %v795_v16 = vpop.f32.mrb[21].mxu1  ;;  %1175 = vmatmul.mubr.f32.gmra.mrb[126].mxu1 %v8633_v20  ;;  %3337 = vmatprep.mubr.f32.mxu0 %v2760_v60  ;;  %v6880_v60 = vld [vmem:[#allocation5 + $0x170] sm:$0xff]  ;;  %v6917_v58 = vld [vmem:[#allocation5 + $0x238] sm:$0xff]  ;;  %v5860_v56 = vld [vmem:[%s6412_s23 + $0x20] sm:$0xff] }
 0x1dc   : > { %5381 = verf.f32 %v2024_v17  ;;  %v6844_v55 = vadd.f32 %v795_v16, %v6735_v6  ;;  %3338 = vmatmul.mubr.f32.gmra.mrb[10].mxu0 %v2759_v43  ;;  %1245 = vmatprep.mubr.f32.mxu1 %v5855_v12  ;;  %v2767_v57 = vmul.f32 %v2511_v63, %v1743_v53  ;;  %v6901_v53 = vld [vmem:[#allocation8 + $0x310] sm:$0xff]  ;;  %v1759_v12 = vmul.f32 0.5, %v6815_v29 }
 0x1dd   : > { %v5372_v49 = vpop.eup %5371  ;;  %v2031_v25 = vmul.f32 0.70710677, %v6839_v7  ;;  %v2768_v13 = vmul.f32 %v2512_v24, %v1744_v42  ;;  %4840 = vmatpush1.bf16.msra.mxu0 %v4839_v21  ;;  %v4845_v21 = vpack.c.bf16 %v6859_v44, %v6857_v59  ;;  %v1760_v42 = vmul.f32 0.5, %v6820_v10  ;;  %v5859_v10 = vld [vmem:[%s6412_s23 + $0x28] sm:$0xff]  ;;  %v6919_v35 = vld [vmem:[#allocation5 + $0x278] sm:$0xff]  ;;  %v6926_v44 = vld [vmem:[#allocation8 + $0x328] sm:$0xff] }
 0x1de   : > { %v5374_v23 = vpop.eup %5373  ;;  %v2519_v15 = vadd.f32 1.0, %v5372_v49  ;;  %v2032_v33 = vmul.f32 0.70710677, %v6844_v55  ;;  %v799_v28 = vpop.f32.mrb[22].mxu1  ;;  %4842 = vmatprep.subr.bf16.mxu0 %v4841_v19  ;;  %v6892_v19 = vld [vmem:[#allocation8 + $0x318] sm:$0xff]  ;;  %v4699_v45 = vpack.c.bf16 %v6880_v60, %v6874_v41  ;;  %v6910_v49 = vld [vmem:[#allocation5 + $0x1b0] sm:$0xff]  ;;  %v4701_v29 = vpack.c.bf16 %v6884_v40, %v6882_v11 }
 0x1df   : > { %v2520_v1 = vadd.f32 1.0, %v5374_v23  ;;  %5383 = verf.f32 %v2031_v25  ;;  %v6863_v38 = vadd.f32 %v799_v28, %v6730_v52  ;;  %v801_v27 = vpop.f32.mrb[23].mxu1  ;;  %1246 = vmatmul.mubr.f32.vlgmr.msra.gmra.mrb[128].mxu1 %v5856_v5  ;;  %3343 = vmatprep.mubr.f32.mxu0 %v2768_v13  ;;  %v4849_v23 = vpack.c.bf16 %v6892_v19, %v6890_v39  ;;  %v6951_v11 = vld [vmem:[#allocation5 + $0x270] sm:$0xff]  ;;  %v6953_v40 = vld [vmem:[#allocation5 + $0x2b8] sm:$0xff] }
 0x1e0   : > { %5385 = verf.f32 %v2032_v33  ;;  %v6870_v26 = vadd.f32 %v801_v27, %v6735_v6  ;;  %4692 = vmatpush1.bf16.msra.mxu1 %v4691_v46  ;;  %3344 = vmatmul.mubr.f32.gmra.mrb[12].mxu0 %v2767_v57  ;;  %v2775_v43 = vmul.f32 %v2519_v15, %v1751_v3  ;;  %v4851_v59 = vpack.c.bf16 %v6901_v53, %v6899_v8  ;;  %v6935_v3 = vld [vmem:[#allocation8 + $0x320] sm:$0xff]  ;;  %v6962_v19 = vld [vmem:[#allocation8 + $0x348] sm:$0xff] }
 0x1e1   : > { %v5376_v0 = vpop.eup %5375  ;;  %v2039_v2 = vmul.f32 0.70710677, %v6863_v38  ;;  %1251 = vmatprep.mubr.f32.mxu1 %v5857_v34  ;;  %v2776_v9 = vmul.f32 %v2520_v1, %v1752_v36  ;;  %4694 = vmatprep.subr.bf16.mxu1 %v4693_v50  ;;  %v6928_v36 = vld [vmem:[#allocation8 + $0x338] sm:$0xff]  ;;  %v1768_v1 = vmul.f32 0.5, %v6832_v30  ;;  %v1767_v41 = vmul.f32 0.5, %v6827_v47  ;;  %v5861_v30 = vld [vmem:[%s6412_s23 + $0x38] sm:$0xff] }
 0x1e2   : > { %v5378_v61 = vpop.eup %5377  ;;  %v2527_v63 = vadd.f32 1.0, %v5376_v0  ;;  %v2040_v17 = vmul.f32 0.70710677, %v6870_v26  ;;  %v805_v62 = vpop.f32.mrb[24].mxu1  ;;  %4844 = vmatpush1.bf16.msra.mxu0 %v4843_v31  ;;  %v6946_v34 = vld [vmem:[#allocation5 + $0x230] sm:$0xff]  ;;  %v4705_v47 = vpack.c.bf16 %v6919_v35, %v6917_v58  ;;  %v6989_v35 = vld [vmem:[#allocation5 + $0x338] sm:$0xff] }
 0x1e3   : > { %v2528_v24 = vadd.f32 1.0, %v5378_v61  ;;  %5387 = verf.f32 %v2039_v2  ;;  %v6896_v16 = vadd.f32 %v805_v62, %v6730_v52  ;;  %v807_v20 = vpop.f32.mrb[25].mxu1  ;;  %1252 = vmatmul.mubr.f32.gmra.mrb[130].mxu1 %v5858_v32  ;;  %3349 = vmatprep.mubr.f32.mxu0 %v2776_v9  ;;  %v4703_v2 = vpack.c.bf16 %v6915_v51, %v6910_v49  ;;  %v5862_v53 = vld [vmem:[%s6412_s23 + $0x30] sm:$0xff] }
 0x1e4   : > { %5389 = verf.f32 %v2040_v17  ;;  %v6905_v46 = vadd.f32 %v807_v20, %v6735_v6  ;;  %3350 = vmatmul.mubr.f32.gmra.mrb[14].mxu0 %v2775_v43  ;;  %1257 = vmatprep.mubr.f32.mxu1 %v5859_v10  ;;  %v2783_v31 = vmul.f32 %v2527_v63, %v1759_v12  ;;  %v4853_v61 = vpack.c.bf16 %v6928_v36, %v6926_v44  ;;  %v6971_v12 = vld [vmem:[#allocation8 + $0x340] sm:$0xff]  ;;  %v6973_v10 = vld [vmem:[#allocation8 + $0x350] sm:$0xff]  ;;  %v6987_v58 = vld [vmem:[#allocation5 + $0x2f0] sm:$0xff] }
 0x1e5   : > { %v5380_v25 = vpop.eup %5379  ;;  %v2047_v13 = vmul.f32 0.70710677, %v6896_v16  ;;  %v2784_v50 = vmul.f32 %v2528_v24, %v1760_v42  ;;  %4696 = vmatpush1.bf16.msra.mxu1 %v4695_v37  ;;  %4846 = vmatprep.subr.bf16.mxu0 %v4845_v21  ;;  %v6937_v37 = vld [vmem:[#allocation8 + $0x330] sm:$0xff]  ;;  %v6964_v42 = vld [vmem:[#allocation8 + $0x358] sm:$0xff]  ;;  %v1776_v24 = vmul.f32 0.5, %v6844_v55  ;;  %v5863_v55 = vld [vmem:[%s6412_s23 + $0x48] sm:$0xff]  ;;  %v4859_v44 = vpack.c.bf16 %v6973_v10, %v6971_v12 }
 0x1e6   : > { %v5382_v15 = vpop.eup %5381  ;;  %v2535_v33 = vadd.f32 1.0, %v5380_v25  ;;  %v2048_v28 = vmul.f32 0.70710677, %v6905_v46  ;;  %v811_v57 = vpop.f32.mrb[26].mxu1  ;;  %4698 = vmatprep.subr.bf16.mxu1 %v4697_v18  ;;  %4848 = vmatpush1.bf16.msra.mxu0 %v4847_v14  ;;  %v6955_v21 = vld [vmem:[#allocation5 + $0x2f8] sm:$0xff]  ;;  %v4855_v39 = vpack.c.bf16 %v6937_v37, %v6935_v3  ;;  %v4707_v25 = vpack.c.bf16 %v6951_v11, %v6946_v34  ;;  %v6998_v36 = vld [vmem:[#allocation8 + $0x368] sm:$0xff] }
 0x1e7   : > { %v2536_v27 = vadd.f32 1.0, %v5382_v15  ;;  %5391 = verf.f32 %v2047_v13  ;;  %v6932_v5 = vadd.f32 %v811_v57, %v6730_v52  ;;  %v813_v54 = vpop.f32.mrb[27].mxu1  ;;  %1258 = vmatmul.mubr.f32.gmra.mrb[132].mxu1 %v5860_v56  ;;  %3355 = vmatprep.mubr.f32.mxu0 %v2784_v50  ;;  %v6982_v13 = vld [vmem:[#allocation5 + $0x2b0] sm:$0xff]  ;;  %v4857_v15 = vpack.c.bf16 %v6964_v42, %v6962_v19  ;;  %v5864_v37 = vld [vmem:[%s6412_s23 + $0x40] sm:$0xff] }
 0x1e8   : > { %5393 = verf.f32 %v2048_v28  ;;  %v6941_v0 = vadd.f32 %v813_v54, %v6735_v6  ;;  %3356 = vmatmul.mubr.f32.gmra.mrb[16].mxu0 %v2783_v31  ;;  %1263 = vmatprep.mubr.f32.mxu1 %v5861_v30  ;;  %v2791_v14 = vmul.f32 %v2535_v33, %v1767_v41  ;;  %v7007_v41 = vld [vmem:[#allocation8 + $0x360] sm:$0xff]  ;;  %v7009_v30 = vld [vmem:[#allocation8 + $0x370] sm:$0xff]  ;;  %v7034_v42 = vld [vmem:[#allocation8 + $0x388] sm:$0xff] }
 0x1e9   : > { %v5384_v9 = vpop.eup %5383  ;;  %v2055_v18 = vmul.f32 0.70710677, %v6932_v5  ;;  %v2792_v60 = vmul.f32 %v2536_v27, %v1768_v1  ;;  %4700 = vmatpush1.bf16.msra.mxu1 %v4699_v45  ;;  %4850 = vmatprep.subr.bf16.mxu0 %v4849_v23  ;;  %v1775_v45 = vmul.f32 0.5, %v6839_v7  ;;  %v4709_v7 = vpack.c.bf16 %v6955_v21, %v6953_v40  ;;  %v6991_v23 = vld [vmem:[#allocation5 + $0x378] sm:$0xff]  ;;  %v7000_v1 = vld [vmem:[#allocation8 + $0x378] sm:$0xff]  ;;  %v7023_v40 = vld [vmem:[#allocation5 + $0x370] sm:$0xff] }
 0x1ea   : > { %v5386_v63 = vpop.eup %5385  ;;  %v2543_v17 = vadd.f32 1.0, %v5384_v9  ;;  %v2056_v62 = vmul.f32 0.70710677, %v6941_v0  ;;  %v817_v43 = vpop.f32.mrb[28].mxu1  ;;  %4702 = vmatprep.subr.bf16.mxu1 %v4701_v29  ;;  %4852 = vmatpush1.bf16.msra.mxu0 %v4851_v59  ;;  %v1784_v27 = vmul.f32 0.5, %v6870_v26  ;;  %v5865_v26 = vld [vmem:[%s6412_s23 + $0x58] sm:$0xff]  ;;  %v4711_v9 = vpack.c.bf16 %v6987_v58, %v6982_v13 }
 0x1eb   : > { %v2544_v20 = vadd.f32 1.0, %v5386_v63  ;;  %5395 = verf.f32 %v2055_v18  ;;  %v6968_v32 = vadd.f32 %v817_v43, %v6730_v52  ;;  %v819_v8 = vpop.f32.mrb[29].mxu1  ;;  %1264 = vmatmul.mubr.f32.gmra.mrb[134].mxu1 %v5862_v53  ;;  %3361 = vmatprep.mubr.f32.mxu0 %v2792_v60  ;;  %v7018_v18 = vld [vmem:[#allocation5 + $0x330] sm:$0xff]  ;;  %v7025_v21 = vld [vmem:[#allocation5 + $0x3b8] sm:$0xff]  ;;  %v4861_v63 = vpack.c.bf16 %v7000_v1, %v6998_v36 }
 0x1ec   : > { %5397 = verf.f32 %v2056_v62  ;;  %v6977_v49 = vadd.f32 %v819_v8, %v6735_v6  ;;  %3362 = vmatmul.mubr.f32.gmra.mrb[18].mxu0 %v2791_v14  ;;  %1269 = vmatprep.mubr.f32.mxu1 %v5863_v55  ;;  %v2799_v59 = vmul.f32 %v2543_v17, %v1775_v45  ;;  %v4863_v19 = vpack.c.bf16 %v7009_v30, %v7007_v41  ;;  %v5866_v10 = vld [vmem:[%s6412_s23 + $0x50] sm:$0xff]  ;;  %v7043_v45 = vld [vmem:[#allocation8 + $0x380] sm:$0xff]  ;;  %v7045_v55 = vld [vmem:[#allocation8 + $0x390] sm:$0xff] }
 0x1ed   : > { %v5388_v50 = vpop.eup %5387  ;;  %v2063_v29 = vmul.f32 0.70710677, %v6968_v32  ;;  %v2800_v51 = vmul.f32 %v2544_v20, %v1776_v24  ;;  %4704 = vmatpush1.bf16.msra.mxu1 %v4703_v2  ;;  %4854 = vmatprep.subr.bf16.mxu0 %v4853_v61  ;;  %v1783_v2 = vmul.f32 0.5, %v6863_v38  ;;  %v4713_v38 = vpack.c.bf16 %v6991_v23, %v6989_v35  ;;  %v7027_v61 = vld [vmem:[#allocation5 + $0x3f8] sm:$0xff]  ;;  %v7036_v24 = vld [vmem:[#allocation8 + $0x398] sm:$0xff]  ;;  %v7059_v35 = vld [vmem:[#allocation5 + $0x3f0] sm:$0xff] }
 0x1ee   : > { %v5390_v33 = vpop.eup %5389  ;;  %v2551_v28 = vadd.f32 1.0, %v5388_v50  ;;  %v2064_v57 = vmul.f32 0.70710677, %v6977_v49  ;;  %v823_v31 = vpop.f32.mrb[30].mxu1  ;;  %4706 = vmatprep.subr.bf16.mxu1 %v4705_v47  ;;  %4856 = vmatpush1.bf16.msra.mxu0 %v4855_v39  ;;  %v1792_v20 = vmul.f32 0.5, %v6905_v46  ;;  %v5867_v46 = vld [vmem:[%s6412_s23 + $0x68] sm:$0xff]  ;;  %v4715_v50 = vpack.c.bf16 %v7023_v40, %v7018_v18 }
 0x1ef   : > { %v2552_v54 = vadd.f32 1.0, %v5390_v33  ;;  %5399 = verf.f32 %v2063_v29  ;;  %v7004_v56 = vadd.f32 %v823_v31, %v6730_v52  ;;  %v825_v3 = vpop.f32.mrb[31].mxu1  ;;  %1270 = vmatmul.mubr.f32.gmra.mrb[136].mxu1 %v5864_v37  ;;  %3367 = vmatprep.mubr.f32.mxu0 %v2800_v51  ;;  %v7054_v29 = vld [vmem:[#allocation5 + $0x3b0] sm:$0xff]  ;;  %v7061_v23 = vld [vmem:[#allocation5 + $0x438] sm:$0xff]  ;;  %v4865_v33 = vpack.c.bf16 %v7036_v24, %v7034_v42  ;;  %v5868_v30 = vld [vmem:[%s6412_s23 + $0x60] sm:$0xff] }
 0x1f0   : > { %5401 = verf.f32 %v2064_v57  ;;  %v7013_v34 = vadd.f32 %v825_v3, %v6735_v6  ;;  %3368 = vmatmul.mubr.f32.gmra.mrb[20].mxu0 %v2799_v59  ;;  %1275 = vmatprep.mubr.f32.mxu1 %v5865_v26  ;;  %v2807_v39 = vmul.f32 %v2551_v28, %v1783_v2  ;;  %v4867_v36 = vpack.c.bf16 %v7045_v55, %v7043_v45  ;;  %v7070_v1 = vld [vmem:[#allocation8 + $0x3a8] sm:$0xff]  ;;  %v7079_v2 = vld [vmem:[#allocation8 + $0x3a0] sm:$0xff]  ;;  %v7081_v26 = vld [vmem:[#allocation8 + $0x3b0] sm:$0xff] }
 0x1f1   : > { %v5392_v60 = vpop.eup %5391  ;;  %v2071_v47 = vmul.f32 0.70710677, %v7004_v56  ;;  %v2808_v11 = vmul.f32 %v2552_v54, %v1784_v27  ;;  %4708 = vmatpush1.bf16.msra.mxu1 %v4707_v25  ;;  %4858 = vmatprep.subr.bf16.mxu0 %v4857_v15  ;;  %v1791_v25 = vmul.f32 0.5, %v6896_v16  ;;  %v4717_v16 = vpack.c.bf16 %v7027_v61, %v7025_v21  ;;  %v7063_v15 = vld [vmem:[#allocation5 + $0x478] sm:$0xff]  ;;  %v7072_v27 = vld [vmem:[#allocation8 + $0x3b8] sm:$0xff]  ;;  %v7095_v21 = vld [vmem:[#allocation5 + $0x470] sm:$0xff] }
 0x1f2   : > { %v5394_v17 = vpop.eup %5393  ;;  %v2559_v62 = vadd.f32 1.0, %v5392_v60  ;;  %v2072_v43 = vmul.f32 0.70710677, %v7013_v34  ;;  %v829_v14 = vpop.f32.mrb[32].mxu1  ;;  %4710 = vmatprep.subr.bf16.mxu1 %v4709_v7  ;;  %4860 = vmatpush1.bf16.msra.mxu0 %v4859_v44  ;;  %v1800_v54 = vmul.f32 0.5, %v6941_v0  ;;  %v5869_v0 = vld [vmem:[%s6412_s23 + $0x78] sm:$0xff]  ;;  %v4719_v60 = vpack.c.bf16 %v7059_v35, %v7054_v29 }
 0x1f3   : > { %v2560_v8 = vadd.f32 1.0, %v5394_v17  ;;  %5403 = verf.f32 %v2071_v47  ;;  %v7040_v53 = vadd.f32 %v829_v14, %v6730_v52  ;;  %v831_v12 = vpop.f32.mrb[33].mxu1  ;;  %1276 = vmatmul.mubr.f32.gmra.mrb[138].mxu1 %v5866_v10  ;;  %3373 = vmatprep.mubr.f32.mxu0 %v2808_v11  ;;  %v7090_v47 = vld [vmem:[#allocation5 + $0x430] sm:$0xff]  ;;  %v7097_v61 = vld [vmem:[#allocation5 + $0x4b8] sm:$0xff]  ;;  %v4869_v17 = vpack.c.bf16 %v7072_v27, %v7070_v1 }
 0x1f4   : > { %5405 = verf.f32 %v2072_v43  ;;  %v7049_v13 = vadd.f32 %v831_v12, %v6735_v6  ;;  %3374 = vmatmul.mubr.f32.gmra.mrb[22].mxu0 %v2807_v39  ;;  %1281 = vmatprep.mubr.f32.mxu1 %v5867_v46  ;;  %v2815_v44 = vmul.f32 %v2559_v62, %v1791_v25  ;;  %v4871_v42 = vpack.c.bf16 %v7081_v26, %v7079_v2  ;;  %v7106_v24 = vld [vmem:[#allocation8 + $0x3c8] sm:$0xff]  ;;  %v3095_v25 = vld [vmem:[#allocation8 + $0x3c0] sm:$0xff]  ;;  %v3097_v46 = vld [vmem:[#allocation8 + $0x3d0] sm:$0xff] }
 0x1f5   : > { %v5396_v51 = vpop.eup %5395  ;;  %v2079_v7 = vmul.f32 0.70710677, %v7040_v53  ;;  %v2816_v58 = vmul.f32 %v2560_v8, %v1792_v20  ;;  %4712 = vmatpush1.bf16.msra.mxu1 %v4711_v9  ;;  %4862 = vmatprep.subr.bf16.mxu0 %v4861_v63  ;;  %v1799_v9 = vmul.f32 0.5, %v6932_v5  ;;  %v4721_v5 = vpack.c.bf16 %v7063_v15, %v7061_v23  ;;  %v7099_v63 = vld [vmem:[#allocation5 + $0x4f8] sm:$0xff]  ;;  %v7108_v20 = vld [vmem:[#allocation8 + $0x3d8] sm:$0xff]  ;;  %v5870_v55 = vld [vmem:[%s6412_s23 + $0x70] sm:$0xff] }
 0x1f6   : > { %v5398_v28 = vpop.eup %5397  ;;  %v2567_v57 = vadd.f32 1.0, %v5396_v51  ;;  %v2080_v31 = vmul.f32 0.70710677, %v7049_v13  ;;  %v835_v59 = vpop.f32.mrb[34].mxu1  ;;  %4714 = vmatprep.subr.bf16.mxu1 %v4713_v38  ;;  %4864 = vmatpush1.bf16.msra.mxu0 %v4863_v19  ;;  %v1808_v8 = vmul.f32 0.5, %v6977_v49  ;;  %v5871_v51 = vld [vmem:[%s6412_s23 + $0x88] sm:$0xff]  ;;  %v4723_v49 = vpack.c.bf16 %v7095_v21, %v7090_v47 }
 0x1f7   : > { %v2568_v3 = vadd.f32 1.0, %v5398_v28  ;;  %5407 = verf.f32 %v2079_v7  ;;  %v7076_v37 = vadd.f32 %v835_v59, %v6730_v52  ;;  %v837_v41 = vpop.f32.mrb[35].mxu1  ;;  %1282 = vmatmul.mubr.f32.gmra.mrb[140].mxu1 %v5868_v30  ;;  %3379 = vmatprep.mubr.f32.mxu0 %v2816_v58  ;;  %v7122_v7 = vld [vmem:[#allocation5 + $0x4b0] sm:$0xff]  ;;  %v7129_v15 = vld [vmem:[#allocation5 + $0x538] sm:$0xff]  ;;  %v4873_v28 = vpack.c.bf16 %v7108_v20, %v7106_v24  ;;  %v5872_v26 = vld [vmem:[%s6412_s23 + $0x80] sm:$0xff] }
 0x1f8   : > { %5409 = verf.f32 %v2080_v31  ;;  %v7085_v18 = vadd.f32 %v837_v41, %v6735_v6  ;;  %3380 = vmatmul.mubr.f32.gmra.mrb[24].mxu0 %v2815_v44  ;;  %1287 = vmatprep.mubr.f32.mxu1 %v5869_v0  ;;  %v2823_v19 = vmul.f32 %v2567_v57, %v1799_v9  ;;  %v7127_v23 = vld [vmem:[#allocation5 + $0x4f0] sm:$0xff]  ;;  %v4875_v1 = vpack.c.bf16 %v3097_v46, %v3095_v25  ;;  %v3099_v9 = vld [vmem:[#allocation8 + $0x3e0] sm:$0xff]  ;;  %v3101_v0 = vld [vmem:[#allocation8 + $0x3f0] sm:$0xff] }
 0x1f9   : > { %v5400_v11 = vpop.eup %5399  ;;  %v2087_v38 = vmul.f32 0.70710677, %v7076_v37  ;;  %v2824_v40 = vmul.f32 %v2568_v3, %v1800_v54  ;;  %4716 = vmatpush1.bf16.msra.mxu1 %v4715_v50  ;;  %4866 = vmatprep.subr.bf16.mxu0 %v4865_v33  ;;  %v1807_v50 = vmul.f32 0.5, %v6968_v32  ;;  %v4725_v32 = vpack.c.bf16 %v7099_v63, %v7097_v61  ;;  %v7131_v33 = vld [vmem:[#allocation5 + $0x578] sm:$0xff]  ;;  %v3100_v27 = vld [vmem:[#allocation8 + $0x3e8] sm:$0xff]  ;;  %v3102_v54 = vld [vmem:[#allocation8 + $0x3f8] sm:$0xff] }
 0x1fa   : > { %v5402_v62 = vpop.eup %5401  ;;  %v2575_v43 = vadd.f32 1.0, %v5400_v11  ;;  %v2088_v14 = vmul.f32 0.70710677, %v7085_v18  ;;  %v841_v39 = vpop.f32.mrb[36].mxu1  ;;  %4718 = vmatprep.subr.bf16.mxu1 %v4717_v16  ;;  %4868 = vmatpush1.bf16.msra.mxu0 %v4867_v36  ;;  %v1816_v3 = vmul.f32 0.5, %v7013_v34  ;;  %v5873_v11 = vld [vmem:[%s6412_s23 + $0x98] sm:$0xff]  ;;  %v4727_v34 = vpack.c.bf16 %v7127_v23, %v7122_v7 }
 0x1fb   : > { %v2576_v12 = vadd.f32 1.0, %v5402_v62  ;;  %5411 = verf.f32 %v2087_v38  ;;  %v7112_v10 = vadd.f32 %v841_v39, %v6730_v52  ;;  %v843_v45 = vpop.f32.mrb[37].mxu1  ;;  %1288 = vmatmul.mubr.f32.gmra.mrb[142].mxu1 %v5870_v55  ;;  %3385 = vmatprep.mubr.f32.mxu0 %v2824_v40  ;;  %v4729_v21 = vpack.c.bf16 %v7131_v33, %v7129_v15  ;;  %v7151_v61 = vld [vmem:[#allocation5 + $0x530] sm:$0xff]  ;;  %v3106_v24 = vld [vmem:[#allocation8 + $0x418] sm:$0xff]  ;;  %v552_v25 = vld [vmem:[#allocation5 + $0x5b8] sm:$0xff] }
 0x1fc   : > { %5413 = verf.f32 %v2088_v14  ;;  %v7117_v29 = vadd.f32 %v843_v45, %v6735_v6  ;;  %3386 = vmatmul.mubr.f32.gmra.mrb[26].mxu0 %v2823_v19  ;;  %1293 = vmatprep.mubr.f32.mxu1 %v5871_v51  ;;  %v2831_v36 = vmul.f32 %v2575_v43, %v1807_v50  ;;  %v4877_v63 = vpack.c.bf16 %v3102_v54, %v3100_v27  ;;  %v5874_v55 = vld [vmem:[%s6412_s23 + $0x90] sm:$0xff]  ;;  %v560_v46 = vld [vmem:[#allocation5 + $0x5f8] sm:$0xff]  ;;  %v5876_v27 = vld [vmem:[%s6412_s23 + $0xa0] sm:$0xff] }
 0x1fd   : > { %v5404_v58 = vpop.eup %5403  ;;  %v2095_v16 = vmul.f32 0.70710677, %v7112_v10  ;;  %v2832_v35 = vmul.f32 %v2576_v12, %v1808_v8  ;;  %4720 = vmatpush1.bf16.msra.mxu1 %v4719_v60  ;;  %4870 = vmatprep.subr.bf16.mxu0 %v4869_v17  ;;  %v1815_v60 = vmul.f32 0.5, %v7004_v56  ;;  %v7153_v56 = vld [vmem:[#allocation5 + $0x570] sm:$0xff]  ;;  %v4879_v19 = vpack.c.bf16 %v3101_v0, %v3099_v9  ;;  %v568_v54 = vld [vmem:[#allocation5 + $0x638] sm:$0xff] }
 0x1fe   : > { %v5406_v57 = vpop.eup %5405  ;;  %v2583_v31 = vadd.f32 1.0, %v5404_v58  ;;  %v2096_v59 = vmul.f32 0.70710677, %v7117_v29  ;;  %v847_v44 = vpop.f32.mrb[38].mxu1  ;;  %4722 = vmatprep.subr.bf16.mxu1 %v4721_v5  ;;  %4872 = vmatpush1.bf16.msra.mxu0 %v4871_v42  ;;  %v3104_v42 = vld [vmem:[#allocation8 + $0x408] sm:$0xff]  ;;  %v1824_v20 = vmul.f32 0.5, %v7049_v13 }
 0x1ff   : > { %v2584_v41 = vadd.f32 1.0, %v5406_v57  ;;  %5415 = verf.f32 %v2095_v16  ;;  %v7138_v30 = vadd.f32 %v847_v44, %v6730_v52  ;;  %v849_v2 = vpop.f32.mrb[39].mxu1  ;;  %1294 = vmatmul.mubr.f32.gmra.mrb[144].mxu1 %v5872_v26  ;;  %3391 = vmatprep.mubr.f32.mxu0 %v2832_v35  ;;  %v1823_v50 = vmul.f32 0.5, %v7040_v53  ;;  %v551_v57 = vld [vmem:[#allocation5 + $0x5b0] sm:$0xff]  ;;  %v5877_v26 = vld [vmem:[%s6412_s23 + $0xb8] sm:$0xff] }
 0x200   : > { %5417 = verf.f32 %v2096_v59  ;;  %v7143_v47 = vadd.f32 %v849_v2, %v6735_v6  ;;  %3392 = vmatmul.mubr.f32.gmra.mrb[28].mxu0 %v2831_v36  ;;  %1299 = vmatprep.mubr.f32.mxu1 %v5873_v11  ;;  %v2839_v39 = vmul.f32 %v2583_v31, %v1815_v60  ;;  %v4731_v16 = vpack.c.bf16 %v7153_v56, %v7151_v61  ;;  %v559_v31 = vld [vmem:[#allocation5 + $0x5f0] sm:$0xff] }
 0x201   : > { %v5408_v38 = vpop.eup %5407  ;;  %v2103_v40 = vmul.f32 0.70710677, %v7138_v30  ;;  %v2840_v5 = vmul.f32 %v2584_v41, %v1816_v3  ;;  %4724 = vmatpush1.bf16.msra.mxu1 %v4723_v49  ;;  %4874 = vmatprep.subr.bf16.mxu0 %v4873_v28  ;;  %v5875_v49 = vld [vmem:[%s6412_s23 + $0xa8] sm:$0xff]  ;;  %v4881_v35 = vpack.c.bf16 %v3106_v24, %v3104_v42  ;;  %v4733_v28 = vpack.c.bf16 %v560_v46, %v552_v25  ;;  %v576_v3 = vld [vmem:[#allocation5 + $0x678] sm:$0xff]  ;;  %v575_v61 = vld [vmem:[#allocation5 + $0x670] sm:$0xff] }
 0x202   : > { %v5410_v17 = vpop.eup %5409  ;;  %v2591_v62 = vadd.f32 1.0, %v5408_v38  ;;  %v2104_v43 = vmul.f32 0.70710677, %v7143_v47  ;;  %v853_v14 = vpop.f32.mrb[40].mxu1  ;;  %4726 = vmatprep.subr.bf16.mxu1 %v4725_v32  ;;  %4876 = vmatpush1.bf16.msra.mxu0 %v4875_v1  ;;  %v1832_v59 = vmul.f32 0.5, %v7085_v18  ;;  %v1831_v41 = vmul.f32 0.5, %v7076_v37 }
 0x203   : > { %v2592_v8 = vadd.f32 1.0, %v5410_v17  ;;  %5419 = verf.f32 %v2103_v40  ;;  %v7158_v12 = vadd.f32 %v853_v14, %v6730_v52  ;;  %v855_v45 = vpop.f32.mrb[41].mxu1  ;;  %1300 = vmatmul.mubr.f32.gmra.mrb[146].mxu1 %v5874_v55  ;;  %3397 = vmatprep.mubr.f32.mxu0 %v2840_v5  ;;  %v4735_v60 = vpack.c.bf16 %v559_v31, %v551_v57  ;;  %v584_v14 = vld [vmem:[#allocation5 + $0x6b8] sm:$0xff]  ;;  %v5879_v24 = vld [vmem:[%s6412_s23 + $0xc8] sm:$0xff] }
 0x204   : > { %5421 = verf.f32 %v2104_v43  ;;  %v7163_v51 = vadd.f32 %v855_v45, %v6735_v6  ;;  %3398 = vmatmul.mubr.f32.gmra.mrb[30].mxu0 %v2839_v39  ;;  %1305 = vmatprep.mubr.f32.mxu1 %v5875_v49  ;;  %v2847_v33 = vmul.f32 %v2591_v62, %v1823_v50  ;;  %v4737_v5 = vpack.c.bf16 %v576_v3, %v568_v54  ;;  %v5878_v43 = vld [vmem:[%s6412_s23 + $0xb0] sm:$0xff]  ;;  %v592_v39 = vld [vmem:[#allocation5 + $0x6f8] sm:$0xff] }
 0x205   : > { %v5412_v13 = vpop.eup %5411  ;;  %v2111_v7 = vmul.f32 0.70710677, %v7158_v12  ;;  %v2848_v58 = vmul.f32 %v2592_v8, %v1824_v20  ;;  %4728 = vmatpush1.bf16.msra.mxu1 %v4727_v34  ;;  %4878 = vmatprep.subr.bf16.mxu0 %v4877_v63  ;;  %v1840_v56 = vmul.f32 0.5, %v7117_v29  ;;  %v4741_v49 = vpack.c.bf16 %v592_v39, %v584_v14  ;;  %v5881_v57 = vld [vmem:[%s6412_s23 + $0xd8] sm:$0xff] }
 0x206   : > { %v5414_v32 = vpop.eup %5413  ;;  %v2599_v53 = vadd.f32 1.0, %v5412_v13  ;;  %v2112_v23 = vmul.f32 0.70710677, %v7163_v51  ;;  %v859_v15 = vpop.f32.mrb[42].mxu1  ;;  %4730 = vmatprep.subr.bf16.mxu1 %v4729_v21  ;;  %4880 = vmatpush1.bf16.msra.mxu0 %v4879_v19  ;;  %v567_v21 = vld [vmem:[#allocation5 + $0x630] sm:$0xff]  ;;  %v1839_v19 = vmul.f32 0.5, %v7112_v10 }
 0x207   : > { %v2600_v44 = vadd.f32 1.0, %v5414_v32  ;;  %5423 = verf.f32 %v2111_v7  ;;  %v7172_v36 = vadd.f32 %v859_v15, %v6730_v52  ;;  %v861_v1 = vpop.f32.mrb[43].mxu1  ;;  %1306 = vmatmul.mubr.f32.gmra.mrb[148].mxu1 %v5876_v27  ;;  %3403 = vmatprep.mubr.f32.mxu0 %v2848_v58  ;;  %v4739_v45 = vpack.c.bf16 %v575_v61, %v567_v21  ;;  %v583_v13 = vld [vmem:[#allocation5 + $0x6b0] sm:$0xff]  ;;  %v608_v15 = vld [vmem:[#allocation5 + $0x778] sm:$0xff]  ;;  %v5883_v21 = vld [vmem:[%s6412_s23 + $0xe8] sm:$0xff] }
 0x208   : > { %5425 = verf.f32 %v2112_v23  ;;  %v7177_v2 = vadd.f32 %v861_v1, %v6735_v6  ;;  %3404 = vmatmul.mubr.f32.gmra.mrb[32].mxu0 %v2847_v33  ;;  %1311 = vmatprep.mubr.f32.mxu1 %v5877_v26  ;;  %v2855_v40 = vmul.f32 %v2599_v53, %v1831_v41  ;;  %v591_v7 = vld [vmem:[#allocation5 + $0x6f0] sm:$0xff]  ;;  %v1848_v58 = vmul.f32 0.5, %v7143_v47  ;;  %v5880_v53 = vld [vmem:[%s6412_s23 + $0xc0] sm:$0xff]  ;;  %v600_v23 = vld [vmem:[#allocation5 + $0x738] sm:$0xff] }
 0x209   : > { %v5416_v18 = vpop.eup %5415  ;;  %v2119_v9 = vmul.f32 0.70710677, %v7172_v36  ;;  %v2856_v0 = vmul.f32 %v2600_v44, %v1832_v59  ;;  %4732 = vmatpush1.bf16.msra.mxu1 %v4731_v16  ;;  %4882 = vmatprep.subr.bf16.mxu0 %v4881_v35  ;;  %v1847_v33 = vmul.f32 0.5, %v7138_v30  ;;  %v4743_v44 = vpack.c.bf16 %v591_v7, %v583_v13  ;;  %v599_v26 = vld [vmem:[#allocation5 + $0x730] sm:$0xff] }
 0x20a   : > { %v5418_v11 = vpop.eup %5417  ;;  %v2607_v34 = vadd.f32 1.0, %v5416_v18  ;;  %v2120_v38 = vmul.f32 0.70710677, %v7177_v2  ;;  %v865_v37 = vpop.f32.mrb[44].mxu1  ;;  %4734 = vmatprep.subr.bf16.mxu1 %v4733_v28  ;;  %v4745_v41 = vpack.c.bf16 %v608_v15, %v600_v23  ;;  %v607_v18 = vld [vmem:[#allocation5 + $0x770] sm:$0xff] }
 0x20b   : > { %v2608_v63 = vadd.f32 1.0, %v5418_v11  ;;  %5427 = verf.f32 %v2119_v9  ;;  %v7184_v17 = vadd.f32 %v865_v37, %v6730_v52  ;;  %v867_v62 = vpop.f32.mrb[45].mxu1  ;;  %1312 = vmatmul.mubr.f32.gmra.mrb[150].mxu1 %v5878_v43  ;;  %3409 = vmatprep.mubr.f32.mxu0 %v2856_v0  ;;  %v1856_v9 = vmul.f32 0.5, %v7163_v51  ;;  %v624_v37 = vld [vmem:[#allocation5 + $0x7f8] sm:$0xff] }
 0x20c   : > { %5429 = verf.f32 %v2120_v38  ;;  %v7189_v42 = vadd.f32 %v867_v62, %v6735_v6  ;;  %3410 = vmatmul.mubr.f32.gmra.mrb[34].mxu0 %v2855_v40  ;;  %1317 = vmatprep.mubr.f32.mxu1 %v5879_v24  ;;  %v2863_v10 = vmul.f32 %v2607_v34, %v1839_v19  ;;  %v5882_v34 = vld [vmem:[%s6412_s23 + $0xd0] sm:$0xff]  ;;  %v616_v38 = vld [vmem:[#allocation5 + $0x7b8] sm:$0xff]  ;;  %v1855_v40 = vmul.f32 0.5, %v7158_v12 }
 0x20d   : > { %v5420_v29 = vpop.eup %5419  ;;  %v2127_v20 = vmul.f32 0.70710677, %v7184_v17  ;;  %v2864_v8 = vmul.f32 %v2608_v63, %v1840_v56  ;;  %4736 = vmatpush1.bf16.msra.mxu1 %v4735_v60  ;;  %v4747_v63 = vpack.c.bf16 %v607_v18, %v599_v26  ;;  %v4749_v19 = vpack.c.bf16 %v624_v37, %v616_v38  ;;  %v615_v24 = vld [vmem:[#allocation5 + $0x7b0] sm:$0xff]  ;;  %v5889_v37 = vld [vmem:[%s6412_s23 + $0x118] sm:$0xff] }
 0x20e   : > { %v5422_v55 = vpop.eup %5421  ;;  %v2615_v25 = vadd.f32 1.0, %v5420_v29  ;;  %v2128_v46 = vmul.f32 0.70710677, %v7189_v42  ;;  %v871_v50 = vpop.f32.mrb[46].mxu1  ;;  %4738 = vmatprep.subr.bf16.mxu1 %v4737_v5  ;;  %v623_v29 = vld [vmem:[#allocation5 + $0x7f0] sm:$0xff]  ;;  %v1872_v23 = vmul.f32 0.5, %v7189_v42 }
 0x20f   : > { %v2616_v16 = vadd.f32 1.0, %v5422_v55  ;;  %5431 = verf.f32 %v2127_v20  ;;  %v7196_v35 = vadd.f32 %v871_v50, %v6730_v52  ;;  %v873_v32 = vpop.f32.mrb[47].mxu1  ;;  %1318 = vmatmul.mubr.f32.gmra.mrb[152].mxu1 %v5880_v53  ;;  %3415 = vmatprep.mubr.f32.mxu0 %v2864_v8  ;;  %v1864_v20 = vmul.f32 0.5, %v7177_v2 }
 0x210   : > { %5433 = verf.f32 %v2128_v46  ;;  %v7201_v28 = vadd.f32 %v873_v32, %v6735_v6  ;;  %3416 = vmatmul.mubr.f32.gmra.mrb[36].mxu0 %v2863_v10  ;;  %1323 = vmatprep.mubr.f32.mxu1 %v5881_v57  ;;  %v2871_v30 = vmul.f32 %v2615_v25, %v1847_v33  ;;  %v5884_v25 = vld [vmem:[%s6412_s23 + $0xe0] sm:$0xff]  ;;  %v1863_v46 = vmul.f32 0.5, %v7172_v36  ;;  %v5885_v10 = vld [vmem:[%s6412_s23 + $0xf8] sm:$0xff] }
 0x211   : > { %v5424_v47 = vpop.eup %5423  ;;  %v2135_v31 = vmul.f32 0.70710677, %v7196_v35  ;;  %v2872_v59 = vmul.f32 %v2616_v16, %v1848_v58  ;;  %4740 = vmatpush1.bf16.msra.mxu1 %v4739_v45  ;;  %v4751_v7 = vpack.c.bf16 %v623_v29, %v615_v24  ;;  %v5891_v29 = vld [vmem:[%s6412_s23 + $0x128] sm:$0xff] }
 0x212   : > { %v5426_v1 = vpop.eup %5425  ;;  %v2623_v27 = vadd.f32 1.0, %v5424_v47  ;;  %v2136_v54 = vmul.f32 0.70710677, %v7201_v28  ;;  %v877_v3 = vpop.f32.mrb[48].mxu1  ;;  %4742 = vmatprep.subr.bf16.mxu1 %v4741_v49  ;;  %v5886_v47 = vld [vmem:[%s6412_s23 + $0xf0] sm:$0xff]  ;;  %v1880_v26 = vmul.f32 0.5, %v7201_v28 }
 0x213   : > { %v2624_v0 = vadd.f32 1.0, %v5426_v1  ;;  %5435 = verf.f32 %v2135_v31  ;;  %v7208_v60 = vadd.f32 %v877_v3, %v6730_v52  ;;  %v879_v11 = vpop.f32.mrb[49].mxu1  ;;  %1324 = vmatmul.mubr.f32.gmra.mrb[154].mxu1 %v5882_v34  ;;  %3421 = vmatprep.mubr.f32.mxu0 %v2872_v59  ;;  %v1871_v31 = vmul.f32 0.5, %v7184_v17 }
 0x214   : > { %5437 = verf.f32 %v2136_v54  ;;  %v7213_v5 = vadd.f32 %v879_v11, %v6735_v6  ;;  %3422 = vmatmul.mubr.f32.gmra.mrb[38].mxu0 %v2871_v30  ;;  %1329 = vmatprep.mubr.f32.mxu1 %v5883_v21  ;;  %v2879_v12 = vmul.f32 %v2623_v27, %v1855_v40  ;;  %v5888_v11 = vld [vmem:[%s6412_s23 + $0x100] sm:$0xff]  ;;  %v1879_v34 = vmul.f32 0.5, %v7196_v35 }
 0x215   : > { %v5428_v51 = vpop.eup %5427  ;;  %v2143_v61 = vmul.f32 0.70710677, %v7208_v60  ;;  %v2880_v56 = vmul.f32 %v2624_v0, %v1856_v9  ;;  %4744 = vmatpush1.bf16.msra.mxu1 %v4743_v44  ;;  %v5887_v44 = vld [vmem:[%s6412_s23 + $0x108] sm:$0xff] }
 0x216   : > { %v5430_v62 = vpop.eup %5429  ;;  %v2631_v43 = vadd.f32 1.0, %v5428_v51  ;;  %v2144_v14 = vmul.f32 0.70710677, %v7213_v5  ;;  %v883_v39 = vpop.f32.mrb[50].mxu1  ;;  %4746 = vmatprep.subr.bf16.mxu1 %v4745_v41  ;;  %v1888_v35 = vmul.f32 0.5, %v7213_v5 }
 0x217   : > { %v2632_v8 = vadd.f32 1.0, %v5430_v62  ;;  %5439 = verf.f32 %v2143_v61  ;;  %v7220_v45 = vadd.f32 %v883_v39, %v6730_v52  ;;  %v885_v55 = vpop.f32.mrb[51].mxu1  ;;  %1330 = vmatmul.mubr.f32.gmra.mrb[156].mxu1 %v5884_v25  ;;  %3427 = vmatprep.mubr.f32.mxu0 %v2880_v56 }
 0x218   : > { %5441 = verf.f32 %v2144_v14  ;;  %v7225_v50 = vadd.f32 %v885_v55, %v6735_v6  ;;  %3428 = vmatmul.mubr.f32.gmra.mrb[40].mxu0 %v2879_v12  ;;  %1335 = vmatprep.mubr.f32.mxu1 %v5885_v10  ;;  %v2887_v53 = vmul.f32 %v2631_v43, %v1863_v46  ;;  %v5890_v12 = vld [vmem:[%s6412_s23 + $0x110] sm:$0xff] }
 0x219   : > { %v5432_v49 = vpop.eup %5431  ;;  %v2151_v2 = vmul.f32 0.70710677, %v7220_v45  ;;  %v2888_v13 = vmul.f32 %v2632_v8, %v1864_v20  ;;  %4748 = vmatpush1.bf16.msra.mxu1 %v4747_v63 }
 0x21a   : > { %v5434_v58 = vpop.eup %5433  ;;  %v2639_v16 = vadd.f32 1.0, %v5432_v49  ;;  %v2152_v32 = vmul.f32 0.70710677, %v7225_v50  ;;  %v889_v36 = vpop.f32.mrb[52].mxu1  ;;  %4750 = vmatprep.subr.bf16.mxu1 %v4749_v19  ;;  %v1887_v19 = vmul.f32 0.5, %v7208_v60  ;;  %v1896_v60 = vmul.f32 0.5, %v7225_v50 }
 0x21b   : > { %v2640_v15 = vadd.f32 1.0, %v5434_v58  ;;  %5443 = verf.f32 %v2151_v2  ;;  %v7232_v33 = vadd.f32 %v889_v36, %v6730_v52  ;;  %v891_v57 = vpop.f32.mrb[53].mxu1  ;;  %1336 = vmatmul.mubr.f32.gmra.mrb[158].mxu1 %v5886_v47  ;;  %3433 = vmatprep.mubr.f32.mxu0 %v2888_v13  ;;  %v5892_v58 = vld [vmem:[%s6412_s23 + $0x120] sm:$0xff]  ;;  %v5893_v36 = vld [vmem:[%s6412_s23 + $0x138] sm:$0xff] }
 0x21c   : > { %5445 = verf.f32 %v2152_v32  ;;  %v7237_v59 = vadd.f32 %v891_v57, %v6735_v6  ;;  %3434 = vmatmul.mubr.f32.gmra.mrb[42].mxu0 %v2887_v53  ;;  %1341 = vmatprep.mubr.f32.mxu1 %v5887_v44  ;;  %v2895_v17 = vmul.f32 %v2639_v16, %v1871_v31  ;;  %v1895_v16 = vmul.f32 0.5, %v7220_v45 }
 0x21d   : > { %v5436_v42 = vpop.eup %5435  ;;  %v2159_v1 = vmul.f32 0.70710677, %v7232_v33  ;;  %v2896_v27 = vmul.f32 %v2640_v15, %v1872_v23  ;;  %4752 = vmatpush1.bf16.msra.mxu1 %v4751_v7  ;;  %v637_v45 = vsub.s32 2, %v6720_v4 }
 0x21e   : > { %v5438_v54 = vpop.eup %5437  ;;  %v2647_v3 = vadd.f32 1.0, %v5436_v42  ;;  %v2160_v30 = vmul.f32 0.70710677, %v7237_v59  ;;  %v895_v41 = vpop.f32.mrb[54].mxu1  ;;  %v1904_v42 = vmul.f32 0.5, %v7237_v59  ;;  %v641_v59 = vsub.s32 3, %v6720_v4 }
 0x21f   : > { %v2648_v18 = vadd.f32 1.0, %v5438_v54  ;;  %5447 = verf.f32 %v2159_v1  ;;  %v7244_v9 = vadd.f32 %v895_v41, %v6730_v52  ;;  %v897_v0 = vpop.f32.mrb[55].mxu1  ;;  %1342 = vmatmul.mubr.f32.gmra.mrb[160].mxu1 %v5888_v11  ;;  %3439 = vmatprep.mubr.f32.mxu0 %v2896_v27 }
 0x220   : > { %5449 = verf.f32 %v2160_v30  ;;  %v7249_v38 = vadd.f32 %v897_v0, %v6735_v6  ;;  %3440 = vmatmul.mubr.f32.gmra.mrb[44].mxu0 %v2895_v17  ;;  %1347 = vmatprep.mubr.f32.mxu1 %v5889_v37  ;;  %v2903_v62 = vmul.f32 %v2647_v3, %v1879_v34  ;;  %v5894_v3 = vld [vmem:[%s6412_s23 + $0x130] sm:$0xff]  ;;  %v1903_v30 = vmul.f32 0.5, %v7232_v33  ;;  %v5895_v17 = vld [vmem:[%s6412_s23 + $0x148] sm:$0xff] }
 0x221   : > { %v5440_v28 = vpop.eup %5439  ;;  %v2167_v40 = vmul.f32 0.70710677, %v7244_v9  ;;  %v2904_v21 = vmul.f32 %v2648_v18, %v1880_v26 }
 0x222   : > { %v5442_v51 = vpop.eup %5441  ;;  %v2655_v61 = vadd.f32 1.0, %v5440_v28  ;;  %v2168_v56 = vmul.f32 0.70710677, %v7249_v38  ;;  %v901_v63 = vpop.f32.mrb[56].mxu1 }
 0x223   : > { %v2656_v43 = vadd.f32 1.0, %v5442_v51  ;;  %5451 = verf.f32 %v2167_v40  ;;  %v7256_v14 = vadd.f32 %v901_v63, %v6730_v52  ;;  %v903_v39 = vpop.f32.mrb[57].mxu1  ;;  %1348 = vmatmul.mubr.f32.gmra.mrb[162].mxu1 %v5890_v12  ;;  %3445 = vmatprep.mubr.f32.mxu0 %v2904_v21  ;;  %v5896_v40 = vld [vmem:[#allocation7] sm:$0xff]  ;;  %v1912_v51 = vmul.f32 0.5, %v7249_v38 }
 0x224   : > { %5453 = verf.f32 %v2168_v56  ;;  %v7261_v24 = vadd.f32 %v903_v39, %v6735_v6  ;;  %3446 = vmatmul.mubr.f32.gmra.mrb[46].mxu0 %v2903_v62  ;;  %1353 = vmatprep.mubr.f32.mxu1 %v5891_v29  ;;  %v2911_v49 = vmul.f32 %v2655_v61, %v1887_v19  ;;  %v7292_v21 = vrot.slane %v5896_v40, %v637_v45  ;;  %v5897_v62 = vld [vmem:[%s6412_s23 + $0x140] sm:$0xff]  ;;  %v5898_v39 = vld [vmem:[%s6412_s23 + $0x158] sm:$0xff] }
 0x225   : > { %v5444_v5 = vpop.eup %5443  ;;  %v2175_v20 = vmul.f32 0.70710677, %v7256_v14  ;;  %v2912_v8 = vmul.f32 %v2656_v43, %v1888_v35  ;;  %v1911_v35 = vmul.f32 0.5, %v7244_v9  ;;  %v7304_v38 = vrot.slane %v5896_v40, %v641_v59 }
 0x226   : > { %v5446_v55 = vpop.eup %5445  ;;  %v2663_v25 = vadd.f32 1.0, %v5444_v5  ;;  %v2176_v46 = vmul.f32 0.70710677, %v7261_v24  ;;  %v907_v10 = vpop.f32.mrb[58].mxu1 }
 0x227   : > { %v2664_v2 = vadd.f32 1.0, %v5446_v55  ;;  %5455 = verf.f32 %v2175_v20  ;;  %v7268_v13 = vadd.f32 %v907_v10, %v6730_v52  ;;  %v909_v7 = vpop.f32.mrb[59].mxu1  ;;  %1354 = vmatmul.mubr.f32.gmra.mrb[164].mxu1 %v5892_v58  ;;  %3451 = vmatprep.mubr.f32.mxu0 %v2912_v8  ;;  %v5899_v10 = vld [vmem:[%s6412_s23 + $0x150] sm:$0xff] }
 0x228   : > { %5457 = verf.f32 %v2176_v46  ;;  %v7273_v32 = vadd.f32 %v909_v7, %v6735_v6  ;;  %3452 = vmatmul.mubr.f32.gmra.mrb[48].mxu0 %v2911_v49  ;;  %1359 = vmatprep.mubr.f32.mxu1 %v5893_v36  ;;  %v2919_v44 = vmul.f32 %v2663_v25, %v1895_v16  ;;  %v1919_v49 = vmul.f32 0.5, %v7256_v14 }
 0x229   : > { %v5448_v50 = vpop.eup %5447  ;;  %v2183_v53 = vmul.f32 0.70710677, %v7268_v13  ;;  %v2920_v23 = vmul.f32 %v2664_v2, %v1896_v60  ;;  %v5900_v2 = vld [vmem:[%s6412_s23 + $0x168] sm:$0xff] }
 0x22a   : > { %v5450_v15 = vpop.eup %5449  ;;  %v2671_v57 = vadd.f32 1.0, %v5448_v50  ;;  %v2184_v47 = vmul.f32 0.70710677, %v7273_v32  ;;  %v913_v31 = vpop.f32.mrb[60].mxu1  ;;  %v1928_v14 = vmul.f32 0.5, %v7273_v32 }
 0x22b   : > { %v2672_v1 = vadd.f32 1.0, %v5450_v15  ;;  %5459 = verf.f32 %v2183_v53  ;;  %v7281_v27 = vadd.f32 %v913_v31, %v6730_v52  ;;  %v915_v54 = vpop.f32.mrb[61].mxu1  ;;  %1360 = vmatmul.mubr.f32.gmra.mrb[166].mxu1 %v5894_v3  ;;  %3457 = vmatprep.mubr.f32.mxu0 %v2920_v23  ;;  %v5901_v31 = vld [vmem:[%s6412_s23 + $0x160] sm:$0xff] }
 0x22c   : > { %5461 = verf.f32 %v2184_v47  ;;  %v7286_v41 = vadd.f32 %v915_v54, %v6735_v6  ;;  %3458 = vmatmul.mubr.f32.gmra.mrb[50].mxu0 %v2919_v44  ;;  %1365 = vmatprep.mubr.f32.mxu1 %v5895_v17  ;;  %v2927_v33 = vmul.f32 %v2671_v57, %v1903_v30  ;;  %v1927_v44 = vmul.f32 0.5, %v7268_v13 }
 0x22d   : > { %v5452_v26 = vpop.eup %5451  ;;  %v2191_v18 = vmul.f32 0.70710677, %v7281_v27  ;;  %v2928_v0 = vmul.f32 %v2672_v1, %v1904_v42  ;;  %v5902_v42 = vld [vmem:[%s6412_s23 + $0x178] sm:$0xff] }
 0x22e   : > { %v5454_v11 = vpop.eup %5453  ;;  %v2679_v34 = vadd.f32 1.0, %v5452_v26  ;;  %v2192_v37 = vmul.f32 0.70710677, %v7286_v41  ;;  %v919_v28 = vpop.f32.mrb[62].mxu1  ;;  %v1936_v13 = vmul.f32 0.5, %v7286_v41 }
 0x22f   : > { %v2680_v61 = vadd.f32 1.0, %v5454_v11  ;;  %5463 = verf.f32 %v2191_v18  ;;  %v7296_v56 = vadd.f32 %v919_v28, %v6730_v52  ;;  %v921_v63 = vpop.f32.mrb[63].mxu1  ;;  %1366 = vmatmul.mubr.f32.gmra.mrb[168].mxu1 %v5897_v62  ;;  %3463 = vmatprep.mubr.f32.mxu0 %v2928_v0 }
 0x230   : > { %5465 = verf.f32 %v2192_v37  ;;  %v7301_v43 = vadd.f32 %v921_v63, %v6735_v6  ;;  %3464 = vmatmul.mubr.f32.gmra.mrb[52].mxu0 %v2927_v33  ;;  %1371 = vmatprep.mubr.f32.mxu1 %v5898_v39  ;;  %v2935_v8 = vmul.f32 %v2679_v34, %v1911_v35  ;;  %v1920_v6 = vmul.f32 0.5, %v7261_v24  ;;  %v5903_v34 = vld [vmem:[%s6412_s23 + $0x170] sm:$0xff]  ;;  %v5904_v33 = vld [vmem:[%s6412_s23 + $0x188] sm:$0xff] }
 0x231   : > { %v5456_v12 = vpop.eup %5455  ;;  %v2199_v52 = vmul.f32 0.70710677, %v7296_v56  ;;  %v2936_v19 = vmul.f32 %v2680_v61, %v1912_v51  ;;  %v1935_v37 = vmul.f32 0.5, %v7281_v27 }
 0x232   : > { %v5458_v29 = vpop.eup %5457  ;;  %v2687_v5 = vadd.f32 1.0, %v5456_v12  ;;  %v2200_v20 = vmul.f32 0.70710677, %v7301_v43  ;;  %v990_v9 = vpop.f32.mrb[64].mxu1  ;;  %v1944_v27 = vmul.f32 0.5, %v7301_v43 }
 0x233   : > { %v2688_v55 = vadd.f32 1.0, %v5458_v29  ;;  %5467 = verf.f32 %v2199_v52  ;;  %v7310_v25 = vadd.f32 %v990_v9, %v7292_v21  ;;  %v992_v46 = vpop.f32.mrb[65].mxu1  ;;  %1372 = vmatmul.mubr.f32.gmra.mrb[170].mxu1 %v5899_v10  ;;  %3469 = vmatprep.mubr.f32.mxu0 %v2936_v19  ;;  %v5905_v29 = vld [vmem:[%s6412_s23 + $0x180] sm:$0xff]  ;;  %v5906_v9 = vld [vmem:[%s6412_s23 + $0x198] sm:$0xff] }
 0x234   : > { %5469 = verf.f32 %v2200_v20  ;;  %v7315_v60 = vadd.f32 %v992_v46, %v7304_v38  ;;  %3470 = vmatmul.mubr.f32.gmra.mrb[54].mxu0 %v2935_v8  ;;  %1377 = vmatprep.mubr.f32.mxu1 %v5900_v2  ;;  %v2943_v23 = vmul.f32 %v2687_v5, %v1919_v49  ;;  %v1943_v5 = vmul.f32 0.5, %v7296_v56  ;;  %v3105_v56 = vld [vmem:[#allocation8 + $0x410] sm:$0xff] }
 0x235   : > { %v5460_v24 = vpop.eup %5459  ;;  %v1953_v7 = vmul.f32 0.70710677, %v7310_v25  ;;  %v2944_v58 = vmul.f32 %v2688_v55, %v1920_v6 }
 0x236   : > { %v5462_v16 = vpop.eup %5461  ;;  %v2695_v36 = vadd.f32 1.0, %v5460_v24  ;;  %v1954_v50 = vmul.f32 0.70710677, %v7315_v60  ;;  %v996_v53 = vpop.f32.mrb[66].mxu1  ;;  %v3103_v24 = vld [vmem:[#allocation8 + $0x400] sm:$0xff] }
 0x237   : > { %v2696_v15 = vadd.f32 1.0, %v5462_v16  ;;  %5471 = verf.f32 %v1953_v7  ;;  %v7322_v57 = vadd.f32 %v996_v53, %v7292_v21  ;;  %v998_v47 = vpop.f32.mrb[67].mxu1  ;;  %1378 = vmatmul.mubr.f32.gmra.mrb[172].mxu1 %v5901_v31  ;;  %3475 = vmatprep.mubr.f32.mxu0 %v2944_v58  ;;  %v1698_v7 = vmul.f32 0.5, %v7315_v60  ;;  %v3108_v53 = vld [vmem:[#allocation8 + $0x428] sm:$0xff] }
 0x238   : > { %5473 = verf.f32 %v1954_v50  ;;  %v7327_v45 = vadd.f32 %v998_v47, %v7304_v38  ;;  %3476 = vmatmul.mubr.f32.gmra.mrb[56].mxu0 %v2943_v23  ;;  %1383 = vmatprep.mubr.f32.mxu1 %v5902_v42  ;;  %v2951_v26 = vmul.f32 %v2695_v36, %v1927_v44  ;;  %v5907_v50 = vld [vmem:[%s6412_s23 + $0x190] sm:$0xff]  ;;  %v3110_v23 = vld [vmem:[#allocation8 + $0x438] sm:$0xff]  ;;  %v5908_v47 = vld [vmem:[%s6412_s23 + $0x1a8] sm:$0xff]  ;;  %v4883_v42 = vpack.c.bf16 %v3105_v56, %v3103_v24 }
 0x239   : > { %v5464_v32 = vpop.eup %5463  ;;  %v1961_v1 = vmul.f32 0.70710677, %v7322_v57  ;;  %v2952_v54 = vmul.f32 %v2696_v15, %v1928_v14  ;;  %v1697_v14 = vmul.f32 0.5, %v7310_v25  ;;  %v4885_v25 = vpack.c.bf16 %v3110_v23, %v3108_v53  ;;  %v5912_v24 = vld [vmem:[%s6412_s23 + $0x1c8] sm:$0xff] }
 0x23a   : > { %v5466_v3 = vpop.eup %5465  ;;  %v2703_v30 = vadd.f32 1.0, %v5464_v32  ;;  %v1962_v17 = vmul.f32 0.70710677, %v7327_v45  ;;  %v1002_v59 = vpop.f32.mrb[68].mxu1 }
 0x23b   : > { %v2704_v18 = vadd.f32 1.0, %v5466_v3  ;;  %5475 = verf.f32 %v1961_v1  ;;  %v7334_v0 = vadd.f32 %v1002_v59, %v7292_v21  ;;  %v1004_v11 = vpop.f32.mrb[69].mxu1  ;;  %1384 = vmatmul.mubr.f32.gmra.mrb[174].mxu1 %v5903_v34  ;;  %3481 = vmatprep.mubr.f32.mxu0 %v2952_v54  ;;  %v3109_v59 = vld [vmem:[#allocation8 + $0x430] sm:$0xff]  ;;  %v5909_v34 = vld [vmem:[%s6412_s23 + $0x1a0] sm:$0xff] }
 0x23c   : > { %5477 = verf.f32 %v1962_v17  ;;  %v7339_v28 = vadd.f32 %v1004_v11, %v7304_v38  ;;  %3482 = vmatmul.mubr.f32.gmra.mrb[58].mxu0 %v2951_v26  ;;  %1389 = vmatprep.mubr.f32.mxu1 %v5904_v33  ;;  %v2959_v39 = vmul.f32 %v2703_v30, %v1935_v37  ;;  %v3107_v17 = vld [vmem:[#allocation8 + $0x420] sm:$0xff]  ;;  %v1706_v26 = vmul.f32 0.5, %v7327_v45  ;;  %v3112_v37 = vld [vmem:[#allocation8 + $0x448] sm:$0xff]  ;;  %v3114_v33 = vld [vmem:[#allocation8 + $0x458] sm:$0xff] }
 0x23d   : > { %v5468_v41 = vpop.eup %5467  ;;  %v1969_v40 = vmul.f32 0.70710677, %v7334_v0  ;;  %v2960_v51 = vmul.f32 %v2704_v18, %v1936_v13 }
 0x23e   : > { %v5470_v61 = vpop.eup %5469  ;;  %v2711_v63 = vadd.f32 1.0, %v5468_v41  ;;  %v1970_v62 = vmul.f32 0.70710677, %v7339_v28  ;;  %v1008_v35 = vpop.f32.mrb[70].mxu1  ;;  %v1705_v41 = vmul.f32 0.5, %v7322_v57 }
 0x23f   : > { %v2712_v12 = vadd.f32 1.0, %v5470_v61  ;;  %5479 = verf.f32 %v1969_v40  ;;  %v7346_v52 = vadd.f32 %v1008_v35, %v7292_v21  ;;  %v1010_v19 = vpop.f32.mrb[71].mxu1  ;;  %1390 = vmatmul.mubr.f32.gmra.mrb[176].mxu1 %v5905_v29  ;;  %3487 = vmatprep.mubr.f32.mxu0 %v2960_v51  ;;  %v5910_v51 = vld [vmem:[%s6412_s23 + $0x1b8] sm:$0xff]  ;;  %v3111_v29 = vld [vmem:[#allocation8 + $0x440] sm:$0xff] }
 0x240   : > { %5481 = verf.f32 %v1970_v62  ;;  %v7351_v20 = vadd.f32 %v1010_v19, %v7304_v38  ;;  %3488 = vmatmul.mubr.f32.gmra.mrb[60].mxu0 %v2959_v39  ;;  %1395 = vmatprep.mubr.f32.mxu1 %v5906_v9  ;;  %v2967_v2 = vmul.f32 %v2711_v63, %v1943_v5  ;;  %v4887_v62 = vpack.c.bf16 %v3109_v59, %v3107_v17  ;;  %v3113_v5 = vld [vmem:[#allocation8 + $0x450] sm:$0xff] }
 0x241   : > { %v5472_v43 = vpop.eup %5471  ;;  %v1977_v8 = vmul.f32 0.70710677, %v7346_v52  ;;  %v2968_v6 = vmul.f32 %v2712_v12, %v1944_v27  ;;  %v4889_v19 = vpack.c.bf16 %v3114_v33, %v3112_v37  ;;  %v1714_v9 = vmul.f32 0.5, %v7339_v28  ;;  %v5914_v17 = vld [vmem:[%s6412_s23 + $0x1d8] sm:$0xff] }
 0x242   : > { %v5474_v55 = vpop.eup %5473  ;;  %v2465_v46 = vadd.f32 1.0, %v5472_v43  ;;  %v1978_v10 = vmul.f32 0.70710677, %v7351_v20  ;;  %v1014_v49 = vpop.f32.mrb[72].mxu1 }
 0x243   : > { %v2466_v58 = vadd.f32 1.0, %v5474_v55  ;;  %5483 = verf.f32 %v1977_v8  ;;  %v7358_v16 = vadd.f32 %v1014_v49, %v7292_v21  ;;  %v1016_v36 = vpop.f32.mrb[73].mxu1  ;;  %1396 = vmatmul.mubr.f32.gmra.mrb[178].mxu1 %v5907_v50  ;;  %3493 = vmatprep.mubr.f32.mxu0 %v2968_v6  ;;  %v5911_v55 = vld [vmem:[%s6412_s23 + $0x1b0] sm:$0xff]  ;;  %v1713_v49 = vmul.f32 0.5, %v7334_v0 }
 0x244   : > { %5485 = verf.f32 %v1978_v10  ;;  %v7363_v15 = vadd.f32 %v1016_v36, %v7304_v38  ;;  %3494 = vmatmul.mubr.f32.gmra.mrb[62].mxu0 %v2967_v2  ;;  %1401 = vmatprep.mubr.f32.mxu1 %v5908_v47  ;;  %v2721_v1 = vmul.f32 %v2465_v46, %v1697_v14  ;;  %v3116_v46 = vld [vmem:[#allocation8 + $0x468] sm:$0xff]  ;;  %v3118_v10 = vld [vmem:[#allocation8 + $0x478] sm:$0xff]  ;;  %v3115_v47 = vld [vmem:[#allocation8 + $0x460] sm:$0xff] }
 0x245   : > { %v5476_v60 = vpop.eup %5475  ;;  %v1985_v31 = vmul.f32 0.70710677, %v7358_v16  ;;  %v2722_v44 = vmul.f32 %v2466_v58, %v1698_v7  ;;  %v4891_v58 = vpack.c.bf16 %v3113_v5, %v3111_v29  ;;  %v4893_v14 = vpack.c.bf16 %v3118_v10, %v3116_v46  ;;  %v5916_v29 = vld [vmem:[%s6412_s23 + $0x1e8] sm:$0xff] }
 0x246   : > { %v5478_v32 = vpop.eup %5477  ;;  %v2473_v54 = vadd.f32 1.0, %v5476_v60  ;;  %v1986_v3 = vmul.f32 0.70710677, %v7363_v15  ;;  %v1020_v30 = vpop.f32.mrb[74].mxu1  ;;  %v3117_v60 = vld [vmem:[#allocation8 + $0x470] sm:$0xff] }
 0x247   : > { %v2474_v13 = vadd.f32 1.0, %v5478_v32  ;;  %5487 = verf.f32 %v1985_v31  ;;  %v7370_v18 = vadd.f32 %v1020_v30, %v7292_v21  ;;  %v1022_v11 = vpop.f32.mrb[75].mxu1  ;;  %1402 = vmatmul.mubr.f32.gmra.mrb[180].mxu1 %v5909_v34  ;;  %3564 = vmatprep.mubr.f32.mxu0 %v2722_v44  ;;  %v1722_v31 = vmul.f32 0.5, %v7351_v20 }
 0x248   : > { %5489 = verf.f32 %v1986_v3  ;;  %v7375_v40 = vadd.f32 %v1022_v11, %v7304_v38  ;;  %3565 = vmatmul.mubr.f32.vlgmr.msra.gmra.mrb[0].mxu0 %v2721_v1  ;;  %1407 = vmatprep.mubr.f32.mxu1 %v5910_v51  ;;  %v2729_v57 = vmul.f32 %v2473_v54, %v1705_v41  ;;  %v5913_v1 = vld [vmem:[%s6412_s23 + $0x1c0] sm:$0xff]  ;;  %v3120_v54 = vld [vmem:[#allocation8 + $0x488] sm:$0xff]  ;;  %v1721_v30 = vmul.f32 0.5, %v7346_v52  ;;  %v3119_v51 = vld [vmem:[#allocation8 + $0x480] sm:$0xff] }
 0x249   : > { %v5480_v45 = vpop.eup %5479  ;;  %v1993_v61 = vmul.f32 0.70710677, %v7370_v18  ;;  %4884 = vmatpush1.bf16.msra.mxu0 %v4883_v42  ;;  %v2730_v63 = vmul.f32 %v2474_v13, %v1706_v26  ;;  %v3122_v3 = vld [vmem:[#allocation8 + $0x498] sm:$0xff]  ;;  %v4895_v13 = vpack.c.bf16 %v3117_v60, %v3115_v47  ;;  %v5918_v47 = vld [vmem:[%s6412_s23 + $0x1f8] sm:$0xff] }
 0x24a   : > { %v5482_v35 = vpop.eup %5481  ;;  %v2481_v39 = vadd.f32 1.0, %v5480_v45  ;;  %v1994_v27 = vmul.f32 0.70710677, %v7375_v40  ;;  %v1026_v12 = vpop.f32.mrb[76].mxu1  ;;  %4886 = vmatprep.subr.bf16.mxu0 %v4885_v25  ;;  %v4897_v41 = vpack.c.bf16 %v3122_v3, %v3120_v54  ;;  %v3121_v45 = vld [vmem:[#allocation8 + $0x490] sm:$0xff] }
 0x24b   : > { %v2482_v43 = vadd.f32 1.0, %v5482_v35  ;;  %5491 = verf.f32 %v1993_v61  ;;  %v7382_v8 = vadd.f32 %v1026_v12, %v7292_v21  ;;  %v1028_v6 = vpop.f32.mrb[77].mxu1  ;;  %1408 = vmatmul.mubr.f32.gmra.mrb[182].mxu1 %v5911_v55  ;;  %3570 = vmatprep.mubr.f32.mxu0 %v2730_v63  ;;  %v1730_v61 = vmul.f32 0.5, %v7363_v15  ;;  %v3126_v12 = vld [vmem:[#allocation8 + $0x4b8] sm:$0xff] }
 0x24c   : > { %5493 = verf.f32 %v1994_v27  ;;  %v7387_v2 = vadd.f32 %v1028_v6, %v7304_v38  ;;  %3571 = vmatmul.mubr.f32.gmra.mrb[2].mxu0 %v2729_v57  ;;  %1413 = vmatprep.mubr.f32.mxu1 %v5912_v24  ;;  %v2737_v0 = vmul.f32 %v2481_v39, %v1713_v49  ;;  %v5915_v39 = vld [vmem:[%s6412_s23 + $0x1d0] sm:$0xff]  ;;  %v1729_v57 = vmul.f32 0.5, %v7358_v16  ;;  %v3123_v24 = vld [vmem:[#allocation8 + $0x4a0] sm:$0xff] }
 0x24d   : > { %v5484_v28 = vpop.eup %5483  ;;  %v2001_v56 = vmul.f32 0.70710677, %v7382_v8  ;;  %v2738_v7 = vmul.f32 %v2482_v43, %v1714_v9  ;;  %4888 = vmatpush1.bf16.msra.mxu0 %v4887_v62  ;;  %v3124_v27 = vld [vmem:[#allocation8 + $0x4a8] sm:$0xff]  ;;  %v4899_v43 = vpack.c.bf16 %v3121_v45, %v3119_v51  ;;  %v5920_v51 = vld [vmem:[%s6412_s23 + $0x8] sm:$0xff] }
 0x24e   : > { %v5486_v36 = vpop.eup %5485  ;;  %v2489_v50 = vadd.f32 1.0, %v5484_v28  ;;  %v2002_v53 = vmul.f32 0.70710677, %v7387_v2  ;;  %v1032_v23 = vpop.f32.mrb[78].mxu1  ;;  %4890 = vmatprep.subr.bf16.mxu0 %v4889_v19  ;;  %v4901_v49 = vpack.c.bf16 %v3126_v12, %v3124_v27  ;;  %v3125_v28 = vld [vmem:[#allocation8 + $0x4b0] sm:$0xff] }
 0x24f   : > { %v2490_v44 = vadd.f32 1.0, %v5486_v36  ;;  %5495 = verf.f32 %v2001_v56  ;;  %v7394_v42 = vadd.f32 %v1032_v23, %v7292_v21  ;;  %v1034_v32 = vpop.f32.mrb[79].mxu1  ;;  %1414 = vmatmul.mubr.f32.gmra.mrb[184].mxu1 %v5913_v1  ;;  %3576 = vmatprep.mubr.f32.mxu0 %v2738_v7  ;;  %v1738_v56 = vmul.f32 0.5, %v7375_v40  ;;  %v3130_v23 = vld [vmem:[#allocation8 + $0x4d8] sm:$0xff] }
 0x250   : > { %5497 = verf.f32 %v2002_v53  ;;  %v7399_v25 = vadd.f32 %v1034_v32, %v7304_v38  ;;  %3577 = vmatmul.mubr.f32.gmra.mrb[4].mxu0 %v2737_v0  ;;  %1419 = vmatprep.mubr.f32.mxu1 %v5914_v17  ;;  %v2745_v52 = vmul.f32 %v2489_v50, %v1721_v30  ;;  %v5917_v50 = vld [vmem:[%s6412_s23 + $0x1e0] sm:$0xff]  ;;  %v3128_v53 = vld [vmem:[#allocation8 + $0x4c8] sm:$0xff]  ;;  %v1737_v0 = vmul.f32 0.5, %v7370_v18  ;;  %v3127_v17 = vld [vmem:[#allocation8 + $0x4c0] sm:$0xff] }
 0x251   : > { %v5488_v20 = vpop.eup %5487  ;;  %v2009_v59 = vmul.f32 0.70710677, %v7394_v42  ;;  %v2746_v26 = vmul.f32 %v2490_v44, %v1722_v31  ;;  %4892 = vmatpush1.bf16.msra.mxu0 %v4891_v58  ;;  %v4903_v44 = vpack.c.bf16 %v3125_v28, %v3123_v24  ;;  %v4905_v30 = vpack.c.bf16 %v3130_v23, %v3128_v53  ;;  %v5922_v24 = vld [vmem:[%s6412_s23 + $0x18] sm:$0xff] }
 0x252   : > { %v5490_v11 = vpop.eup %5489  ;;  %v2497_v34 = vadd.f32 1.0, %v5488_v20  ;;  %v2010_v37 = vmul.f32 0.70710677, %v7399_v25  ;;  %v1038_v33 = vpop.f32.mrb[80].mxu1  ;;  %4894 = vmatprep.subr.bf16.mxu0 %v4893_v14  ;;  %v3129_v20 = vld [vmem:[#allocation8 + $0x4d0] sm:$0xff] }
 0x253   : > { %v2498_v63 = vadd.f32 1.0, %v5490_v11  ;;  %5499 = verf.f32 %v2009_v59  ;;  %v7406_v62 = vadd.f32 %v1038_v33, %v7292_v21  ;;  %v1040_v35 = vpop.f32.mrb[81].mxu1  ;;  %1420 = vmatmul.mubr.f32.gmra.mrb[186].mxu1 %v5915_v39  ;;  %3582 = vmatprep.mubr.f32.mxu0 %v2746_v26  ;;  %v1746_v59 = vmul.f32 0.5, %v7387_v2  ;;  %v3134_v33 = vld [vmem:[#allocation8 + $0x4f8] sm:$0xff] }
 0x254   : > { %5501 = verf.f32 %v2010_v37  ;;  %v7411_v19 = vadd.f32 %v1040_v35, %v7304_v38  ;;  %3583 = vmatmul.mubr.f32.gmra.mrb[6].mxu0 %v2745_v52  ;;  %1425 = vmatprep.mubr.f32.mxu1 %v5916_v29  ;;  %v2753_v16 = vmul.f32 %v2497_v34, %v1729_v57  ;;  %v5919_v34 = vld [vmem:[%s6412_s23 + $0x1f0] sm:$0xff]  ;;  %v1745_v52 = vmul.f32 0.5, %v7382_v8  ;;  %v3131_v29 = vld [vmem:[#allocation8 + $0x4e0] sm:$0xff] }
 0x255   : > { %v5492_v15 = vpop.eup %5491  ;;  %v2017_v5 = vmul.f32 0.70710677, %v7406_v62  ;;  %v2754_v9 = vmul.f32 %v2498_v63, %v1730_v61  ;;  %4896 = vmatpush1.bf16.msra.mxu0 %v4895_v13  ;;  %v3132_v37 = vld [vmem:[#allocation8 + $0x4e8] sm:$0xff]  ;;  %v4907_v63 = vpack.c.bf16 %v3129_v20, %v3127_v17  ;;  %v5924_v17 = vld [vmem:[%s6412_s23 + $0x28] sm:$0xff] }
 0x256   : > { %v5494_v6 = vpop.eup %5493  ;;  %v2505_v55 = vadd.f32 1.0, %v5492_v15  ;;  %v2018_v46 = vmul.f32 0.70710677, %v7411_v19  ;;  %v1044_v10 = vpop.f32.mrb[82].mxu1  ;;  %4898 = vmatprep.subr.bf16.mxu0 %v4897_v41  ;;  %v4909_v57 = vpack.c.bf16 %v3134_v33, %v3132_v37  ;;  %v3133_v15 = vld [vmem:[#allocation8 + $0x4f0] sm:$0xff] }
 0x257   : > { %v2506_v7 = vadd.f32 1.0, %v5494_v6  ;;  %5503 = verf.f32 %v2017_v5  ;;  %v7418_v58 = vadd.f32 %v1044_v10, %v7292_v21  ;;  %v1046_v36 = vpop.f32.mrb[83].mxu1  ;;  %1426 = vmatmul.mubr.f32.gmra.mrb[188].mxu1 %v5917_v50  ;;  %3588 = vmatprep.mubr.f32.mxu0 %v2754_v9  ;;  %v1754_v5 = vmul.f32 0.5, %v7399_v25  ;;  %v3138_v10 = vld [vmem:[#allocation8 + $0x518] sm:$0xff] }
 0x258   : > { %5505 = verf.f32 %v2018_v46  ;;  %v7423_v14 = vadd.f32 %v1046_v36, %v7304_v38  ;;  %3589 = vmatmul.mubr.f32.gmra.mrb[8].mxu0 %v2753_v16  ;;  %1431 = vmatprep.mubr.f32.mxu1 %v5918_v47  ;;  %v2761_v18 = vmul.f32 %v2505_v55, %v1737_v0  ;;  %v5921_v55 = vld [vmem:[%s6412_s23] sm:$0xff]  ;;  %v3136_v46 = vld [vmem:[#allocation8 + $0x508] sm:$0xff]  ;;  %v1753_v16 = vmul.f32 0.5, %v7394_v42  ;;  %v3135_v47 = vld [vmem:[#allocation8 + $0x500] sm:$0xff] }
 0x259   : > { %v5496_v40 = vpop.eup %5495  ;;  %v2025_v60 = vmul.f32 0.70710677, %v7418_v58  ;;  %v2762_v31 = vmul.f32 %v2506_v7, %v1738_v56  ;;  %4900 = vmatpush1.bf16.msra.mxu0 %v4899_v43  ;;  %v4911_v7 = vpack.c.bf16 %v3133_v15, %v3131_v29  ;;  %v4913_v0 = vpack.c.bf16 %v3138_v10, %v3136_v46  ;;  %v5926_v29 = vld [vmem:[%s6412_s23 + $0x38] sm:$0xff] }
 0x25a   : > { %v5498_v32 = vpop.eup %5497  ;;  %v2513_v1 = vadd.f32 1.0, %v5496_v40  ;;  %v2026_v54 = vmul.f32 0.70710677, %v7423_v14  ;;  %v1050_v3 = vpop.f32.mrb[84].mxu1  ;;  %4902 = vmatprep.subr.bf16.mxu0 %v4901_v49  ;;  %v3137_v40 = vld [vmem:[#allocation8 + $0x510] sm:$0xff] }
 0x25b   : > { %v2514_v26 = vadd.f32 1.0, %v5498_v32  ;;  %5507 = verf.f32 %v2025_v60  ;;  %v7430_v13 = vadd.f32 %v1050_v3, %v7292_v21  ;;  %v1052_v11 = vpop.f32.mrb[85].mxu1  ;;  %1432 = vmatmul.mubr.f32.gmra.mrb[190].mxu1 %v5919_v34  ;;  %3594 = vmatprep.mubr.f32.mxu0 %v2762_v31  ;;  %v1762_v60 = vmul.f32 0.5, %v7411_v19  ;;  %v3142_v3 = vld [vmem:[#allocation8 + $0x538] sm:$0xff] }
 0x25c   : > { %5509 = verf.f32 %v2026_v54  ;;  %v7435_v41 = vadd.f32 %v1052_v11, %v7304_v38  ;;  %3595 = vmatmul.mubr.f32.gmra.mrb[10].mxu0 %v2761_v18  ;;  %1502 = vmatprep.mubr.f32.mxu1 %v5920_v51  ;;  %v2769_v8 = vmul.f32 %v2513_v1, %v1745_v52  ;;  %v5923_v1 = vld [vmem:[%s6412_s23 + $0x10] sm:$0xff]  ;;  %v1761_v18 = vmul.f32 0.5, %v7406_v62  ;;  %v3139_v51 = vld [vmem:[#allocation8 + $0x520] sm:$0xff] }
 0x25d   : > { %v5500_v2 = vpop.eup %5499  ;;  %v2033_v45 = vmul.f32 0.70710677, %v7430_v13  ;;  %v2770_v61 = vmul.f32 %v2514_v26, %v1746_v59  ;;  %4904 = vmatpush1.bf16.msra.mxu0 %v4903_v44  ;;  %v3140_v54 = vld [vmem:[#allocation8 + $0x528] sm:$0xff]  ;;  %v4915_v26 = vpack.c.bf16 %v3137_v40, %v3135_v47  ;;  %v5928_v47 = vld [vmem:[%s6412_s23 + $0x48] sm:$0xff] }
 0x25e   : > { %v5502_v35 = vpop.eup %5501  ;;  %v2521_v39 = vadd.f32 1.0, %v5500_v2  ;;  %v2034_v27 = vmul.f32 0.70710677, %v7435_v41  ;;  %v1056_v12 = vpop.f32.mrb[86].mxu1  ;;  %4906 = vmatprep.subr.bf16.mxu0 %v4905_v30  ;;  %v4917_v52 = vpack.c.bf16 %v3142_v3, %v3140_v54  ;;  %v3141_v2 = vld [vmem:[#allocation8 + $0x530] sm:$0xff] }
 0x25f   : > { %v2522_v9 = vadd.f32 1.0, %v5502_v35  ;;  %5511 = verf.f32 %v2033_v45  ;;  %v7442_v43 = vadd.f32 %v1056_v12, %v7292_v21  ;;  %v1058_v6 = vpop.f32.mrb[87].mxu1  ;;  %1503 = vmatmul.mubr.f32.vlgmr.msra.gmra.mrb[192].mxu1 %v5921_v55  ;;  %3600 = vmatprep.mubr.f32.mxu0 %v2770_v61  ;;  %v1770_v45 = vmul.f32 0.5, %v7423_v14  ;;  %v3146_v12 = vld [vmem:[#allocation8 + $0x558] sm:$0xff] }
 0x260   : > { %5513 = verf.f32 %v2034_v27  ;;  %v7447_v49 = vadd.f32 %v1058_v6, %v7304_v38  ;;  %3601 = vmatmul.mubr.f32.gmra.mrb[12].mxu0 %v2769_v8  ;;  %1508 = vmatprep.mubr.f32.mxu1 %v5922_v24  ;;  %v2777_v42 = vmul.f32 %v2521_v39, %v1753_v16  ;;  %v5925_v39 = vld [vmem:[%s6412_s23 + $0x20] sm:$0xff]  ;;  %v3144_v27 = vld [vmem:[#allocation8 + $0x548] sm:$0xff]  ;;  %v1769_v8 = vmul.f32 0.5, %v7418_v58  ;;  %v3143_v24 = vld [vmem:[#allocation8 + $0x540] sm:$0xff] }
 0x261   : > { %v5504_v25 = vpop.eup %5503  ;;  %v2041_v28 = vmul.f32 0.70710677, %v7442_v43  ;;  %v2778_v56 = vmul.f32 %v2522_v9, %v1754_v5  ;;  %4908 = vmatpush1.bf16.msra.mxu0 %v4907_v63  ;;  %v4919_v9 = vpack.c.bf16 %v3141_v2, %v3139_v51  ;;  %v4921_v16 = vpack.c.bf16 %v3146_v12, %v3144_v27  ;;  %v5930_v51 = vld [vmem:[%s6412_s23 + $0x58] sm:$0xff] }
 0x262   : > { %v5506_v36 = vpop.eup %5505  ;;  %v2529_v50 = vadd.f32 1.0, %v5504_v25  ;;  %v2042_v53 = vmul.f32 0.70710677, %v7447_v49  ;;  %v1062_v23 = vpop.f32.mrb[88].mxu1  ;;  %4910 = vmatprep.subr.bf16.mxu0 %v4909_v57  ;;  %v3145_v25 = vld [vmem:[#allocation8 + $0x550] sm:$0xff] }
 0x263   : > { %v2530_v31 = vadd.f32 1.0, %v5506_v36  ;;  %5515 = verf.f32 %v2041_v28  ;;  %v7454_v44 = vadd.f32 %v1062_v23, %v7292_v21  ;;  %v1064_v32 = vpop.f32.mrb[89].mxu1  ;;  %1509 = vmatmul.mubr.f32.gmra.mrb[194].mxu1 %v5923_v1  ;;  %3606 = vmatprep.mubr.f32.mxu0 %v2778_v56  ;;  %v1778_v28 = vmul.f32 0.5, %v7435_v41  ;;  %v3150_v23 = vld [vmem:[#allocation8 + $0x578] sm:$0xff] }
 0x264   : > { %5517 = verf.f32 %v2042_v53  ;;  %v7459_v30 = vadd.f32 %v1064_v32, %v7304_v38  ;;  %3607 = vmatmul.mubr.f32.gmra.mrb[14].mxu0 %v2777_v42  ;;  %1514 = vmatprep.mubr.f32.mxu1 %v5924_v17  ;;  %v2785_v62 = vmul.f32 %v2529_v50, %v1761_v18  ;;  %v5927_v50 = vld [vmem:[%s6412_s23 + $0x30] sm:$0xff]  ;;  %v1777_v42 = vmul.f32 0.5, %v7430_v13  ;;  %v3147_v17 = vld [vmem:[#allocation8 + $0x560] sm:$0xff] }
 0x265   : > { %v5508_v19 = vpop.eup %5507  ;;  %v2049_v20 = vmul.f32 0.70710677, %v7454_v44  ;;  %v2786_v59 = vmul.f32 %v2530_v31, %v1762_v60  ;;  %4912 = vmatpush1.bf16.msra.mxu0 %v4911_v7  ;;  %v3148_v53 = vld [vmem:[#allocation8 + $0x568] sm:$0xff]  ;;  %v4923_v31 = vpack.c.bf16 %v3145_v25, %v3143_v24  ;;  %v5932_v24 = vld [vmem:[%s6412_s23 + $0x68] sm:$0xff] }
 0x266   : > { %v5510_v11 = vpop.eup %5509  ;;  %v2537_v34 = vadd.f32 1.0, %v5508_v19  ;;  %v2050_v37 = vmul.f32 0.70710677, %v7459_v30  ;;  %v1068_v33 = vpop.f32.mrb[90].mxu1  ;;  %4914 = vmatprep.subr.bf16.mxu0 %v4913_v0  ;;  %v4925_v18 = vpack.c.bf16 %v3150_v23, %v3148_v53  ;;  %v3149_v19 = vld [vmem:[#allocation8 + $0x570] sm:$0xff] }
 0x267   : > { %v2538_v61 = vadd.f32 1.0, %v5510_v11  ;;  %5519 = verf.f32 %v2049_v20  ;;  %v7466_v63 = vadd.f32 %v1068_v33, %v7292_v21  ;;  %v1070_v35 = vpop.f32.mrb[91].mxu1  ;;  %1515 = vmatmul.mubr.f32.gmra.mrb[196].mxu1 %v5925_v39  ;;  %3612 = vmatprep.mubr.f32.mxu0 %v2786_v59  ;;  %v1786_v20 = vmul.f32 0.5, %v7447_v49  ;;  %v3154_v33 = vld [vmem:[#allocation8 + $0x598] sm:$0xff] }
 0x268   : > { %5521 = verf.f32 %v2050_v37  ;;  %v7471_v57 = vadd.f32 %v1070_v35, %v7304_v38  ;;  %3613 = vmatmul.mubr.f32.gmra.mrb[16].mxu0 %v2785_v62  ;;  %1520 = vmatprep.mubr.f32.mxu1 %v5926_v29  ;;  %v2793_v58 = vmul.f32 %v2537_v34, %v1769_v8  ;;  %v5929_v34 = vld [vmem:[%s6412_s23 + $0x40] sm:$0xff]  ;;  %v3152_v37 = vld [vmem:[#allocation8 + $0x588] sm:$0xff]  ;;  %v1785_v62 = vmul.f32 0.5, %v7442_v43  ;;  %v3151_v29 = vld [vmem:[#allocation8 + $0x580] sm:$0xff] }
 0x269   : > { %v5512_v14 = vpop.eup %5511  ;;  %v2057_v15 = vmul.f32 0.70710677, %v7466_v63  ;;  %v2794_v5 = vmul.f32 %v2538_v61, %v1770_v45  ;;  %4916 = vmatpush1.bf16.msra.mxu0 %v4915_v26  ;;  %v4927_v61 = vpack.c.bf16 %v3149_v19, %v3147_v17  ;;  %v4929_v8 = vpack.c.bf16 %v3154_v33, %v3152_v37  ;;  %v5934_v17 = vld [vmem:[%s6412_s23 + $0x78] sm:$0xff] }
 0x26a   : > { %v5514_v6 = vpop.eup %5513  ;;  %v2545_v55 = vadd.f32 1.0, %v5512_v14  ;;  %v2058_v46 = vmul.f32 0.70710677, %v7471_v57  ;;  %v1074_v10 = vpop.f32.mrb[92].mxu1  ;;  %4918 = vmatprep.subr.bf16.mxu0 %v4917_v52  ;;  %v3153_v14 = vld [vmem:[#allocation8 + $0x590] sm:$0xff] }
 0x26b   : > { %v2546_v56 = vadd.f32 1.0, %v5514_v6  ;;  %5523 = verf.f32 %v2057_v15  ;;  %v7478_v7 = vadd.f32 %v1074_v10, %v7292_v21  ;;  %v1076_v36 = vpop.f32.mrb[93].mxu1  ;;  %1521 = vmatmul.mubr.f32.gmra.mrb[198].mxu1 %v5927_v50  ;;  %3618 = vmatprep.mubr.f32.mxu0 %v2794_v5  ;;  %v1794_v15 = vmul.f32 0.5, %v7459_v30  ;;  %v3158_v10 = vld [vmem:[#allocation8 + $0x5b8] sm:$0xff] }
 0x26c   : > { %5525 = verf.f32 %v2058_v46  ;;  %v7483_v0 = vadd.f32 %v1076_v36, %v7304_v38  ;;  %3619 = vmatmul.mubr.f32.gmra.mrb[18].mxu0 %v2793_v58  ;;  %1526 = vmatprep.mubr.f32.mxu1 %v5928_v47  ;;  %v2801_v13 = vmul.f32 %v2545_v55, %v1777_v42  ;;  %v5931_v55 = vld [vmem:[%s6412_s23 + $0x50] sm:$0xff]  ;;  %v1793_v58 = vmul.f32 0.5, %v7454_v44  ;;  %v3155_v47 = vld [vmem:[#allocation8 + $0x5a0] sm:$0xff] }
 0x26d   : > { %v5516_v41 = vpop.eup %5515  ;;  %v2065_v40 = vmul.f32 0.70710677, %v7478_v7  ;;  %v2802_v60 = vmul.f32 %v2546_v56, %v1778_v28  ;;  %4920 = vmatpush1.bf16.msra.mxu0 %v4919_v9  ;;  %v3156_v46 = vld [vmem:[#allocation8 + $0x5a8] sm:$0xff]  ;;  %v4931_v56 = vpack.c.bf16 %v3153_v14, %v3151_v29  ;;  %v5936_v29 = vld [vmem:[%s6412_s23 + $0x88] sm:$0xff] }
 0x26e   : > { %v5518_v32 = vpop.eup %5517  ;;  %v2553_v1 = vadd.f32 1.0, %v5516_v41  ;;  %v2066_v54 = vmul.f32 0.70710677, %v7483_v0  ;;  %v1080_v3 = vpop.f32.mrb[94].mxu1  ;;  %4922 = vmatprep.subr.bf16.mxu0 %v4921_v16  ;;  %v4933_v42 = vpack.c.bf16 %v3158_v10, %v3156_v46  ;;  %v3157_v41 = vld [vmem:[#allocation8 + $0x5b0] sm:$0xff] }
 0x26f   : > { %v2554_v59 = vadd.f32 1.0, %v5518_v32  ;;  %5527 = verf.f32 %v2065_v40  ;;  %v7490_v26 = vadd.f32 %v1080_v3, %v7292_v21  ;;  %v1082_v11 = vpop.f32.mrb[95].mxu1  ;;  %1527 = vmatmul.mubr.f32.gmra.mrb[200].mxu1 %v5929_v34  ;;  %3624 = vmatprep.mubr.f32.mxu0 %v2802_v60  ;;  %v1802_v40 = vmul.f32 0.5, %v7471_v57  ;;  %v3162_v3 = vld [vmem:[#allocation8 + $0x5d8] sm:$0xff] }
 0x270   : > { %5529 = verf.f32 %v2066_v54  ;;  %v7495_v52 = vadd.f32 %v1082_v11, %v7304_v38  ;;  %3625 = vmatmul.mubr.f32.gmra.mrb[20].mxu0 %v2801_v13  ;;  %1532 = vmatprep.mubr.f32.mxu1 %v5930_v51  ;;  %v2809_v43 = vmul.f32 %v2553_v1, %v1785_v62  ;;  %v5933_v1 = vld [vmem:[%s6412_s23 + $0x60] sm:$0xff]  ;;  %v3160_v54 = vld [vmem:[#allocation8 + $0x5c8] sm:$0xff]  ;;  %v1801_v13 = vmul.f32 0.5, %v7466_v63  ;;  %v3159_v51 = vld [vmem:[#allocation8 + $0x5c0] sm:$0xff] }
 0x271   : > { %v5520_v49 = vpop.eup %5519  ;;  %v2073_v2 = vmul.f32 0.70710677, %v7490_v26  ;;  %v2810_v45 = vmul.f32 %v2554_v59, %v1786_v20  ;;  %4924 = vmatpush1.bf16.msra.mxu0 %v4923_v31  ;;  %v4935_v59 = vpack.c.bf16 %v3157_v41, %v3155_v47  ;;  %v4937_v62 = vpack.c.bf16 %v3162_v3, %v3160_v54  ;;  %v5938_v47 = vld [vmem:[%s6412_s23 + $0x98] sm:$0xff] }
 0x272   : > { %v5522_v35 = vpop.eup %5521  ;;  %v2561_v39 = vadd.f32 1.0, %v5520_v49  ;;  %v2074_v27 = vmul.f32 0.70710677, %v7495_v52  ;;  %v1086_v12 = vpop.f32.mrb[96].mxu1  ;;  %4926 = vmatprep.subr.bf16.mxu0 %v4925_v18  ;;  %v3161_v49 = vld [vmem:[#allocation8 + $0x5d0] sm:$0xff] }
 0x273   : > { %v2562_v5 = vadd.f32 1.0, %v5522_v35  ;;  %5531 = verf.f32 %v2073_v2  ;;  %v7502_v9 = vadd.f32 %v1086_v12, %v7292_v21  ;;  %v1088_v6 = vpop.f32.mrb[97].mxu1  ;;  %1533 = vmatmul.mubr.f32.gmra.mrb[202].mxu1 %v5931_v55  ;;  %3630 = vmatprep.mubr.f32.mxu0 %v2810_v45  ;;  %v1810_v2 = vmul.f32 0.5, %v7483_v0  ;;  %v3166_v12 = vld [vmem:[#allocation8 + $0x5f8] sm:$0xff] }
 0x274   : > { %5533 = verf.f32 %v2074_v27  ;;  %v7507_v16 = vadd.f32 %v1088_v6, %v7304_v38  ;;  %3631 = vmatmul.mubr.f32.gmra.mrb[22].mxu0 %v2809_v43  ;;  %1538 = vmatprep.mubr.f32.mxu1 %v5932_v24  ;;  %v2817_v44 = vmul.f32 %v2561_v39, %v1793_v58  ;;  %v5935_v39 = vld [vmem:[%s6412_s23 + $0x70] sm:$0xff]  ;;  %v1809_v43 = vmul.f32 0.5, %v7478_v7  ;;  %v3163_v24 = vld [vmem:[#allocation8 + $0x5e0] sm:$0xff] }
 0x275   : > { %v5524_v30 = vpop.eup %5523  ;;  %v2081_v25 = vmul.f32 0.70710677, %v7502_v9  ;;  %v2818_v28 = vmul.f32 %v2562_v5, %v1794_v15  ;;  %4928 = vmatpush1.bf16.msra.mxu0 %v4927_v61  ;;  %v3164_v27 = vld [vmem:[#allocation8 + $0x5e8] sm:$0xff]  ;;  %v4939_v5 = vpack.c.bf16 %v3161_v49, %v3159_v51 }
 0x276   : > { %v5526_v36 = vpop.eup %5525  ;;  %v2569_v50 = vadd.f32 1.0, %v5524_v30  ;;  %v2082_v53 = vmul.f32 0.70710677, %v7507_v16  ;;  %v1092_v23 = vpop.f32.mrb[98].mxu1  ;;  %4930 = vmatprep.subr.bf16.mxu0 %v4929_v8  ;;  %v4941_v58 = vpack.c.bf16 %v3166_v12, %v3164_v27  ;;  %v3165_v30 = vld [vmem:[#allocation8 + $0x5f0] sm:$0xff]  ;;  %v5941_v12 = vld [vmem:[%s6412_s23 + $0xa0] sm:$0xff] }
 0x277   : > { %v2570_v60 = vadd.f32 1.0, %v5526_v36  ;;  %5535 = verf.f32 %v2081_v25  ;;  %v7514_v31 = vadd.f32 %v1092_v23, %v7292_v21  ;;  %v1094_v32 = vpop.f32.mrb[99].mxu1  ;;  %1539 = vmatmul.mubr.f32.gmra.mrb[204].mxu1 %v5933_v1  ;;  %3636 = vmatprep.mubr.f32.mxu0 %v2818_v28  ;;  %v1818_v25 = vmul.f32 0.5, %v7495_v52  ;;  %v3170_v23 = vld [vmem:[#allocation8 + $0x618] sm:$0xff] }
 0x278   : > { %5537 = verf.f32 %v2082_v53  ;;  %v7519_v18 = vadd.f32 %v1094_v32, %v7304_v38  ;;  %3637 = vmatmul.mubr.f32.gmra.mrb[24].mxu0 %v2817_v44  ;;  %1544 = vmatprep.mubr.f32.mxu1 %v5934_v17  ;;  %v2825_v63 = vmul.f32 %v2569_v50, %v1801_v13  ;;  %v5937_v50 = vld [vmem:[%s6412_s23 + $0x80] sm:$0xff]  ;;  %v3168_v53 = vld [vmem:[#allocation8 + $0x608] sm:$0xff]  ;;  %v1817_v44 = vmul.f32 0.5, %v7490_v26 }
 0x279   : > { %v5528_v57 = vpop.eup %5527  ;;  %v2089_v19 = vmul.f32 0.70710677, %v7514_v31  ;;  %v2826_v20 = vmul.f32 %v2570_v60, %v1802_v40  ;;  %4932 = vmatpush1.bf16.msra.mxu0 %v4931_v56  ;;  %v4943_v60 = vpack.c.bf16 %v3165_v30, %v3163_v24  ;;  %v4945_v13 = vpack.c.bf16 %v3170_v23, %v3168_v53  ;;  %v5943_v30 = vld [vmem:[%s6412_s23 + $0xb0] sm:$0xff] }
 0x27a   : > { %v5530_v11 = vpop.eup %5529  ;;  %v2577_v34 = vadd.f32 1.0, %v5528_v57  ;;  %v2090_v37 = vmul.f32 0.70710677, %v7519_v18  ;;  %v1098_v33 = vpop.f32.mrb[100].mxu1  ;;  %4934 = vmatprep.subr.bf16.mxu0 %v4933_v42  ;;  %v1826_v17 = vmul.f32 0.5, %v7507_v16 }
 0x27b   : > { %v2578_v45 = vadd.f32 1.0, %v5530_v11  ;;  %5539 = verf.f32 %v2089_v19  ;;  %v7526_v61 = vadd.f32 %v1098_v33, %v7292_v21  ;;  %v1100_v35 = vpop.f32.mrb[101].mxu1  ;;  %1545 = vmatmul.mubr.f32.gmra.mrb[206].mxu1 %v5935_v39  ;;  %3642 = vmatprep.mubr.f32.mxu0 %v2826_v20  ;;  %v1825_v11 = vmul.f32 0.5, %v7502_v9 }
 0x27c   : > { %5541 = verf.f32 %v2090_v37  ;;  %v7531_v8 = vadd.f32 %v1100_v35, %v7304_v38  ;;  %3643 = vmatmul.mubr.f32.gmra.mrb[26].mxu0 %v2825_v63  ;;  %1550 = vmatprep.mubr.f32.mxu1 %v5936_v29  ;;  %v2833_v7 = vmul.f32 %v2577_v34, %v1809_v43  ;;  %v5940_v37 = vld [vmem:[%s6412_s23 + $0xa8] sm:$0xff]  ;;  %v1833_v43 = vmul.f32 0.5, %v7514_v31 }
 0x27d   : > { %v5532_v0 = vpop.eup %5531  ;;  %v2097_v14 = vmul.f32 0.70710677, %v7526_v61  ;;  %v2834_v15 = vmul.f32 %v2578_v45, %v1810_v2  ;;  %4936 = vmatpush1.bf16.msra.mxu0 %v4935_v59  ;;  %v5939_v59 = vld [vmem:[%s6412_s23 + $0x90] sm:$0xff]  ;;  %v1834_v45 = vmul.f32 0.5, %v7519_v18 }
 0x27e   : > { %v5534_v6 = vpop.eup %5533  ;;  %v2585_v55 = vadd.f32 1.0, %v5532_v0  ;;  %v2098_v46 = vmul.f32 0.70710677, %v7531_v8  ;;  %v1104_v10 = vpop.f32.mrb[102].mxu1  ;;  %4938 = vmatprep.subr.bf16.mxu0 %v4937_v62  ;;  %v5942_v0 = vld [vmem:[%s6412_s23 + $0xb8] sm:$0xff]  ;;  %v1842_v31 = vmul.f32 0.5, %v7531_v8 }
 0x27f   : > { %v2586_v28 = vadd.f32 1.0, %v5534_v6  ;;  %5543 = verf.f32 %v2097_v14  ;;  %v7538_v56 = vadd.f32 %v1104_v10, %v7292_v21  ;;  %v1106_v36 = vpop.f32.mrb[103].mxu1  ;;  %1551 = vmatmul.mubr.f32.gmra.mrb[208].mxu1 %v5937_v50  ;;  %3648 = vmatprep.mubr.f32.mxu0 %v2834_v15 }
 0x280   : > { %5545 = verf.f32 %v2098_v46  ;;  %v7543_v42 = vadd.f32 %v1106_v36, %v7304_v38  ;;  %3649 = vmatmul.mubr.f32.gmra.mrb[28].mxu0 %v2833_v7  ;;  %1556 = vmatprep.mubr.f32.mxu1 %v5938_v47  ;;  %v2841_v26 = vmul.f32 %v2585_v55, %v1817_v44  ;;  %v5944_v36 = vld [vmem:[%s6412_s23 + $0xc8] sm:$0xff] }
 0x281   : > { %v5536_v52 = vpop.eup %5535  ;;  %v2105_v41 = vmul.f32 0.70710677, %v7538_v56  ;;  %v2842_v40 = vmul.f32 %v2586_v28, %v1818_v25  ;;  %4940 = vmatpush1.bf16.msra.mxu0 %v4939_v5  ;;  %v1841_v25 = vmul.f32 0.5, %v7526_v61 }
 0x282   : > { %v5538_v32 = vpop.eup %5537  ;;  %v2593_v1 = vadd.f32 1.0, %v5536_v52  ;;  %v2106_v54 = vmul.f32 0.70710677, %v7543_v42  ;;  %v1110_v3 = vpop.f32.mrb[104].mxu1  ;;  %4942 = vmatprep.subr.bf16.mxu0 %v4941_v58  ;;  %v1850_v61 = vmul.f32 0.5, %v7543_v42 }
 0x283   : > { %v2594_v57 = vadd.f32 1.0, %v5538_v32  ;;  %5547 = verf.f32 %v2105_v41  ;;  %v7550_v19 = vadd.f32 %v1110_v3, %v7292_v21  ;;  %v1112_v20 = vpop.f32.mrb[105].mxu1  ;;  %1557 = vmatmul.mubr.f32.gmra.mrb[210].mxu1 %v5939_v59  ;;  %3654 = vmatprep.mubr.f32.mxu0 %v2842_v40 }
 0x284   : > { %5549 = verf.f32 %v2106_v54  ;;  %v7555_v34 = vadd.f32 %v1112_v20, %v7304_v38  ;;  %3655 = vmatmul.mubr.f32.gmra.mrb[30].mxu0 %v2841_v26  ;;  %1562 = vmatprep.mubr.f32.mxu1 %v5940_v37  ;;  %v2849_v9 = vmul.f32 %v2593_v1, %v1825_v11  ;;  %v5945_v1 = vld [vmem:[%s6412_s23 + $0xc0] sm:$0xff]  ;;  %v1849_v54 = vmul.f32 0.5, %v7538_v56  ;;  %v5946_v26 = vld [vmem:[%s6412_s23 + $0xd8] sm:$0xff] }
 0x285   : > { %v5540_v16 = vpop.eup %5539  ;;  %v2113_v33 = vmul.f32 0.70710677, %v7550_v19  ;;  %v2850_v63 = vmul.f32 %v2594_v57, %v1826_v17  ;;  %4944 = vmatpush1.bf16.msra.mxu0 %v4943_v60 }
 0x286   : > { %v5542_v62 = vpop.eup %5541  ;;  %v2601_v51 = vadd.f32 1.0, %v5540_v16  ;;  %v2114_v49 = vmul.f32 0.70710677, %v7555_v34  ;;  %v1116_v2 = vpop.f32.mrb[106].mxu1  ;;  %4946 = vmatprep.subr.bf16.mxu0 %v4945_v13  ;;  %v1858_v56 = vmul.f32 0.5, %v7555_v34 }
 0x287   : > { %v2602_v35 = vadd.f32 1.0, %v5542_v62  ;;  %5551 = verf.f32 %v2113_v33  ;;  %v7562_v39 = vadd.f32 %v1116_v2, %v7292_v21  ;;  %v1118_v27 = vpop.f32.mrb[107].mxu1  ;;  %1563 = vmatmul.mubr.f32.gmra.mrb[212].mxu1 %v5941_v12  ;;  %3660 = vmatprep.mubr.f32.mxu0 %v2850_v63  ;;  %v5947_v62 = vld [vmem:[%s6412_s23 + $0xd0] sm:$0xff]  ;;  %v5948_v2 = vld [vmem:[%s6412_s23 + $0xe8] sm:$0xff] }
 0x288   : > { %5553 = verf.f32 %v2114_v49  ;;  %v7567_v29 = vadd.f32 %v1118_v27, %v7304_v38  ;;  %3661 = vmatmul.mubr.f32.gmra.mrb[32].mxu0 %v2849_v9  ;;  %1568 = vmatprep.mubr.f32.mxu1 %v5942_v0  ;;  %v2857_v10 = vmul.f32 %v2601_v51, %v1833_v43  ;;  %v1857_v51 = vmul.f32 0.5, %v7550_v19 }
 0x289   : > { %v5544_v18 = vpop.eup %5543  ;;  %v2121_v14 = vmul.f32 0.70710677, %v7562_v39  ;;  %v2858_v15 = vmul.f32 %v2602_v35, %v1834_v45 }
 0x28a   : > { %v5546_v5 = vpop.eup %5545  ;;  %v2609_v6 = vadd.f32 1.0, %v5544_v18  ;;  %v2122_v55 = vmul.f32 0.70710677, %v7567_v29  ;;  %v1122_v46 = vpop.f32.mrb[108].mxu1  ;;  %v1866_v19 = vmul.f32 0.5, %v7567_v29 }
 0x28b   : > { %v2610_v7 = vadd.f32 1.0, %v5546_v5  ;;  %5555 = verf.f32 %v2121_v14  ;;  %v7574_v58 = vadd.f32 %v1122_v46, %v7292_v21  ;;  %v1124_v24 = vpop.f32.mrb[109].mxu1  ;;  %1569 = vmatmul.mubr.f32.gmra.mrb[214].mxu1 %v5943_v30  ;;  %3666 = vmatprep.mubr.f32.mxu0 %v2858_v15  ;;  %v5949_v5 = vld [vmem:[%s6412_s23 + $0xe0] sm:$0xff]  ;;  %v5950_v46 = vld [vmem:[%s6412_s23 + $0xf8] sm:$0xff] }
 0x28c   : > { %5557 = verf.f32 %v2122_v55  ;;  %v7579_v28 = vadd.f32 %v1124_v24, %v7304_v38  ;;  %3667 = vmatmul.mubr.f32.gmra.mrb[34].mxu0 %v2857_v10  ;;  %1574 = vmatprep.mubr.f32.mxu1 %v5944_v36  ;;  %v2865_v41 = vmul.f32 %v2609_v6, %v1841_v25  ;;  %v1865_v6 = vmul.f32 0.5, %v7562_v39 }
 0x28d   : > { %v5548_v8 = vpop.eup %5547  ;;  %v2129_v50 = vmul.f32 0.70710677, %v7574_v58  ;;  %v2866_v53 = vmul.f32 %v2610_v7, %v1842_v31 }
 0x28e   : > { %v5550_v23 = vpop.eup %5549  ;;  %v2617_v44 = vadd.f32 1.0, %v5548_v8  ;;  %v2130_v47 = vmul.f32 0.70710677, %v7579_v28  ;;  %v1128_v52 = vpop.f32.mrb[110].mxu1  ;;  %v1874_v39 = vmul.f32 0.5, %v7579_v28 }
 0x28f   : > { %v2618_v40 = vadd.f32 1.0, %v5550_v23  ;;  %5559 = verf.f32 %v2129_v50  ;;  %v7586_v60 = vadd.f32 %v1128_v52, %v7292_v21  ;;  %v1130_v32 = vpop.f32.mrb[111].mxu1  ;;  %1575 = vmatmul.mubr.f32.gmra.mrb[216].mxu1 %v5945_v1  ;;  %3672 = vmatprep.mubr.f32.mxu0 %v2866_v53  ;;  %v5951_v23 = vld [vmem:[%s6412_s23 + $0xf0] sm:$0xff]  ;;  %v5952_v52 = vld [vmem:[%s6412_s23 + $0x108] sm:$0xff] }
 0x290   : > { %5561 = verf.f32 %v2130_v47  ;;  %v7591_v3 = vadd.f32 %v1130_v32, %v7304_v38  ;;  %3673 = vmatmul.mubr.f32.gmra.mrb[36].mxu0 %v2865_v41  ;;  %1580 = vmatprep.mubr.f32.mxu1 %v5946_v26  ;;  %v2873_v37 = vmul.f32 %v2617_v44, %v1849_v54  ;;  %v1873_v44 = vmul.f32 0.5, %v7574_v58 }
 0x291   : > { %v5552_v42 = vpop.eup %5551  ;;  %v2137_v13 = vmul.f32 0.70710677, %v7586_v60  ;;  %v2874_v17 = vmul.f32 %v2618_v40, %v1850_v61 }
 0x292   : > { %v5554_v57 = vpop.eup %5553  ;;  %v2625_v20 = vadd.f32 1.0, %v5552_v42  ;;  %v2138_v59 = vmul.f32 0.70710677, %v7591_v3  ;;  %v1134_v11 = vpop.f32.mrb[112].mxu1  ;;  %v1882_v58 = vmul.f32 0.5, %v7591_v3 }
 0x293   : > { %v2626_v16 = vadd.f32 1.0, %v5554_v57  ;;  %5563 = verf.f32 %v2137_v13  ;;  %v7598_v33 = vadd.f32 %v1134_v11, %v7292_v21  ;;  %v1136_v63 = vpop.f32.mrb[113].mxu1  ;;  %1581 = vmatmul.mubr.f32.gmra.mrb[218].mxu1 %v5947_v62  ;;  %3678 = vmatprep.mubr.f32.mxu0 %v2874_v17  ;;  %v5953_v57 = vld [vmem:[%s6412_s23 + $0x100] sm:$0xff]  ;;  %v5954_v11 = vld [vmem:[%s6412_s23 + $0x118] sm:$0xff] }
 0x294   : > { %5565 = verf.f32 %v2138_v59  ;;  %v7603_v49 = vadd.f32 %v1136_v63, %v7304_v38  ;;  %3679 = vmatmul.mubr.f32.gmra.mrb[38].mxu0 %v2873_v37  ;;  %1586 = vmatprep.mubr.f32.mxu1 %v5948_v2  ;;  %v2881_v0 = vmul.f32 %v2625_v20, %v1857_v51  ;;  %v1881_v20 = vmul.f32 0.5, %v7586_v60 }
 0x295   : > { %v5556_v34 = vpop.eup %5555  ;;  %v2145_v9 = vmul.f32 0.70710677, %v7598_v33  ;;  %v2882_v45 = vmul.f32 %v2626_v16, %v1858_v56 }
 0x296   : > { %v5558_v35 = vpop.eup %5557  ;;  %v2633_v27 = vadd.f32 1.0, %v5556_v34  ;;  %v2146_v12 = vmul.f32 0.70710677, %v7603_v49  ;;  %v1140_v43 = vpop.f32.mrb[114].mxu1  ;;  %v1890_v60 = vmul.f32 0.5, %v7603_v49 }
 0x297   : > { %v2634_v18 = vadd.f32 1.0, %v5558_v35  ;;  %5567 = verf.f32 %v2145_v9  ;;  %v7610_v14 = vadd.f32 %v1140_v43, %v7292_v21  ;;  %v1142_v15 = vpop.f32.mrb[115].mxu1  ;;  %1587 = vmatmul.mubr.f32.gmra.mrb[220].mxu1 %v5949_v5  ;;  %3684 = vmatprep.mubr.f32.mxu0 %v2882_v45  ;;  %v5955_v35 = vld [vmem:[%s6412_s23 + $0x110] sm:$0xff]  ;;  %v5956_v43 = vld [vmem:[%s6412_s23 + $0x128] sm:$0xff] }
 0x298   : > { %5569 = verf.f32 %v2146_v12  ;;  %v7615_v55 = vadd.f32 %v1142_v15, %v7304_v38  ;;  %3685 = vmatmul.mubr.f32.gmra.mrb[40].mxu0 %v2881_v0  ;;  %1592 = vmatprep.mubr.f32.mxu1 %v5950_v46  ;;  %v2889_v36 = vmul.f32 %v2633_v27, %v1865_v6  ;;  %v1889_v27 = vmul.f32 0.5, %v7598_v33 }
 0x299   : > { %v5560_v29 = vpop.eup %5559  ;;  %v2153_v10 = vmul.f32 0.70710677, %v7610_v14  ;;  %v2890_v31 = vmul.f32 %v2634_v18, %v1866_v19 }
 0x29a   : > { %v5562_v7 = vpop.eup %5561  ;;  %v2641_v24 = vadd.f32 1.0, %v5560_v29  ;;  %v2154_v30 = vmul.f32 0.70710677, %v7615_v55  ;;  %v1146_v25 = vpop.f32.mrb[116].mxu1  ;;  %v1898_v33 = vmul.f32 0.5, %v7615_v55 }
 0x29b   : > { %v2642_v8 = vadd.f32 1.0, %v5562_v7  ;;  %5571 = verf.f32 %v2153_v10  ;;  %v7622_v50 = vadd.f32 %v1146_v25, %v7292_v21  ;;  %v1148_v53 = vpop.f32.mrb[117].mxu1  ;;  %1593 = vmatmul.mubr.f32.gmra.mrb[222].mxu1 %v5951_v23  ;;  %3690 = vmatprep.mubr.f32.mxu0 %v2890_v31  ;;  %v5957_v7 = vld [vmem:[%s6412_s23 + $0x120] sm:$0xff]  ;;  %v5958_v25 = vld [vmem:[%s6412_s23 + $0x138] sm:$0xff] }
 0x29c   : > { %5573 = verf.f32 %v2154_v30  ;;  %v7627_v47 = vadd.f32 %v1148_v53, %v7304_v38  ;;  %3691 = vmatmul.mubr.f32.gmra.mrb[42].mxu0 %v2889_v36  ;;  %1598 = vmatprep.mubr.f32.mxu1 %v5952_v52  ;;  %v2897_v26 = vmul.f32 %v2641_v24, %v1873_v44  ;;  %v1897_v24 = vmul.f32 0.5, %v7610_v14 }
 0x29d   : > { %v5564_v28 = vpop.eup %5563  ;;  %v2161_v41 = vmul.f32 0.70710677, %v7622_v50  ;;  %v2898_v61 = vmul.f32 %v2642_v8, %v1874_v39  ;;  %v645_v14 = vsub.s32 4, %v6720_v4 }
 0x29e   : > { %v5566_v40 = vpop.eup %5565  ;;  %v2649_v32 = vadd.f32 1.0, %v5564_v28  ;;  %v2162_v1 = vmul.f32 0.70710677, %v7627_v47  ;;  %v1152_v54 = vpop.f32.mrb[118].mxu1  ;;  %v1906_v28 = vmul.f32 0.5, %v7627_v47  ;;  %v649_v47 = vsub.s32 5, %v6720_v4 }
 0x29f   : > { %v2650_v42 = vadd.f32 1.0, %v5566_v40  ;;  %5575 = verf.f32 %v2161_v41  ;;  %v7634_v13 = vadd.f32 %v1152_v54, %v7292_v21  ;;  %v1154_v17 = vpop.f32.mrb[119].mxu1  ;;  %1599 = vmatmul.mubr.f32.gmra.mrb[224].mxu1 %v5953_v57  ;;  %3696 = vmatprep.mubr.f32.mxu0 %v2898_v61 }
 0x2a0   : > { %5577 = verf.f32 %v2162_v1  ;;  %v7639_v59 = vadd.f32 %v1154_v17, %v7304_v38  ;;  %3697 = vmatmul.mubr.f32.gmra.mrb[44].mxu0 %v2897_v26  ;;  %1604 = vmatprep.mubr.f32.mxu1 %v5954_v11  ;;  %v2905_v2 = vmul.f32 %v2649_v32, %v1881_v20  ;;  %v5959_v32 = vld [vmem:[%s6412_s23 + $0x130] sm:$0xff]  ;;  %v1905_v1 = vmul.f32 0.5, %v7622_v50  ;;  %v5960_v26 = vld [vmem:[%s6412_s23 + $0x148] sm:$0xff] }
 0x2a1   : > { %v5568_v3 = vpop.eup %5567  ;;  %v2169_v37 = vmul.f32 0.70710677, %v7634_v13  ;;  %v2906_v56 = vmul.f32 %v2650_v42, %v1882_v58 }
 0x2a2   : > { %v5570_v16 = vpop.eup %5569  ;;  %v2657_v63 = vadd.f32 1.0, %v5568_v3  ;;  %v2170_v62 = vmul.f32 0.70710677, %v7639_v59  ;;  %v1158_v51 = vpop.f32.mrb[120].mxu1 }
 0x2a3   : > { %v2658_v34 = vadd.f32 1.0, %v5570_v16  ;;  %5579 = verf.f32 %v2169_v37  ;;  %v7646_v9 = vadd.f32 %v1158_v51, %v7292_v21  ;;  %v1160_v45 = vpop.f32.mrb[121].mxu1  ;;  %1605 = vmatmul.mubr.f32.gmra.mrb[226].mxu1 %v5955_v35  ;;  %3702 = vmatprep.mubr.f32.mxu0 %v2906_v56  ;;  %v5961_v37 = vld [vmem:[#allocation7] sm:$0xff]  ;;  %v1914_v16 = vmul.f32 0.5, %v7639_v59 }
 0x2a4   : > { %5581 = verf.f32 %v2170_v62  ;;  %v7651_v12 = vadd.f32 %v1160_v45, %v7304_v38  ;;  %3703 = vmatmul.mubr.f32.gmra.mrb[46].mxu0 %v2905_v2  ;;  %1610 = vmatprep.mubr.f32.mxu1 %v5956_v43  ;;  %v2913_v46 = vmul.f32 %v2657_v63, %v1889_v27  ;;  %v7682_v56 = vrot.slane %v5961_v37, %v645_v14  ;;  %v5962_v2 = vld [vmem:[%s6412_s23 + $0x140] sm:$0xff]  ;;  %v5963_v45 = vld [vmem:[%s6412_s23 + $0x158] sm:$0xff] }
 0x2a5   : > { %v5572_v49 = vpop.eup %5571  ;;  %v2177_v0 = vmul.f32 0.70710677, %v7646_v9  ;;  %v2914_v19 = vmul.f32 %v2658_v34, %v1890_v60  ;;  %v1913_v60 = vmul.f32 0.5, %v7634_v13  ;;  %v7694_v59 = vrot.slane %v5961_v37, %v649_v47 }
 0x2a6   : > { %v5574_v18 = vpop.eup %5573  ;;  %v2665_v15 = vadd.f32 1.0, %v5572_v49  ;;  %v2178_v5 = vmul.f32 0.70710677, %v7651_v12  ;;  %v1164_v6 = vpop.f32.mrb[122].mxu1 }
 0x2a7   : > { %v2666_v29 = vadd.f32 1.0, %v5574_v18  ;;  %5583 = verf.f32 %v2177_v0  ;;  %v7658_v10 = vadd.f32 %v1164_v6, %v7292_v21  ;;  %v1166_v31 = vpop.f32.mrb[123].mxu1  ;;  %1611 = vmatmul.mubr.f32.gmra.mrb[228].mxu1 %v5957_v7  ;;  %3708 = vmatprep.mubr.f32.mxu0 %v2914_v19  ;;  %v5964_v6 = vld [vmem:[%s6412_s23 + $0x150] sm:$0xff] }
 0x2a8   : > { %5585 = verf.f32 %v2178_v5  ;;  %v7663_v30 = vadd.f32 %v1166_v31, %v7304_v38  ;;  %3709 = vmatmul.mubr.f32.gmra.mrb[48].mxu0 %v2913_v46  ;;  %1616 = vmatprep.mubr.f32.mxu1 %v5958_v25  ;;  %v2921_v52 = vmul.f32 %v2665_v15, %v1897_v24  ;;  %v1921_v46 = vmul.f32 0.5, %v7646_v9 }
 0x2a9   : > { %v5576_v55 = vpop.eup %5575  ;;  %v2185_v36 = vmul.f32 0.70710677, %v7658_v10  ;;  %v2922_v39 = vmul.f32 %v2666_v29, %v1898_v33  ;;  %v5965_v29 = vld [vmem:[%s6412_s23 + $0x168] sm:$0xff] }
 0x2aa   : > { %v5578_v8 = vpop.eup %5577  ;;  %v2673_v53 = vadd.f32 1.0, %v5576_v55  ;;  %v2186_v23 = vmul.f32 0.70710677, %v7663_v30  ;;  %v1170_v44 = vpop.f32.mrb[124].mxu1  ;;  %v1930_v9 = vmul.f32 0.5, %v7663_v30 }
 0x2ab   : > { %v2674_v41 = vadd.f32 1.0, %v5578_v8  ;;  %5587 = verf.f32 %v2185_v36  ;;  %v7671_v61 = vadd.f32 %v1170_v44, %v7292_v21  ;;  %v1172_v40 = vpop.f32.mrb[125].mxu1  ;;  %1617 = vmatmul.mubr.f32.gmra.mrb[230].mxu1 %v5959_v32  ;;  %3714 = vmatprep.mubr.f32.mxu0 %v2922_v39  ;;  %v5966_v44 = vld [vmem:[%s6412_s23 + $0x160] sm:$0xff] }
 0x2ac   : > { %5589 = verf.f32 %v2186_v23  ;;  %v7676_v54 = vadd.f32 %v1172_v40, %v7304_v38  ;;  %3715 = vmatmul.mubr.f32.gmra.mrb[50].mxu0 %v2921_v52  ;;  %1622 = vmatprep.mubr.f32.mxu1 %v5960_v26  ;;  %v2929_v50 = vmul.f32 %v2673_v53, %v1905_v1  ;;  %v1929_v52 = vmul.f32 0.5, %v7658_v10 }
 0x2ad   : > { %v5580_v58 = vpop.eup %5579  ;;  %v2193_v42 = vmul.f32 0.70710677, %v7671_v61  ;;  %v2930_v17 = vmul.f32 %v2674_v41, %v1906_v28  ;;  %v5967_v28 = vld [vmem:[%s6412_s23 + $0x178] sm:$0xff] }
 0x2ae   : > { %v5582_v57 = vpop.eup %5581  ;;  %v2681_v20 = vadd.f32 1.0, %v5580_v58  ;;  %v2194_v11 = vmul.f32 0.70710677, %v7676_v54  ;;  %v1176_v3 = vpop.f32.mrb[126].mxu1  ;;  %v1938_v10 = vmul.f32 0.5, %v7676_v54 }
 0x2af   : > { %v2682_v63 = vadd.f32 1.0, %v5582_v57  ;;  %5591 = verf.f32 %v2193_v42  ;;  %v7686_v62 = vadd.f32 %v1176_v3, %v7292_v21  ;;  %v1178_v51 = vpop.f32.mrb[127].mxu1  ;;  %1623 = vmatmul.mubr.f32.gmra.mrb[232].mxu1 %v5962_v2  ;;  %3720 = vmatprep.mubr.f32.mxu0 %v2930_v17 }
 0x2b0   : > { %5593 = verf.f32 %v2194_v11  ;;  %v7691_v34 = vadd.f32 %v1178_v51, %v7304_v38  ;;  %3721 = vmatmul.mubr.f32.gmra.mrb[52].mxu0 %v2929_v50  ;;  %1628 = vmatprep.mubr.f32.mxu1 %v5963_v45  ;;  %v2937_v19 = vmul.f32 %v2681_v20, %v1913_v60  ;;  %v1922_v38 = vmul.f32 0.5, %v7651_v12  ;;  %v5968_v20 = vld [vmem:[%s6412_s23 + $0x170] sm:$0xff]  ;;  %v5969_v50 = vld [vmem:[%s6412_s23 + $0x188] sm:$0xff] }
 0x2b1   : > { %v5584_v35 = vpop.eup %5583  ;;  %v2201_v21 = vmul.f32 0.70710677, %v7686_v62  ;;  %v2938_v27 = vmul.f32 %v2682_v63, %v1914_v16  ;;  %v1937_v11 = vmul.f32 0.5, %v7671_v61 }
 0x2b2   : > { %v5586_v43 = vpop.eup %5585  ;;  %v2689_v49 = vadd.f32 1.0, %v5584_v35  ;;  %v2202_v0 = vmul.f32 0.70710677, %v7691_v34  ;;  %v1247_v13 = vpop.f32.mrb[128].mxu1  ;;  %v1946_v61 = vmul.f32 0.5, %v7691_v34 }
 0x2b3   : > { %v2690_v18 = vadd.f32 1.0, %v5586_v43  ;;  %5595 = verf.f32 %v2201_v21  ;;  %v7700_v15 = vadd.f32 %v1247_v13, %v7682_v56  ;;  %v1249_v5 = vpop.f32.mrb[129].mxu1  ;;  %1629 = vmatmul.mubr.f32.gmra.mrb[234].mxu1 %v5964_v6  ;;  %3726 = vmatprep.mubr.f32.mxu0 %v2938_v27  ;;  %v5970_v43 = vld [vmem:[%s6412_s23 + $0x180] sm:$0xff]  ;;  %v5971_v13 = vld [vmem:[%s6412_s23 + $0x198] sm:$0xff] }
 0x2b4   : > { %5597 = verf.f32 %v2202_v0  ;;  %v7705_v33 = vadd.f32 %v1249_v5, %v7694_v59  ;;  %3727 = vmatmul.mubr.f32.gmra.mrb[54].mxu0 %v2937_v19  ;;  %1634 = vmatprep.mubr.f32.mxu1 %v5965_v29  ;;  %v2945_v39 = vmul.f32 %v2689_v49, %v1921_v46  ;;  %v1945_v49 = vmul.f32 0.5, %v7686_v62  ;;  %v3169_v62 = vld [vmem:[#allocation8 + $0x610] sm:$0xff] }
 0x2b5   : > { %v5588_v12 = vpop.eup %5587  ;;  %v1955_v31 = vmul.f32 0.70710677, %v7700_v15  ;;  %v2946_v7 = vmul.f32 %v2690_v18, %v1922_v38 }
 0x2b6   : > { %v5590_v24 = vpop.eup %5589  ;;  %v2697_v25 = vadd.f32 1.0, %v5588_v12  ;;  %v1956_v55 = vmul.f32 0.70710677, %v7705_v33  ;;  %v1253_v36 = vpop.f32.mrb[130].mxu1  ;;  %v3167_v12 = vld [vmem:[#allocation8 + $0x600] sm:$0xff] }
 0x2b7   : > { %v2698_v8 = vadd.f32 1.0, %v5590_v24  ;;  %5599 = verf.f32 %v1955_v31  ;;  %v7712_v53 = vadd.f32 %v1253_v36, %v7682_v56  ;;  %v1255_v23 = vpop.f32.mrb[131].mxu1  ;;  %1635 = vmatmul.mubr.f32.gmra.mrb[236].mxu1 %v5966_v44  ;;  %3732 = vmatprep.mubr.f32.mxu0 %v2946_v7  ;;  %v1700_v31 = vmul.f32 0.5, %v7705_v33  ;;  %v3172_v36 = vld [vmem:[#allocation8 + $0x628] sm:$0xff] }
 0x2b8   : > { %5601 = verf.f32 %v1956_v55  ;;  %v7717_v14 = vadd.f32 %v1255_v23, %v7694_v59  ;;  %3733 = vmatmul.mubr.f32.gmra.mrb[56].mxu0 %v2945_v39  ;;  %1640 = vmatprep.mubr.f32.mxu1 %v5967_v28  ;;  %v2953_v58 = vmul.f32 %v2697_v25, %v1929_v52  ;;  %v5972_v55 = vld [vmem:[%s6412_s23 + $0x190] sm:$0xff]  ;;  %v3174_v39 = vld [vmem:[#allocation8 + $0x638] sm:$0xff]  ;;  %v5973_v23 = vld [vmem:[%s6412_s23 + $0x1a8] sm:$0xff]  ;;  %v4947_v28 = vpack.c.bf16 %v3169_v62, %v3167_v12 }
 0x2b9   : > { %v5592_v30 = vpop.eup %5591  ;;  %v1963_v41 = vmul.f32 0.70710677, %v7712_v53  ;;  %v2954_v40 = vmul.f32 %v2698_v8, %v1930_v9  ;;  %v1699_v9 = vmul.f32 0.5, %v7700_v15  ;;  %v4949_v15 = vpack.c.bf16 %v3174_v39, %v3172_v36  ;;  %v5977_v12 = vld [vmem:[%s6412_s23 + $0x1c8] sm:$0xff] }
 0x2ba   : > { %v5594_v32 = vpop.eup %5593  ;;  %v2705_v1 = vadd.f32 1.0, %v5592_v30  ;;  %v1964_v26 = vmul.f32 0.70710677, %v7717_v14  ;;  %v1259_v47 = vpop.f32.mrb[132].mxu1 }
 0x2bb   : > { %v2706_v42 = vadd.f32 1.0, %v5594_v32  ;;  %5603 = verf.f32 %v1963_v41  ;;  %v7724_v17 = vadd.f32 %v1259_v47, %v7682_v56  ;;  %v1261_v57 = vpop.f32.mrb[133].mxu1  ;;  %1641 = vmatmul.mubr.f32.gmra.mrb[238].mxu1 %v5968_v20  ;;  %3738 = vmatprep.mubr.f32.mxu0 %v2954_v40  ;;  %v3173_v47 = vld [vmem:[#allocation8 + $0x630] sm:$0xff]  ;;  %v5974_v20 = vld [vmem:[%s6412_s23 + $0x1a0] sm:$0xff] }
 0x2bc   : > { %5605 = verf.f32 %v1964_v26  ;;  %v7729_v3 = vadd.f32 %v1261_v57, %v7694_v59  ;;  %3739 = vmatmul.mubr.f32.gmra.mrb[58].mxu0 %v2953_v58  ;;  %1646 = vmatprep.mubr.f32.mxu1 %v5969_v50  ;;  %v2961_v45 = vmul.f32 %v2705_v1, %v1937_v11  ;;  %v3171_v26 = vld [vmem:[#allocation8 + $0x620] sm:$0xff]  ;;  %v1708_v58 = vmul.f32 0.5, %v7717_v14  ;;  %v3176_v11 = vld [vmem:[#allocation8 + $0x648] sm:$0xff]  ;;  %v3178_v50 = vld [vmem:[#allocation8 + $0x658] sm:$0xff] }
 0x2bd   : > { %v5596_v54 = vpop.eup %5595  ;;  %v1971_v37 = vmul.f32 0.70710677, %v7724_v17  ;;  %v2962_v16 = vmul.f32 %v2706_v42, %v1938_v10 }
 0x2be   : > { %v5598_v63 = vpop.eup %5597  ;;  %v2713_v51 = vadd.f32 1.0, %v5596_v54  ;;  %v1972_v2 = vmul.f32 0.70710677, %v7729_v3  ;;  %v1265_v60 = vpop.f32.mrb[134].mxu1  ;;  %v1707_v54 = vmul.f32 0.5, %v7712_v53 }
 0x2bf   : > { %v2714_v35 = vadd.f32 1.0, %v5598_v63  ;;  %5607 = verf.f32 %v1971_v37  ;;  %v7736_v21 = vadd.f32 %v1265_v60, %v7682_v56  ;;  %v1267_v27 = vpop.f32.mrb[135].mxu1  ;;  %1647 = vmatmul.mubr.f32.gmra.mrb[240].mxu1 %v5970_v43  ;;  %3744 = vmatprep.mubr.f32.mxu0 %v2962_v16  ;;  %v5975_v16 = vld [vmem:[%s6412_s23 + $0x1b8] sm:$0xff]  ;;  %v3175_v43 = vld [vmem:[#allocation8 + $0x640] sm:$0xff] }
 0x2c0   : > { %5609 = verf.f32 %v1972_v2  ;;  %v7741_v0 = vadd.f32 %v1267_v27, %v7694_v59  ;;  %3745 = vmatmul.mubr.f32.gmra.mrb[60].mxu0 %v2961_v45  ;;  %1652 = vmatprep.mubr.f32.mxu1 %v5971_v13  ;;  %v2969_v29 = vmul.f32 %v2713_v51, %v1945_v49  ;;  %v4951_v2 = vpack.c.bf16 %v3173_v47, %v3171_v26  ;;  %v3177_v49 = vld [vmem:[#allocation8 + $0x650] sm:$0xff] }
 0x2c1   : > { %v5600_v34 = vpop.eup %5599  ;;  %v1979_v19 = vmul.f32 0.70710677, %v7736_v21  ;;  %v2970_v38 = vmul.f32 %v2714_v35, %v1946_v61  ;;  %v4953_v27 = vpack.c.bf16 %v3178_v50, %v3176_v11  ;;  %v1716_v13 = vmul.f32 0.5, %v7729_v3  ;;  %v5979_v26 = vld [vmem:[%s6412_s23 + $0x1d8] sm:$0xff] }
 0x2c2   : > { %v5602_v18 = vpop.eup %5601  ;;  %v2467_v5 = vadd.f32 1.0, %v5600_v34  ;;  %v1980_v6 = vmul.f32 0.70710677, %v7741_v0  ;;  %v1271_v46 = vpop.f32.mrb[136].mxu1 }
 0x2c3   : > { %v2468_v7 = vadd.f32 1.0, %v5602_v18  ;;  %5611 = verf.f32 %v1979_v19  ;;  %v7748_v24 = vadd.f32 %v1271_v46, %v7682_v56  ;;  %v1273_v25 = vpop.f32.mrb[137].mxu1  ;;  %1653 = vmatmul.mubr.f32.gmra.mrb[242].mxu1 %v5972_v55  ;;  %3750 = vmatprep.mubr.f32.mxu0 %v2970_v38  ;;  %v5976_v18 = vld [vmem:[%s6412_s23 + $0x1b0] sm:$0xff]  ;;  %v1715_v46 = vmul.f32 0.5, %v7724_v17 }
 0x2c4   : > { %5613 = verf.f32 %v1980_v6  ;;  %v7753_v8 = vadd.f32 %v1273_v25, %v7694_v59  ;;  %3751 = vmatmul.mubr.f32.gmra.mrb[62].mxu0 %v2969_v29  ;;  %1658 = vmatprep.mubr.f32.mxu1 %v5973_v23  ;;  %v2723_v41 = vmul.f32 %v2467_v5, %v1699_v9  ;;  %v3180_v5 = vld [vmem:[#allocation8 + $0x668] sm:$0xff]  ;;  %v3182_v6 = vld [vmem:[#allocation8 + $0x678] sm:$0xff]  ;;  %v3179_v23 = vld [vmem:[#allocation8 + $0x660] sm:$0xff] }
 0x2c5   : > { %v5604_v33 = vpop.eup %5603  ;;  %v1987_v44 = vmul.f32 0.70710677, %v7748_v24  ;;  %v2724_v52 = vmul.f32 %v2468_v7, %v1700_v31  ;;  %v4955_v7 = vpack.c.bf16 %v3177_v49, %v3175_v43  ;;  %v4957_v9 = vpack.c.bf16 %v3182_v6, %v3180_v5  ;;  %v5981_v43 = vld [vmem:[%s6412_s23 + $0x1e8] sm:$0xff] }
 0x2c6   : > { %v5606_v30 = vpop.eup %5605  ;;  %v2475_v40 = vadd.f32 1.0, %v5604_v33  ;;  %v1988_v32 = vmul.f32 0.70710677, %v7753_v8  ;;  %v1277_v1 = vpop.f32.mrb[138].mxu1  ;;  %v3181_v33 = vld [vmem:[#allocation8 + $0x670] sm:$0xff] }
 0x2c7   : > { %v2476_v10 = vadd.f32 1.0, %v5606_v30  ;;  %5615 = verf.f32 %v1987_v44  ;;  %v7760_v42 = vadd.f32 %v1277_v1, %v7682_v56  ;;  %v1279_v57 = vpop.f32.mrb[139].mxu1  ;;  %1659 = vmatmul.mubr.f32.gmra.mrb[244].mxu1 %v5974_v20  ;;  %3821 = vmatprep.mubr.f32.mxu0 %v2724_v52  ;;  %v1724_v44 = vmul.f32 0.5, %v7741_v0 }
 0x2c8   : > { %5617 = verf.f32 %v1988_v32  ;;  %v7765_v37 = vadd.f32 %v1279_v57, %v7694_v59  ;;  %3822 = vmatmul.mubr.f32.vlgmr.msra.gmra.mrb[0].mxu0 %v2723_v41  ;;  %1664 = vmatprep.mubr.f32.mxu1 %v5975_v16  ;;  %v2731_v53 = vmul.f32 %v2475_v40, %v1707_v54  ;;  %v5978_v41 = vld [vmem:[%s6412_s23 + $0x1c0] sm:$0xff]  ;;  %v3184_v40 = vld [vmem:[#allocation8 + $0x688] sm:$0xff]  ;;  %v1723_v1 = vmul.f32 0.5, %v7736_v21  ;;  %v3183_v16 = vld [vmem:[#allocation8 + $0x680] sm:$0xff] }
 0x2c9   : > { %v5608_v14 = vpop.eup %5607  ;;  %v1995_v63 = vmul.f32 0.70710677, %v7760_v42  ;;  %4948 = vmatpush1.bf16.msra.mxu0 %v4947_v28  ;;  %v2732_v51 = vmul.f32 %v2476_v10, %v1708_v58  ;;  %v3186_v32 = vld [vmem:[#allocation8 + $0x698] sm:$0xff]  ;;  %v4959_v10 = vpack.c.bf16 %v3181_v33, %v3179_v23  ;;  %v5983_v23 = vld [vmem:[%s6412_s23 + $0x1f8] sm:$0xff] }
 0x2ca   : > { %v5610_v60 = vpop.eup %5609  ;;  %v2483_v45 = vadd.f32 1.0, %v5608_v14  ;;  %v1996_v61 = vmul.f32 0.70710677, %v7765_v37  ;;  %v1283_v35 = vpop.f32.mrb[140].mxu1  ;;  %4950 = vmatprep.subr.bf16.mxu0 %v4949_v15  ;;  %v4961_v54 = vpack.c.bf16 %v3186_v32, %v3184_v40  ;;  %v3185_v14 = vld [vmem:[#allocation8 + $0x690] sm:$0xff] }
 0x2cb   : > { %v2484_v34 = vadd.f32 1.0, %v5610_v60  ;;  %5619 = verf.f32 %v1995_v63  ;;  %v7772_v19 = vadd.f32 %v1283_v35, %v7682_v56  ;;  %v1285_v38 = vpop.f32.mrb[141].mxu1  ;;  %1665 = vmatmul.mubr.f32.gmra.mrb[246].mxu1 %v5976_v18  ;;  %3827 = vmatprep.mubr.f32.mxu0 %v2732_v51  ;;  %v1732_v63 = vmul.f32 0.5, %v7753_v8  ;;  %v3190_v35 = vld [vmem:[#allocation8 + $0x6b8] sm:$0xff] }
 0x2cc   : > { %5621 = verf.f32 %v1996_v61  ;;  %v7777_v29 = vadd.f32 %v1285_v38, %v7694_v59  ;;  %3828 = vmatmul.mubr.f32.gmra.mrb[2].mxu0 %v2731_v53  ;;  %1670 = vmatprep.mubr.f32.mxu1 %v5977_v12  ;;  %v2739_v17 = vmul.f32 %v2483_v45, %v1715_v46  ;;  %v5980_v45 = vld [vmem:[%s6412_s23 + $0x1d0] sm:$0xff]  ;;  %v1731_v53 = vmul.f32 0.5, %v7748_v24  ;;  %v3187_v12 = vld [vmem:[#allocation8 + $0x6a0] sm:$0xff] }
 0x2cd   : > { %v5612_v3 = vpop.eup %5611  ;;  %v2003_v62 = vmul.f32 0.70710677, %v7772_v19  ;;  %v2740_v31 = vmul.f32 %v2484_v34, %v1716_v13  ;;  %4952 = vmatpush1.bf16.msra.mxu0 %v4951_v2  ;;  %v3188_v61 = vld [vmem:[#allocation8 + $0x6a8] sm:$0xff]  ;;  %v4963_v34 = vpack.c.bf16 %v3185_v14, %v3183_v16 }
 0x2ce   : > { %v5614_v25 = vpop.eup %5613  ;;  %v2491_v55 = vadd.f32 1.0, %v5612_v3  ;;  %v2004_v36 = vmul.f32 0.70710677, %v7777_v29  ;;  %v1289_v39 = vpop.f32.mrb[142].mxu1  ;;  %4954 = vmatprep.subr.bf16.mxu0 %v4953_v27  ;;  %v4965_v46 = vpack.c.bf16 %v3190_v35, %v3188_v61  ;;  %v3189_v3 = vld [vmem:[#allocation8 + $0x6b0] sm:$0xff] }
 0x2cf   : > { %v2492_v52 = vadd.f32 1.0, %v5614_v25  ;;  %5623 = verf.f32 %v2003_v62  ;;  %v7784_v28 = vadd.f32 %v1289_v39, %v7682_v56  ;;  %v1291_v30 = vpop.f32.mrb[143].mxu1  ;;  %1671 = vmatmul.mubr.f32.gmra.mrb[248].mxu1 %v5978_v41  ;;  %3833 = vmatprep.mubr.f32.mxu0 %v2740_v31  ;;  %v1740_v62 = vmul.f32 0.5, %v7765_v37  ;;  %v3194_v39 = vld [vmem:[#allocation8 + $0x6d8] sm:$0xff] }
 0x2d0   : > { %5625 = verf.f32 %v2004_v36  ;;  %v7789_v15 = vadd.f32 %v1291_v30, %v7694_v59  ;;  %3834 = vmatmul.mubr.f32.gmra.mrb[4].mxu0 %v2739_v17  ;;  %1676 = vmatprep.mubr.f32.mxu1 %v5979_v26  ;;  %v2747_v21 = vmul.f32 %v2491_v55, %v1723_v1  ;;  %v5982_v55 = vld [vmem:[%s6412_s23 + $0x1e0] sm:$0xff]  ;;  %v3192_v36 = vld [vmem:[#allocation8 + $0x6c8] sm:$0xff]  ;;  %v1739_v17 = vmul.f32 0.5, %v7760_v42  ;;  %v3191_v26 = vld [vmem:[#allocation8 + $0x6c0] sm:$0xff] }
 0x2d1   : > { %v5616_v0 = vpop.eup %5615  ;;  %v2011_v47 = vmul.f32 0.70710677, %v7784_v28  ;;  %v2748_v58 = vmul.f32 %v2492_v52, %v1724_v44  ;;  %4956 = vmatpush1.bf16.msra.mxu0 %v4955_v7  ;;  %v4967_v52 = vpack.c.bf16 %v3189_v3, %v3187_v12  ;;  %v4969_v1 = vpack.c.bf16 %v3194_v39, %v3192_v36  ;;  %v3201_v39 = vld [vmem:[#allocation8 + $0x710] sm:$0xff] }
 0x2d2   : > { %v5618_v57 = vpop.eup %5617  ;;  %v2499_v20 = vadd.f32 1.0, %v5616_v0  ;;  %v2012_v11 = vmul.f32 0.70710677, %v7789_v15  ;;  %v1295_v50 = vpop.f32.mrb[144].mxu1  ;;  %4958 = vmatprep.subr.bf16.mxu0 %v4957_v9  ;;  %v3193_v0 = vld [vmem:[#allocation8 + $0x6d0] sm:$0xff] }
 0x2d3   : > { %v2500_v51 = vadd.f32 1.0, %v5618_v57  ;;  %5627 = verf.f32 %v2011_v47  ;;  %v7796_v2 = vadd.f32 %v1295_v50, %v7682_v56  ;;  %v1297_v60 = vpop.f32.mrb[145].mxu1  ;;  %1677 = vmatmul.mubr.f32.gmra.mrb[250].mxu1 %v5980_v45  ;;  %3839 = vmatprep.mubr.f32.mxu0 %v2748_v58  ;;  %v1748_v47 = vmul.f32 0.5, %v7777_v29  ;;  %v3198_v50 = vld [vmem:[#allocation8 + $0x6f8] sm:$0xff] }
 0x2d4   : > { %5629 = verf.f32 %v2012_v11  ;;  %v7801_v27 = vadd.f32 %v1297_v60, %v7694_v59  ;;  %3840 = vmatmul.mubr.f32.gmra.mrb[6].mxu0 %v2747_v21  ;;  %1682 = vmatprep.mubr.f32.mxu1 %v5981_v43  ;;  %v2755_v24 = vmul.f32 %v2499_v20, %v1731_v53  ;;  %v5984_v20 = vld [vmem:[%s6412_s23 + $0x1f0] sm:$0xff]  ;;  %v1747_v21 = vmul.f32 0.5, %v7772_v19  ;;  %v3195_v19 = vld [vmem:[#allocation8 + $0x6e0] sm:$0xff]  ;;  %v3197_v43 = vld [vmem:[#allocation8 + $0x6f0] sm:$0xff] }
 0x2d5   : > { %v5620_v8 = vpop.eup %5619  ;;  %v2019_v49 = vmul.f32 0.70710677, %v7796_v2  ;;  %v2756_v13 = vmul.f32 %v2500_v51, %v1732_v63  ;;  %4960 = vmatpush1.bf16.msra.mxu0 %v4959_v10  ;;  %v3196_v11 = vld [vmem:[#allocation8 + $0x6e8] sm:$0xff]  ;;  %v4971_v63 = vpack.c.bf16 %v3193_v0, %v3191_v26  ;;  %v4975_v12 = vpack.c.bf16 %v3197_v43, %v3195_v19 }
 0x2d6   : > { %v5622_v38 = vpop.eup %5621  ;;  %v2507_v18 = vadd.f32 1.0, %v5620_v8  ;;  %v2020_v5 = vmul.f32 0.70710677, %v7801_v27  ;;  %v1301_v6 = vpop.f32.mrb[146].mxu1  ;;  %4962 = vmatprep.subr.bf16.mxu0 %v4961_v54  ;;  %v4973_v53 = vpack.c.bf16 %v3198_v50, %v3196_v11  ;;  %v1756_v8 = vmul.f32 0.5, %v7789_v15 }
 0x2d7   : > { %v2508_v31 = vadd.f32 1.0, %v5622_v38  ;;  %5631 = verf.f32 %v2019_v49  ;;  %v7808_v7 = vadd.f32 %v1301_v6, %v7682_v56  ;;  %v1303_v25 = vpop.f32.mrb[147].mxu1  ;;  %1683 = vmatmul.mubr.f32.gmra.mrb[252].mxu1 %v5982_v55  ;;  %3845 = vmatprep.mubr.f32.mxu0 %v2756_v13  ;;  %v3200_v38 = vld [vmem:[#allocation8 + $0x708] sm:$0xff] }
 0x2d8   : > { %5633 = verf.f32 %v2020_v5  ;;  %v7813_v9 = vadd.f32 %v1303_v25, %v7694_v59  ;;  %3846 = vmatmul.mubr.f32.gmra.mrb[8].mxu0 %v2755_v24  ;;  %1688 = vmatprep.mubr.f32.mxu1 %v5983_v23  ;;  %v2763_v42 = vmul.f32 %v2507_v18, %v1739_v17  ;;  %v3202_v18 = vld [vmem:[#allocation8 + $0x718] sm:$0xff]  ;;  %v1755_v5 = vmul.f32 0.5, %v7784_v28  ;;  %v3199_v28 = vld [vmem:[#allocation8 + $0x700] sm:$0xff] }
 0x2d9   : > { %v5624_v37 = vpop.eup %5623  ;;  %v2027_v33 = vmul.f32 0.70710677, %v7808_v7  ;;  %v2764_v44 = vmul.f32 %v2508_v31, %v1740_v62  ;;  %4964 = vmatpush1.bf16.msra.mxu0 %v4963_v34  ;;  %v4977_v36 = vpack.c.bf16 %v3202_v18, %v3200_v38  ;;  %v1764_v17 = vmul.f32 0.5, %v7801_v27 }
 0x2da   : > { %v5626_v30 = vpop.eup %5625  ;;  %v2515_v41 = vadd.f32 1.0, %v5624_v37  ;;  %v2028_v40 = vmul.f32 0.70710677, %v7813_v9  ;;  %v1307_v32 = vpop.f32.mrb[148].mxu1  ;;  %4966 = vmatprep.subr.bf16.mxu0 %v4965_v46  ;;  %v1772_v11 = vmul.f32 0.5, %v7813_v9 }
 0x2db   : > { %v2516_v58 = vadd.f32 1.0, %v5626_v30  ;;  %5635 = verf.f32 %v2027_v33  ;;  %v7820_v10 = vadd.f32 %v1307_v32, %v7682_v56  ;;  %v1309_v57 = vpop.f32.mrb[149].mxu1  ;;  %1689 = vmatmul.mubr.f32.gmra.mrb[254].mxu1 %v5984_v20  ;;  %3851 = vmatprep.mubr.f32.mxu0 %v2764_v44  ;;  %v3204_v44 = vld [vmem:[#allocation8 + $0x728] sm:$0xff]  ;;  %v1763_v30 = vmul.f32 0.5, %v7796_v2  ;;  %v3203_v2 = vld [vmem:[#allocation8 + $0x720] sm:$0xff]  ;;  %v3205_v20 = vld [vmem:[#allocation8 + $0x730] sm:$0xff] }
 0x2dc   : > { %5637 = verf.f32 %v2028_v40  ;;  %v7825_v54 = vadd.f32 %v1309_v57, %v7694_v59  ;;  %3852 = vmatmul.mubr.f32.gmra.mrb[10].mxu0 %v2763_v42  ;;  %v2771_v35 = vmul.f32 %v2515_v41, %v1747_v21  ;;  %v4979_v42 = vpack.c.bf16 %v3201_v39, %v3199_v28 }
 0x2dd   : > { %v5628_v16 = vpop.eup %5627  ;;  %v2035_v29 = vmul.f32 0.70710677, %v7820_v10  ;;  %v2772_v14 = vmul.f32 %v2516_v58, %v1748_v47  ;;  %4968 = vmatpush1.bf16.msra.mxu0 %v4967_v52  ;;  %v3206_v52 = vld [vmem:[#allocation8 + $0x738] sm:$0xff] }
 0x2de   : > { %v5630_v51 = vpop.eup %5629  ;;  %v2523_v60 = vadd.f32 1.0, %v5628_v16  ;;  %v2036_v45 = vmul.f32 0.70710677, %v7825_v54  ;;  %v1313_v61 = vpop.f32.mrb[150].mxu1  ;;  %4970 = vmatprep.subr.bf16.mxu0 %v4969_v1  ;;  %v4981_v57 = vpack.c.bf16 %v3206_v52, %v3204_v44  ;;  %v1780_v38 = vmul.f32 0.5, %v7825_v54 }
 0x2df   : > { %v2524_v49 = vadd.f32 1.0, %v5630_v51  ;;  %5639 = verf.f32 %v2035_v29  ;;  %v7831_v13 = vadd.f32 %v1313_v61, %v7682_v56  ;;  %v1315_v34 = vpop.f32.mrb[151].mxu1  ;;  %3857 = vmatprep.mubr.f32.mxu0 %v2772_v14  ;;  %v3208_v29 = vld [vmem:[#allocation8 + $0x748] sm:$0xff]  ;;  %v3210_v14 = vld [vmem:[#allocation8 + $0x758] sm:$0xff]  ;;  %v4983_v61 = vpack.c.bf16 %v3205_v20, %v3203_v2 }
 0x2e0   : > { %5641 = verf.f32 %v2036_v45  ;;  %v7835_v6 = vadd.f32 %v1315_v34, %v7694_v59  ;;  %3858 = vmatmul.mubr.f32.gmra.mrb[12].mxu0 %v2771_v35  ;;  %v2779_v55 = vmul.f32 %v2523_v60, %v1755_v5  ;;  %v3209_v34 = vld [vmem:[#allocation8 + $0x750] sm:$0xff] }
 0x2e1   : > { %v5632_v24 = vpop.eup %5631  ;;  %v2043_v46 = vmul.f32 0.70710677, %v7831_v13  ;;  %v2780_v15 = vmul.f32 %v2524_v49, %v1756_v8  ;;  %4972 = vmatpush1.bf16.msra.mxu0 %v4971_v63  ;;  %v1771_v63 = vmul.f32 0.5, %v7808_v7  ;;  %v4985_v49 = vpack.c.bf16 %v3210_v14, %v3208_v29  ;;  %v3207_v7 = vld [vmem:[#allocation8 + $0x740] sm:$0xff] }
 0x2e2   : > { %v5634_v3 = vpop.eup %5633  ;;  %v2531_v62 = vadd.f32 1.0, %v5632_v24  ;;  %v2044_v31 = vmul.f32 0.70710677, %v7835_v6  ;;  %v1319_v25 = vpop.f32.mrb[152].mxu1  ;;  %4974 = vmatprep.subr.bf16.mxu0 %v4973_v53  ;;  %v1788_v44 = vmul.f32 0.5, %v7835_v6 }
 0x2e3   : > { %v2532_v23 = vadd.f32 1.0, %v5634_v3  ;;  %5643 = verf.f32 %v2043_v46  ;;  %v7841_v37 = vadd.f32 %v1319_v25, %v7682_v56  ;;  %v1321_v33 = vpop.f32.mrb[153].mxu1  ;;  %3863 = vmatprep.mubr.f32.mxu0 %v2780_v15  ;;  %v3212_v46 = vld [vmem:[#allocation8 + $0x768] sm:$0xff]  ;;  %v3214_v15 = vld [vmem:[#allocation8 + $0x778] sm:$0xff]  ;;  %v4987_v25 = vpack.c.bf16 %v3209_v34, %v3207_v7 }
 0x2e4   : > { %5645 = verf.f32 %v2044_v31  ;;  %v7845_v41 = vadd.f32 %v1321_v33, %v7694_v59  ;;  %3864 = vmatmul.mubr.f32.gmra.mrb[14].mxu0 %v2779_v55  ;;  %v2787_v58 = vmul.f32 %v2531_v62, %v1763_v30  ;;  %v3213_v33 = vld [vmem:[#allocation8 + $0x770] sm:$0xff] }
 0x2e5   : > { %v5636_v40 = vpop.eup %5635  ;;  %v2051_v32 = vmul.f32 0.70710677, %v7841_v37  ;;  %v2788_v27 = vmul.f32 %v2532_v23, %v1764_v17  ;;  %4976 = vmatpush1.bf16.msra.mxu0 %v4975_v12  ;;  %v1779_v12 = vmul.f32 0.5, %v7820_v10  ;;  %v4989_v23 = vpack.c.bf16 %v3214_v15, %v3212_v46  ;;  %v3211_v10 = vld [vmem:[#allocation8 + $0x760] sm:$0xff] }
 0x2e6   : > { %v5638_v1 = vpop.eup %5637  ;;  %v2539_v26 = vadd.f32 1.0, %v5636_v40  ;;  %v2052_v0 = vmul.f32 0.70710677, %v7845_v41  ;;  %v1325_v47 = vpop.f32.mrb[154].mxu1  ;;  %4978 = vmatprep.subr.bf16.mxu0 %v4977_v36  ;;  %v1796_v29 = vmul.f32 0.5, %v7845_v41 }
 0x2e7   : > { %v2540_v50 = vadd.f32 1.0, %v5638_v1  ;;  %5647 = verf.f32 %v2051_v32  ;;  %v7851_v21 = vadd.f32 %v1325_v47, %v7682_v56  ;;  %v1327_v16 = vpop.f32.mrb[155].mxu1  ;;  %3869 = vmatprep.mubr.f32.mxu0 %v2788_v27  ;;  %v3216_v32 = vld [vmem:[#allocation8 + $0x788] sm:$0xff]  ;;  %v3218_v27 = vld [vmem:[#allocation8 + $0x798] sm:$0xff]  ;;  %v4991_v47 = vpack.c.bf16 %v3213_v33, %v3211_v10 }
 0x2e8   : > { %5649 = verf.f32 %v2052_v0  ;;  %v7855_v51 = vadd.f32 %v1327_v16, %v7694_v59  ;;  %3870 = vmatmul.mubr.f32.gmra.mrb[16].mxu0 %v2787_v58  ;;  %v2795_v8 = vmul.f32 %v2539_v26, %v1771_v63  ;;  %v3217_v16 = vld [vmem:[#allocation8 + $0x790] sm:$0xff] }
 0x2e9   : > { %v5640_v60 = vpop.eup %5639  ;;  %v2059_v45 = vmul.f32 0.70710677, %v7851_v21  ;;  %v2796_v9 = vmul.f32 %v2540_v50, %v1772_v11  ;;  %4980 = vmatpush1.bf16.msra.mxu0 %v4979_v42  ;;  %v1787_v42 = vmul.f32 0.5, %v7831_v13  ;;  %v4993_v50 = vpack.c.bf16 %v3218_v27, %v3216_v32  ;;  %v3215_v13 = vld [vmem:[#allocation8 + $0x780] sm:$0xff] }
 0x2ea   : > { %v5642_v35 = vpop.eup %5641  ;;  %v2547_v53 = vadd.f32 1.0, %v5640_v60  ;;  %v2060_v19 = vmul.f32 0.70710677, %v7855_v51  ;;  %v1331_v43 = vpop.f32.mrb[156].mxu1  ;;  %4982 = vmatprep.subr.bf16.mxu0 %v4981_v57  ;;  %v1804_v46 = vmul.f32 0.5, %v7855_v51 }
 0x2eb   : > { %v2548_v18 = vadd.f32 1.0, %v5642_v35  ;;  %5651 = verf.f32 %v2059_v45  ;;  %v7861_v5 = vadd.f32 %v1331_v43, %v7682_v56  ;;  %v1333_v24 = vpop.f32.mrb[157].mxu1  ;;  %3875 = vmatprep.mubr.f32.mxu0 %v2796_v9  ;;  %v3220_v45 = vld [vmem:[#allocation8 + $0x7a8] sm:$0xff]  ;;  %v3222_v9 = vld [vmem:[#allocation8 + $0x7b8] sm:$0xff]  ;;  %v4995_v43 = vpack.c.bf16 %v3217_v16, %v3215_v13 }
 0x2ec   : > { %5653 = verf.f32 %v2060_v19  ;;  %v7865_v3 = vadd.f32 %v1333_v24, %v7694_v59  ;;  %3876 = vmatmul.mubr.f32.gmra.mrb[18].mxu0 %v2795_v8  ;;  %v2803_v17 = vmul.f32 %v2547_v53, %v1779_v12  ;;  %v3221_v24 = vld [vmem:[#allocation8 + $0x7b0] sm:$0xff] }
 0x2ed   : > { %v5644_v62 = vpop.eup %5643  ;;  %v2067_v31 = vmul.f32 0.70710677, %v7861_v5  ;;  %v2804_v54 = vmul.f32 %v2548_v18, %v1780_v38  ;;  %4984 = vmatpush1.bf16.msra.mxu0 %v4983_v61  ;;  %v1795_v61 = vmul.f32 0.5, %v7841_v37  ;;  %v4997_v18 = vpack.c.bf16 %v3222_v9, %v3220_v45  ;;  %v3219_v37 = vld [vmem:[#allocation8 + $0x7a0] sm:$0xff] }
 0x2ee   : > { %v5646_v55 = vpop.eup %5645  ;;  %v2555_v36 = vadd.f32 1.0, %v5644_v62  ;;  %v2068_v28 = vmul.f32 0.70710677, %v7865_v3  ;;  %v1337_v39 = vpop.f32.mrb[158].mxu1  ;;  %4986 = vmatprep.subr.bf16.mxu0 %v4985_v49  ;;  %v1812_v32 = vmul.f32 0.5, %v7865_v3 }
 0x2ef   : > { %v2556_v52 = vadd.f32 1.0, %v5646_v55  ;;  %5655 = verf.f32 %v2067_v31  ;;  %v7871_v30 = vadd.f32 %v1337_v39, %v7682_v56  ;;  %v1339_v40 = vpop.f32.mrb[159].mxu1  ;;  %3881 = vmatprep.mubr.f32.mxu0 %v2804_v54  ;;  %v3224_v31 = vld [vmem:[#allocation8 + $0x7c8] sm:$0xff]  ;;  %v3226_v54 = vld [vmem:[#allocation8 + $0x7d8] sm:$0xff]  ;;  %v4999_v39 = vpack.c.bf16 %v3221_v24, %v3219_v37 }
 0x2f0   : > { %5657 = verf.f32 %v2068_v28  ;;  %v7875_v1 = vadd.f32 %v1339_v40, %v7694_v59  ;;  %3882 = vmatmul.mubr.f32.gmra.mrb[20].mxu0 %v2803_v17  ;;  %v2811_v11 = vmul.f32 %v2555_v36, %v1787_v42  ;;  %v3225_v40 = vld [vmem:[#allocation8 + $0x7d0] sm:$0xff] }
 0x2f1   : > { %v5648_v26 = vpop.eup %5647  ;;  %v2075_v0 = vmul.f32 0.70710677, %v7871_v30  ;;  %v2812_v6 = vmul.f32 %v2556_v52, %v1788_v44  ;;  %4988 = vmatpush1.bf16.msra.mxu0 %v4987_v25  ;;  %v1803_v25 = vmul.f32 0.5, %v7851_v21  ;;  %v5001_v52 = vpack.c.bf16 %v3226_v54, %v3224_v31  ;;  %v3223_v21 = vld [vmem:[#allocation8 + $0x7c0] sm:$0xff] }
 0x2f2   : > { %v5650_v58 = vpop.eup %5649  ;;  %v2563_v57 = vadd.f32 1.0, %v5648_v26  ;;  %v2076_v2 = vmul.f32 0.70710677, %v7875_v1  ;;  %v1343_v20 = vpop.f32.mrb[160].mxu1  ;;  %4990 = vmatprep.subr.bf16.mxu0 %v4989_v23  ;;  %v1820_v45 = vmul.f32 0.5, %v7875_v1 }
 0x2f3   : > { %v2564_v14 = vadd.f32 1.0, %v5650_v58  ;;  %5659 = verf.f32 %v2075_v0  ;;  %v7881_v63 = vadd.f32 %v1343_v20, %v7682_v56  ;;  %v1345_v60 = vpop.f32.mrb[161].mxu1  ;;  %3887 = vmatprep.mubr.f32.mxu0 %v2812_v6  ;;  %v3228_v0 = vld [vmem:[#allocation8 + $0x7e8] sm:$0xff]  ;;  %v3230_v6 = vld [vmem:[#allocation8 + $0x7f8] sm:$0xff]  ;;  %v5003_v20 = vpack.c.bf16 %v3225_v40, %v3223_v21 }
 0x2f4   : > { %5661 = verf.f32 %v2076_v2  ;;  %v7885_v35 = vadd.f32 %v1345_v60, %v7694_v59  ;;  %3888 = vmatmul.mubr.f32.gmra.mrb[22].mxu0 %v2811_v11  ;;  %v2819_v38 = vmul.f32 %v2563_v57, %v1795_v61  ;;  %v3229_v60 = vld [vmem:[#allocation8 + $0x7f0] sm:$0xff] }
 0x2f5   : > { %v5652_v53 = vpop.eup %5651  ;;  %v2083_v19 = vmul.f32 0.70710677, %v7881_v63  ;;  %v2820_v41 = vmul.f32 %v2564_v14, %v1796_v29  ;;  %4992 = vmatpush1.bf16.msra.mxu0 %v4991_v47  ;;  %v1811_v47 = vmul.f32 0.5, %v7861_v5  ;;  %v5005_v14 = vpack.c.bf16 %v3230_v6, %v3228_v0  ;;  %v3227_v5 = vld [vmem:[#allocation8 + $0x7e0] sm:$0xff] }
 0x2f6   : > { %v5654_v8 = vpop.eup %5653  ;;  %v2571_v49 = vadd.f32 1.0, %v5652_v53  ;;  %v2084_v7 = vmul.f32 0.70710677, %v7885_v35  ;;  %v1349_v34 = vpop.f32.mrb[162].mxu1  ;;  %4994 = vmatprep.subr.bf16.mxu0 %v4993_v50  ;;  %v5007_v1 = vpack.c.bf16 %v3229_v60, %v3227_v5 }
 0x2f7   : > { %v2572_v15 = vadd.f32 1.0, %v5654_v8  ;;  %5663 = verf.f32 %v2083_v19  ;;  %v7891_v12 = vadd.f32 %v1349_v34, %v7682_v56  ;;  %v1351_v62 = vpop.f32.mrb[163].mxu1  ;;  %3893 = vmatprep.mubr.f32.mxu0 %v2820_v41  ;;  %v1819_v19 = vmul.f32 0.5, %v7871_v30 }
 0x2f8   : > { %5665 = verf.f32 %v2084_v7  ;;  %v7895_v55 = vadd.f32 %v1351_v62, %v7694_v59  ;;  %3894 = vmatmul.mubr.f32.gmra.mrb[24].mxu0 %v2819_v38  ;;  %v2827_v44 = vmul.f32 %v2571_v49, %v1803_v25  ;;  %v1828_v30 = vmul.f32 0.5, %v7885_v35 }
 0x2f9   : > { %v5656_v36 = vpop.eup %5655  ;;  %v2091_v28 = vmul.f32 0.70710677, %v7891_v12  ;;  %v2828_v51 = vmul.f32 %v2572_v15, %v1804_v46  ;;  %4996 = vmatpush1.bf16.msra.mxu0 %v4995_v43  ;;  %v1827_v62 = vmul.f32 0.5, %v7881_v63 }
 0x2fa   : > { %v5658_v17 = vpop.eup %5657  ;;  %v2579_v23 = vadd.f32 1.0, %v5656_v36  ;;  %v2092_v10 = vmul.f32 0.70710677, %v7895_v55  ;;  %v1355_v33 = vpop.f32.mrb[164].mxu1  ;;  %4998 = vmatprep.subr.bf16.mxu0 %v4997_v18 }
 0x2fb   : > { %v2580_v27 = vadd.f32 1.0, %v5658_v17  ;;  %5667 = verf.f32 %v2091_v28  ;;  %v7901_v42 = vadd.f32 %v1355_v33, %v7682_v56  ;;  %v1357_v26 = vpop.f32.mrb[165].mxu1  ;;  %3899 = vmatprep.mubr.f32.mxu0 %v2828_v51 }
 0x2fc   : > { %5669 = verf.f32 %v2092_v10  ;;  %v7905_v58 = vadd.f32 %v1357_v26, %v7694_v59  ;;  %3900 = vmatmul.mubr.f32.gmra.mrb[26].mxu0 %v2827_v44  ;;  %v2835_v29 = vmul.f32 %v2579_v23, %v1811_v47  ;;  %v1836_v23 = vmul.f32 0.5, %v7895_v55 }
 0x2fd   : > { %v5660_v57 = vpop.eup %5659  ;;  %v2099_v2 = vmul.f32 0.70710677, %v7901_v42  ;;  %v2836_v3 = vmul.f32 %v2580_v27, %v1812_v32  ;;  %5000 = vmatpush1.bf16.msra.mxu0 %v4999_v39  ;;  %v1835_v44 = vmul.f32 0.5, %v7891_v12 }
 0x2fe   : > { %v5662_v11 = vpop.eup %5661  ;;  %v2587_v50 = vadd.f32 1.0, %v5660_v57  ;;  %v2100_v13 = vmul.f32 0.70710677, %v7905_v58  ;;  %v1361_v16 = vpop.f32.mrb[166].mxu1  ;;  %5002 = vmatprep.subr.bf16.mxu0 %v5001_v52  ;;  %v1844_v47 = vmul.f32 0.5, %v7905_v58 }
 0x2ff   : > { %v2588_v9 = vadd.f32 1.0, %v5662_v11  ;;  %5671 = verf.f32 %v2099_v2  ;;  %v7911_v61 = vadd.f32 %v1361_v16, %v7682_v56  ;;  %v1363_v53 = vpop.f32.mrb[167].mxu1  ;;  %3905 = vmatprep.mubr.f32.mxu0 %v2836_v3  ;;  %v1843_v3 = vmul.f32 0.5, %v7901_v42 }
 0x300   : > { %5673 = verf.f32 %v2100_v13  ;;  %v7915_v41 = vadd.f32 %v1363_v53, %v7694_v59  ;;  %3906 = vmatmul.mubr.f32.gmra.mrb[28].mxu0 %v2835_v29  ;;  %v2843_v37 = vmul.f32 %v2587_v50, %v1819_v19 }
 0x301   : > { %v5664_v43 = vpop.eup %5663  ;;  %v2107_v8 = vmul.f32 0.70710677, %v7911_v61  ;;  %v2844_v49 = vmul.f32 %v2588_v9, %v1820_v45  ;;  %5004 = vmatpush1.bf16.msra.mxu0 %v5003_v20  ;;  %v1851_v53 = vmul.f32 0.5, %v7911_v61 }
 0x302   : > { %v5666_v7 = vpop.eup %5665  ;;  %v2595_v34 = vadd.f32 1.0, %v5664_v43  ;;  %v2108_v38 = vmul.f32 0.70710677, %v7915_v41  ;;  %v1367_v18 = vpop.f32.mrb[168].mxu1  ;;  %5006 = vmatprep.subr.bf16.mxu0 %v5005_v14  ;;  %v1852_v60 = vmul.f32 0.5, %v7915_v41 }
 0x303   : > { %v2596_v24 = vadd.f32 1.0, %v5666_v7  ;;  %5675 = verf.f32 %v2107_v8  ;;  %v7921_v46 = vadd.f32 %v1367_v18, %v7682_v56  ;;  %v1369_v15 = vpop.f32.mrb[169].mxu1  ;;  %3911 = vmatprep.mubr.f32.mxu0 %v2844_v49 }
 0x304   : > { %5677 = verf.f32 %v2108_v38  ;;  %v7925_v31 = vadd.f32 %v1369_v15, %v7694_v59  ;;  %3912 = vmatmul.mubr.f32.gmra.mrb[30].mxu0 %v2843_v37  ;;  %v2851_v17 = vmul.f32 %v2595_v34, %v1827_v62 }
 0x305   : > { %v5668_v54 = vpop.eup %5667  ;;  %v2115_v25 = vmul.f32 0.70710677, %v7921_v46  ;;  %v2852_v36 = vmul.f32 %v2596_v24, %v1828_v30  ;;  %5008 = vmatpush1.bf16.msra.mxu0 %v5007_v1  ;;  %v1859_v24 = vmul.f32 0.5, %v7921_v46 }
 0x306   : > { %v5670_v35 = vpop.eup %5669  ;;  %v2603_v28 = vadd.f32 1.0, %v5668_v54  ;;  %v2116_v51 = vmul.f32 0.70710677, %v7925_v31  ;;  %v1373_v39 = vpop.f32.mrb[170].mxu1  ;;  %v1860_v18 = vmul.f32 0.5, %v7925_v31 }
 0x307   : > { %v2604_v10 = vadd.f32 1.0, %v5670_v35  ;;  %5679 = verf.f32 %v2115_v25  ;;  %v7931_v63 = vadd.f32 %v1373_v39, %v7682_v56  ;;  %v1375_v33 = vpop.f32.mrb[171].mxu1  ;;  %3917 = vmatprep.mubr.f32.mxu0 %v2852_v36 }
 0x308   : > { %5681 = verf.f32 %v2116_v51  ;;  %v7935_v52 = vadd.f32 %v1375_v33, %v7694_v59  ;;  %3918 = vmatmul.mubr.f32.gmra.mrb[32].mxu0 %v2851_v17  ;;  %v2859_v6 = vmul.f32 %v2603_v28, %v1835_v44 }
 0x309   : > { %v5672_v21 = vpop.eup %5671  ;;  %v2123_v40 = vmul.f32 0.70710677, %v7931_v63  ;;  %v2860_v32 = vmul.f32 %v2604_v10, %v1836_v23  ;;  %v1867_v10 = vmul.f32 0.5, %v7931_v63 }
 0x30a   : > { %v5674_v27 = vpop.eup %5673  ;;  %v2611_v55 = vadd.f32 1.0, %v5672_v21  ;;  %v2124_v26 = vmul.f32 0.70710677, %v7935_v52  ;;  %v1379_v0 = vpop.f32.mrb[172].mxu1  ;;  %v1868_v39 = vmul.f32 0.5, %v7935_v52 }
 0x30b   : > { %v2612_v57 = vadd.f32 1.0, %v5674_v27  ;;  %5683 = verf.f32 %v2123_v40  ;;  %v7941_v12 = vadd.f32 %v1379_v0, %v7682_v56  ;;  %v1381_v2 = vpop.f32.mrb[173].mxu1  ;;  %3923 = vmatprep.mubr.f32.mxu0 %v2860_v32 }
 0x30c   : > { %5685 = verf.f32 %v2124_v26  ;;  %v7945_v20 = vadd.f32 %v1381_v2, %v7694_v59  ;;  %3924 = vmatmul.mubr.f32.gmra.mrb[34].mxu0 %v2859_v6  ;;  %v2867_v5 = vmul.f32 %v2611_v55, %v1843_v3 }
 0x30d   : > { %v5676_v11 = vpop.eup %5675  ;;  %v2131_v50 = vmul.f32 0.70710677, %v7941_v12  ;;  %v2868_v13 = vmul.f32 %v2612_v57, %v1844_v47  ;;  %v1875_v57 = vmul.f32 0.5, %v7941_v12 }
 0x30e   : > { %v5678_v16 = vpop.eup %5677  ;;  %v2619_v58 = vadd.f32 1.0, %v5676_v11  ;;  %v2132_v29 = vmul.f32 0.70710677, %v7945_v20  ;;  %v1385_v14 = vpop.f32.mrb[174].mxu1  ;;  %v1876_v0 = vmul.f32 0.5, %v7945_v20 }
 0x30f   : > { %v2620_v45 = vadd.f32 1.0, %v5678_v16  ;;  %5687 = verf.f32 %v2131_v50  ;;  %v7951_v42 = vadd.f32 %v1385_v14, %v7682_v56  ;;  %v1387_v9 = vpop.f32.mrb[175].mxu1  ;;  %3929 = vmatprep.mubr.f32.mxu0 %v2868_v13 }
 0x310   : > { %5689 = verf.f32 %v2132_v29  ;;  %v7955_v19 = vadd.f32 %v1387_v9, %v7694_v59  ;;  %3930 = vmatmul.mubr.f32.gmra.mrb[36].mxu0 %v2867_v5  ;;  %v2875_v38 = vmul.f32 %v2619_v58, %v1851_v53 }
 0x311   : > { %v5680_v43 = vpop.eup %5679  ;;  %v2139_v8 = vmul.f32 0.70710677, %v7951_v42  ;;  %v2876_v49 = vmul.f32 %v2620_v45, %v1852_v60  ;;  %v1883_v45 = vmul.f32 0.5, %v7951_v42 }
 0x312   : > { %v5682_v1 = vpop.eup %5681  ;;  %v2627_v41 = vadd.f32 1.0, %v5680_v43  ;;  %v2140_v7 = vmul.f32 0.70710677, %v7955_v19  ;;  %v1391_v34 = vpop.f32.mrb[176].mxu1  ;;  %v1884_v14 = vmul.f32 0.5, %v7955_v19 }
 0x313   : > { %v2628_v37 = vadd.f32 1.0, %v5682_v1  ;;  %5691 = verf.f32 %v2139_v8  ;;  %v7961_v61 = vadd.f32 %v1391_v34, %v7682_v56  ;;  %v1393_v30 = vpop.f32.mrb[177].mxu1  ;;  %3935 = vmatprep.mubr.f32.mxu0 %v2876_v49 }
 0x314   : > { %5693 = verf.f32 %v2140_v7  ;;  %v7965_v15 = vadd.f32 %v1393_v30, %v7694_v59  ;;  %3936 = vmatmul.mubr.f32.gmra.mrb[38].mxu0 %v2875_v38  ;;  %v2883_v51 = vmul.f32 %v2627_v41, %v1859_v24 }
 0x315   : > { %v5684_v62 = vpop.eup %5683  ;;  %v2147_v54 = vmul.f32 0.70710677, %v7961_v61  ;;  %v2884_v25 = vmul.f32 %v2628_v37, %v1860_v18  ;;  %v1891_v37 = vmul.f32 0.5, %v7961_v61 }
 0x316   : > { %v5686_v36 = vpop.eup %5685  ;;  %v2635_v31 = vadd.f32 1.0, %v5684_v62  ;;  %v2148_v35 = vmul.f32 0.70710677, %v7965_v15  ;;  %v1397_v28 = vpop.f32.mrb[178].mxu1  ;;  %v1892_v34 = vmul.f32 0.5, %v7965_v15 }
 0x317   : > { %v2636_v17 = vadd.f32 1.0, %v5686_v36  ;;  %5695 = verf.f32 %v2147_v54  ;;  %v7971_v46 = vadd.f32 %v1397_v28, %v7682_v56  ;;  %v1399_v23 = vpop.f32.mrb[179].mxu1  ;;  %3941 = vmatprep.mubr.f32.mxu0 %v2884_v25 }
 0x318   : > { %5697 = verf.f32 %v2148_v35  ;;  %v7975_v33 = vadd.f32 %v1399_v23, %v7694_v59  ;;  %3942 = vmatmul.mubr.f32.gmra.mrb[40].mxu0 %v2883_v51  ;;  %v2891_v26 = vmul.f32 %v2635_v31, %v1867_v10 }
 0x319   : > { %v5688_v44 = vpop.eup %5687  ;;  %v2155_v21 = vmul.f32 0.70710677, %v7971_v46  ;;  %v2892_v40 = vmul.f32 %v2636_v17, %v1868_v39  ;;  %v1899_v17 = vmul.f32 0.5, %v7971_v46 }
 0x31a   : > { %v5690_v32 = vpop.eup %5689  ;;  %v2643_v52 = vadd.f32 1.0, %v5688_v44  ;;  %v2156_v27 = vmul.f32 0.70710677, %v7975_v33  ;;  %v1403_v55 = vpop.f32.mrb[180].mxu1  ;;  %v1900_v28 = vmul.f32 0.5, %v7975_v33 }
 0x31b   : > { %v2644_v6 = vadd.f32 1.0, %v5690_v32  ;;  %5699 = verf.f32 %v2155_v21  ;;  %v7981_v63 = vadd.f32 %v1403_v55, %v7682_v56  ;;  %v1405_v47 = vpop.f32.mrb[181].mxu1  ;;  %3947 = vmatprep.mubr.f32.mxu0 %v2892_v40  ;;  %v653_v55 = vsub.s32 6, %v6720_v4 }
 0x31c   : > { %5701 = verf.f32 %v2156_v27  ;;  %v7985_v2 = vadd.f32 %v1405_v47, %v7694_v59  ;;  %3948 = vmatmul.mubr.f32.gmra.mrb[42].mxu0 %v2891_v26  ;;  %v2899_v29 = vmul.f32 %v2643_v52, %v1875_v57 }
 0x31d   : > { %v5692_v3 = vpop.eup %5691  ;;  %v2163_v11 = vmul.f32 0.70710677, %v7981_v63  ;;  %v2900_v50 = vmul.f32 %v2644_v6, %v1876_v0  ;;  %v1907_v47 = vmul.f32 0.5, %v7981_v63 }
 0x31e   : > { %v5694_v13 = vpop.eup %5693  ;;  %v2651_v20 = vadd.f32 1.0, %v5692_v3  ;;  %v2164_v16 = vmul.f32 0.70710677, %v7985_v2  ;;  %v1409_v58 = vpop.f32.mrb[182].mxu1  ;;  %v1908_v26 = vmul.f32 0.5, %v7985_v2  ;;  %v657_v3 = vsub.s32 7, %v6720_v4 }
 0x31f   : > { %v2652_v5 = vadd.f32 1.0, %v5694_v13  ;;  %5703 = verf.f32 %v2163_v11  ;;  %v7991_v12 = vadd.f32 %v1409_v58, %v7682_v56  ;;  %v1411_v60 = vpop.f32.mrb[183].mxu1  ;;  %3953 = vmatprep.mubr.f32.mxu0 %v2900_v50 }
 0x320   : > { %5705 = verf.f32 %v2164_v16  ;;  %v7995_v9 = vadd.f32 %v1411_v60, %v7694_v59  ;;  %3954 = vmatmul.mubr.f32.gmra.mrb[44].mxu0 %v2899_v29  ;;  %v2907_v7 = vmul.f32 %v2651_v20, %v1883_v45 }
 0x321   : > { %v5696_v53 = vpop.eup %5695  ;;  %v2171_v43 = vmul.f32 0.70710677, %v7991_v12  ;;  %v2908_v8 = vmul.f32 %v2652_v5, %v1884_v14  ;;  %v5985_v14 = vld [vmem:[#allocation7] sm:$0xff] }
 0x322   : > { %v5698_v49 = vpop.eup %5697  ;;  %v2659_v19 = vadd.f32 1.0, %v5696_v53  ;;  %v2172_v1 = vmul.f32 0.70710677, %v7995_v9  ;;  %v1415_v41 = vpop.f32.mrb[184].mxu1  ;;  %v8031_v5 = vrot.slane %v5985_v14, %v653_v55  ;;  %v1916_v63 = vmul.f32 0.5, %v7995_v9 }
 0x323   : > { %v2660_v38 = vadd.f32 1.0, %v5698_v49  ;;  %5707 = verf.f32 %v2171_v43  ;;  %v8001_v42 = vadd.f32 %v1415_v41, %v7682_v56  ;;  %v1417_v18 = vpop.f32.mrb[185].mxu1  ;;  %3959 = vmatprep.mubr.f32.mxu0 %v2908_v8  ;;  %v1915_v43 = vmul.f32 0.5, %v7991_v12 }
 0x324   : > { %5709 = verf.f32 %v2172_v1  ;;  %v8005_v30 = vadd.f32 %v1417_v18, %v7694_v59  ;;  %3960 = vmatmul.mubr.f32.gmra.mrb[46].mxu0 %v2907_v7  ;;  %v2915_v35 = vmul.f32 %v2659_v19, %v1891_v37  ;;  %v8041_v49 = vrot.slane %v5985_v14, %v657_v3 }
 0x325   : > { %v5700_v24 = vpop.eup %5699  ;;  %v2179_v62 = vmul.f32 0.70710677, %v8001_v42  ;;  %v2916_v54 = vmul.f32 %v2660_v38, %v1892_v34 }
 0x326   : > { %v5702_v25 = vpop.eup %5701  ;;  %v2667_v15 = vadd.f32 1.0, %v5700_v24  ;;  %v2180_v36 = vmul.f32 0.70710677, %v8005_v30  ;;  %v1421_v31 = vpop.f32.mrb[186].mxu1  ;;  %v1924_v18 = vmul.f32 0.5, %v8005_v30  ;;  %v1923_v24 = vmul.f32 0.5, %v8001_v42 }
 0x327   : > { %v2668_v51 = vadd.f32 1.0, %v5702_v25  ;;  %5711 = verf.f32 %v2179_v62  ;;  %v8011_v61 = vadd.f32 %v1421_v31, %v7682_v56  ;;  %v1423_v39 = vpop.f32.mrb[187].mxu1  ;;  %3965 = vmatprep.mubr.f32.mxu0 %v2916_v54 }
 0x328   : > { %5713 = verf.f32 %v2180_v36  ;;  %v8015_v23 = vadd.f32 %v1423_v39, %v7694_v59  ;;  %3966 = vmatmul.mubr.f32.gmra.mrb[48].mxu0 %v2915_v35  ;;  %v2923_v27 = vmul.f32 %v2667_v15, %v1899_v17 }
 0x329   : > { %v5704_v10 = vpop.eup %5703  ;;  %v2187_v44 = vmul.f32 0.70710677, %v8011_v61  ;;  %v2924_v21 = vmul.f32 %v2668_v51, %v1900_v28 }
 0x32a   : > { %v5706_v40 = vpop.eup %5705  ;;  %v2675_v33 = vadd.f32 1.0, %v5704_v10  ;;  %v2188_v32 = vmul.f32 0.70710677, %v8015_v23  ;;  %v1427_v52 = vpop.f32.mrb[188].mxu1  ;;  %v1932_v51 = vmul.f32 0.5, %v8015_v23  ;;  %v1931_v10 = vmul.f32 0.5, %v8011_v61 }
 0x32b   : > { %v2676_v46 = vadd.f32 1.0, %v5706_v40  ;;  %5715 = verf.f32 %v2187_v44  ;;  %v8022_v0 = vadd.f32 %v1427_v52, %v7682_v56  ;;  %v1429_v6 = vpop.f32.mrb[189].mxu1  ;;  %3971 = vmatprep.mubr.f32.mxu0 %v2924_v21 }
 0x32c   : > { %5717 = verf.f32 %v2188_v32  ;;  %v8026_v57 = vadd.f32 %v1429_v6, %v7694_v59  ;;  %3972 = vmatmul.mubr.f32.gmra.mrb[50].mxu0 %v2923_v27  ;;  %v2931_v29 = vmul.f32 %v2675_v33, %v1907_v47 }
 0x32d   : > { %v5708_v11 = vpop.eup %5707  ;;  %v2195_v50 = vmul.f32 0.70710677, %v8022_v0  ;;  %v2932_v2 = vmul.f32 %v2676_v46, %v1908_v26  ;;  %v1939_v47 = vmul.f32 0.5, %v8022_v0 }
 0x32e   : > { %v5710_v13 = vpop.eup %5709  ;;  %v2683_v20 = vadd.f32 1.0, %v5708_v11  ;;  %v2196_v16 = vmul.f32 0.70710677, %v8026_v57  ;;  %v1433_v58 = vpop.f32.mrb[190].mxu1  ;;  %v1940_v26 = vmul.f32 0.5, %v8026_v57 }
 0x32f   : > { %v2684_v60 = vadd.f32 1.0, %v5710_v13  ;;  %5719 = verf.f32 %v2195_v50  ;;  %v8035_v45 = vadd.f32 %v1433_v58, %v7682_v56  ;;  %v1435_v53 = vpop.f32.mrb[191].mxu1  ;;  %3977 = vmatprep.mubr.f32.mxu0 %v2932_v2 }
 0x330   : > { %5721 = verf.f32 %v2196_v16  ;;  %v8039_v8 = vadd.f32 %v1435_v53, %v7694_v59  ;;  %3978 = vmatmul.mubr.f32.gmra.mrb[52].mxu0 %v2931_v29  ;;  %v2939_v38 = vmul.f32 %v2683_v20, %v1915_v43 }
 0x331   : > { %v5712_v19 = vpop.eup %5711  ;;  %v2203_v1 = vmul.f32 0.70710677, %v8035_v45  ;;  %v2940_v9 = vmul.f32 %v2684_v60, %v1916_v63  ;;  %v1947_v60 = vmul.f32 0.5, %v8035_v45 }
 0x332   : > { %v5714_v41 = vpop.eup %5713  ;;  %v2691_v7 = vadd.f32 1.0, %v5712_v19  ;;  %v2204_v56 = vmul.f32 0.70710677, %v8039_v8  ;;  %v1504_v34 = vpop.f32.mrb[192].mxu1  ;;  %v1948_v29 = vmul.f32 0.5, %v8039_v8 }
 0x333   : > { %v2692_v12 = vadd.f32 1.0, %v5714_v41  ;;  %5723 = verf.f32 %v2203_v1  ;;  %v8047_v59 = vadd.f32 %v1504_v34, %v8031_v5  ;;  %v1506_v37 = vpop.f32.mrb[193].mxu1  ;;  %3983 = vmatprep.mubr.f32.mxu0 %v2940_v9 }
 0x334   : > { %5725 = verf.f32 %v2204_v56  ;;  %v8051_v62 = vadd.f32 %v1506_v37, %v8041_v49  ;;  %3984 = vmatmul.mubr.f32.gmra.mrb[54].mxu0 %v2939_v38  ;;  %v2947_v28 = vmul.f32 %v2691_v7, %v1923_v24 }
 0x335   : > { %v5716_v54 = vpop.eup %5715  ;;  %v1957_v25 = vmul.f32 0.70710677, %v8047_v59  ;;  %v2948_v15 = vmul.f32 %v2692_v12, %v1924_v18  ;;  %v1701_v12 = vmul.f32 0.5, %v8047_v59 }
 0x336   : > { %v5718_v36 = vpop.eup %5717  ;;  %v2699_v30 = vadd.f32 1.0, %v5716_v54  ;;  %v1958_v31 = vmul.f32 0.70710677, %v8051_v62  ;;  %v1510_v35 = vpop.f32.mrb[194].mxu1  ;;  %v1702_v34 = vmul.f32 0.5, %v8051_v62 }
 0x337   : > { %v2700_v39 = vadd.f32 1.0, %v5718_v36  ;;  %5727 = verf.f32 %v1957_v25  ;;  %v8057_v42 = vadd.f32 %v1510_v35, %v8031_v5  ;;  %v1512_v17 = vpop.f32.mrb[195].mxu1  ;;  %3989 = vmatprep.mubr.f32.mxu0 %v2948_v15 }
 0x338   : > { %5729 = verf.f32 %v1958_v31  ;;  %v8061_v44 = vadd.f32 %v1512_v17, %v8041_v49  ;;  %3990 = vmatmul.mubr.f32.gmra.mrb[56].mxu0 %v2947_v28  ;;  %v2955_v55 = vmul.f32 %v2699_v30, %v1931_v10 }
 0x339   : > { %v5720_v21 = vpop.eup %5719  ;;  %v1965_v40 = vmul.f32 0.70710677, %v8057_v42  ;;  %v2956_v33 = vmul.f32 %v2700_v39, %v1932_v51  ;;  %v1709_v39 = vmul.f32 0.5, %v8057_v42 }
 0x33a   : > { %v5722_v32 = vpop.eup %5721  ;;  %v2707_v23 = vadd.f32 1.0, %v5720_v21  ;;  %v1966_v52 = vmul.f32 0.70710677, %v8061_v44  ;;  %v1516_v27 = vpop.f32.mrb[196].mxu1  ;;  %v1710_v35 = vmul.f32 0.5, %v8061_v44 }
 0x33b   : > { %v2708_v46 = vadd.f32 1.0, %v5722_v32  ;;  %5731 = verf.f32 %v1965_v40  ;;  %v8067_v61 = vadd.f32 %v1516_v27, %v8031_v5  ;;  %v1518_v6 = vpop.f32.mrb[197].mxu1  ;;  %3995 = vmatprep.mubr.f32.mxu0 %v2956_v33 }
 0x33c   : > { %5733 = verf.f32 %v1966_v52  ;;  %v8071_v3 = vadd.f32 %v1518_v6, %v8041_v49  ;;  %3996 = vmatmul.mubr.f32.gmra.mrb[58].mxu0 %v2955_v55  ;;  %v2963_v58 = vmul.f32 %v2707_v23, %v1939_v47 }
 0x33d   : > { %v5724_v11 = vpop.eup %5723  ;;  %v1973_v50 = vmul.f32 0.70710677, %v8067_v61  ;;  %v2964_v2 = vmul.f32 %v2708_v46, %v1940_v26  ;;  %v1717_v46 = vmul.f32 0.5, %v8067_v61 }
 0x33e   : > { %v5726_v13 = vpop.eup %5725  ;;  %v2715_v57 = vadd.f32 1.0, %v5724_v11  ;;  %v1974_v20 = vmul.f32 0.70710677, %v8071_v3  ;;  %v1522_v16 = vpop.f32.mrb[198].mxu1  ;;  %v1718_v27 = vmul.f32 0.5, %v8071_v3 }
 0x33f   : > { %v2716_v14 = vadd.f32 1.0, %v5726_v13  ;;  %5735 = verf.f32 %v1973_v50  ;;  %v8077_v0 = vadd.f32 %v1522_v16, %v8031_v5  ;;  %v1524_v63 = vpop.f32.mrb[199].mxu1  ;;  %4001 = vmatprep.mubr.f32.mxu0 %v2964_v2 }
 0x340   : > { %5737 = verf.f32 %v1974_v20  ;;  %v8081_v53 = vadd.f32 %v1524_v63, %v8041_v49  ;;  %4002 = vmatmul.mubr.f32.gmra.mrb[60].mxu0 %v2963_v58  ;;  %v2971_v56 = vmul.f32 %v2715_v57, %v1947_v60 }
 0x341   : > { %v5728_v43 = vpop.eup %5727  ;;  %v1981_v19 = vmul.f32 0.70710677, %v8077_v0  ;;  %v2972_v1 = vmul.f32 %v2716_v14, %v1948_v29  ;;  %v1725_v14 = vmul.f32 0.5, %v8077_v0 }
 0x342   : > { %v5730_v9 = vpop.eup %5729  ;;  %v2469_v8 = vadd.f32 1.0, %v5728_v43  ;;  %v1982_v41 = vmul.f32 0.70710677, %v8081_v53  ;;  %v1528_v7 = vpop.f32.mrb[200].mxu1  ;;  %v1726_v16 = vmul.f32 0.5, %v8081_v53 }
 0x343   : > { %v2470_v38 = vadd.f32 1.0, %v5730_v9  ;;  %5739 = verf.f32 %v1981_v19  ;;  %v8087_v45 = vadd.f32 %v1528_v7, %v8031_v5  ;;  %v1530_v18 = vpop.f32.mrb[201].mxu1  ;;  %4007 = vmatprep.mubr.f32.mxu0 %v2972_v1 }
 0x344   : > { %5741 = verf.f32 %v1982_v41  ;;  %v8091_v37 = vadd.f32 %v1530_v18, %v8041_v49  ;;  %4008 = vmatmul.mubr.f32.gmra.mrb[62].mxu0 %v2971_v56  ;;  %v2725_v62 = vmul.f32 %v2469_v8, %v1701_v12 }
 0x345   : > { %v5732_v24 = vpop.eup %5731  ;;  %v1989_v54 = vmul.f32 0.70710677, %v8087_v45  ;;  %v2726_v25 = vmul.f32 %v2470_v38, %v1702_v34  ;;  %v1733_v38 = vmul.f32 0.5, %v8087_v45 }
 0x346   : > { %v5734_v15 = vpop.eup %5733  ;;  %v2477_v36 = vadd.f32 1.0, %v5732_v24  ;;  %v1990_v30 = vmul.f32 0.70710677, %v8091_v37  ;;  %v1534_v31 = vpop.f32.mrb[202].mxu1  ;;  %v1734_v7 = vmul.f32 0.5, %v8091_v37 }
 0x347   : > { %v2478_v28 = vadd.f32 1.0, %v5734_v15  ;;  %5743 = verf.f32 %v1989_v54  ;;  %v8097_v59 = vadd.f32 %v1534_v31, %v8031_v5  ;;  %v1536_v51 = vpop.f32.mrb[203].mxu1  ;;  %4078 = vmatprep.mubr.f32.mxu0 %v2726_v25 }
 0x348   : > { %5745 = verf.f32 %v1990_v30  ;;  %v8101_v17 = vadd.f32 %v1536_v51, %v8041_v49  ;;  %4079 = vmatmul.mubr.f32.vlgmr.msra.gmra.mrb[0].mxu0 %v2725_v62  ;;  %v2733_v52 = vmul.f32 %v2477_v36, %v1709_v39 }
 0x349   : > { %v5736_v10 = vpop.eup %5735  ;;  %v1997_v21 = vmul.f32 0.70710677, %v8097_v59  ;;  %v2734_v40 = vmul.f32 %v2478_v28, %v1710_v35  ;;  %v1741_v28 = vmul.f32 0.5, %v8097_v59 }
 0x34a   : > { %v5738_v33 = vpop.eup %5737  ;;  %v2485_v44 = vadd.f32 1.0, %v5736_v10  ;;  %v1998_v32 = vmul.f32 0.70710677, %v8101_v17  ;;  %v1540_v23 = vpop.f32.mrb[204].mxu1  ;;  %v1742_v30 = vmul.f32 0.5, %v8101_v17 }
 0x34b   : > { %v2486_v55 = vadd.f32 1.0, %v5738_v33  ;;  %5747 = verf.f32 %v1997_v21  ;;  %v8107_v42 = vadd.f32 %v1540_v23, %v8031_v5  ;;  %v1542_v26 = vpop.f32.mrb[205].mxu1  ;;  %4084 = vmatprep.mubr.f32.mxu0 %v2734_v40 }
 0x34c   : > { %5749 = verf.f32 %v1998_v32  ;;  %v8111_v6 = vadd.f32 %v1542_v26, %v8041_v49  ;;  %4085 = vmatmul.mubr.f32.gmra.mrb[2].mxu0 %v2733_v52  ;;  %v2741_v20 = vmul.f32 %v2485_v44, %v1717_v46 }
 0x34d   : > { %v5740_v47 = vpop.eup %5739  ;;  %v2005_v11 = vmul.f32 0.70710677, %v8107_v42  ;;  %v2742_v50 = vmul.f32 %v2486_v55, %v1718_v27  ;;  %v1749_v55 = vmul.f32 0.5, %v8107_v42 }
 0x34e   : > { %v5742_v2 = vpop.eup %5741  ;;  %v2493_v3 = vadd.f32 1.0, %v5740_v47  ;;  %v2006_v13 = vmul.f32 0.70710677, %v8111_v6  ;;  %v1546_v57 = vpop.f32.mrb[206].mxu1  ;;  %v1750_v23 = vmul.f32 0.5, %v8111_v6 }
 0x34f   : > { %v2494_v58 = vadd.f32 1.0, %v5742_v2  ;;  %5751 = verf.f32 %v2005_v11  ;;  %v8117_v61 = vadd.f32 %v1546_v57, %v8031_v5  ;;  %v1548_v29 = vpop.f32.mrb[207].mxu1  ;;  %4090 = vmatprep.mubr.f32.mxu0 %v2742_v50 }
 0x350   : > { %5753 = verf.f32 %v2006_v13  ;;  %v8121_v63 = vadd.f32 %v1548_v29, %v8041_v49  ;;  %4091 = vmatmul.mubr.f32.gmra.mrb[4].mxu0 %v2741_v20  ;;  %v2749_v41 = vmul.f32 %v2493_v3, %v1725_v14 }
 0x351   : > { %v5744_v60 = vpop.eup %5743  ;;  %v2013_v43 = vmul.f32 0.70710677, %v8117_v61  ;;  %v2750_v19 = vmul.f32 %v2494_v58, %v1726_v16  ;;  %v1757_v58 = vmul.f32 0.5, %v8117_v61 }
 0x352   : > { %v5746_v1 = vpop.eup %5745  ;;  %v2501_v53 = vadd.f32 1.0, %v5744_v60  ;;  %v2014_v9 = vmul.f32 0.70710677, %v8121_v63  ;;  %v1552_v8 = vpop.f32.mrb[208].mxu1  ;;  %v1758_v57 = vmul.f32 0.5, %v8121_v63 }
 0x353   : > { %v2502_v56 = vadd.f32 1.0, %v5746_v1  ;;  %5755 = verf.f32 %v2013_v43  ;;  %v8127_v0 = vadd.f32 %v1552_v8, %v8031_v5  ;;  %v1554_v34 = vpop.f32.mrb[209].mxu1  ;;  %4096 = vmatprep.mubr.f32.mxu0 %v2750_v19 }
 0x354   : > { %5757 = verf.f32 %v2014_v9  ;;  %v8131_v18 = vadd.f32 %v1554_v34, %v8041_v49  ;;  %4097 = vmatmul.mubr.f32.gmra.mrb[6].mxu0 %v2749_v41  ;;  %v2757_v36 = vmul.f32 %v2501_v53, %v1733_v38 }
 0x355   : > { %v5748_v12 = vpop.eup %5747  ;;  %v2021_v24 = vmul.f32 0.70710677, %v8127_v0  ;;  %v2758_v54 = vmul.f32 %v2502_v56, %v1734_v7  ;;  %v1765_v56 = vmul.f32 0.5, %v8127_v0 }
 0x356   : > { %v5750_v25 = vpop.eup %5749  ;;  %v2509_v37 = vadd.f32 1.0, %v5748_v12  ;;  %v2022_v15 = vmul.f32 0.70710677, %v8131_v18  ;;  %v1558_v62 = vpop.f32.mrb[210].mxu1  ;;  %v1766_v8 = vmul.f32 0.5, %v8131_v18 }
 0x357   : > { %v2510_v31 = vadd.f32 1.0, %v5750_v25  ;;  %5759 = verf.f32 %v2021_v24  ;;  %v8137_v45 = vadd.f32 %v1558_v62, %v8031_v5  ;;  %v1560_v35 = vpop.f32.mrb[211].mxu1  ;;  %4102 = vmatprep.mubr.f32.mxu0 %v2758_v54 }
 0x358   : > { %5761 = verf.f32 %v2022_v15  ;;  %v8141_v51 = vadd.f32 %v1560_v35, %v8041_v49  ;;  %4103 = vmatmul.mubr.f32.gmra.mrb[8].mxu0 %v2757_v36  ;;  %v2765_v32 = vmul.f32 %v2509_v37, %v1741_v28 }
 0x359   : > { %v5752_v39 = vpop.eup %5751  ;;  %v2029_v10 = vmul.f32 0.70710677, %v8137_v45  ;;  %v2766_v21 = vmul.f32 %v2510_v31, %v1742_v30  ;;  %v1773_v31 = vmul.f32 0.5, %v8137_v45 }
 0x35a   : > { %v5754_v40 = vpop.eup %5753  ;;  %v2517_v17 = vadd.f32 1.0, %v5752_v39  ;;  %v2030_v33 = vmul.f32 0.70710677, %v8141_v51  ;;  %v1564_v44 = vpop.f32.mrb[212].mxu1  ;;  %v1774_v62 = vmul.f32 0.5, %v8141_v51 }
 0x35b   : > { %v2518_v52 = vadd.f32 1.0, %v5754_v40  ;;  %5763 = verf.f32 %v2029_v10  ;;  %v8147_v59 = vadd.f32 %v1564_v44, %v8031_v5  ;;  %v1566_v27 = vpop.f32.mrb[213].mxu1  ;;  %4108 = vmatprep.mubr.f32.mxu0 %v2766_v21 }
 0x35c   : > { %5765 = verf.f32 %v2030_v33  ;;  %v8151_v26 = vadd.f32 %v1566_v27, %v8041_v49  ;;  %4109 = vmatmul.mubr.f32.gmra.mrb[10].mxu0 %v2765_v32  ;;  %v2773_v13 = vmul.f32 %v2517_v17, %v1749_v55 }
 0x35d   : > { %v5756_v46 = vpop.eup %5755  ;;  %v2037_v47 = vmul.f32 0.70710677, %v8147_v59  ;;  %v2774_v11 = vmul.f32 %v2518_v52, %v1750_v23  ;;  %v1781_v52 = vmul.f32 0.5, %v8147_v59 }
 0x35e   : > { %v5758_v50 = vpop.eup %5757  ;;  %v2525_v6 = vadd.f32 1.0, %v5756_v46  ;;  %v2038_v2 = vmul.f32 0.70710677, %v8151_v26  ;;  %v1570_v3 = vpop.f32.mrb[214].mxu1  ;;  %v1782_v44 = vmul.f32 0.5, %v8151_v26 }
 0x35f   : > { %v2526_v20 = vadd.f32 1.0, %v5758_v50  ;;  %5767 = verf.f32 %v2037_v47  ;;  %v8157_v42 = vadd.f32 %v1570_v3, %v8031_v5  ;;  %v1572_v16 = vpop.f32.mrb[215].mxu1  ;;  %4114 = vmatprep.mubr.f32.mxu0 %v2774_v11 }
 0x360   : > { %5769 = verf.f32 %v2038_v2  ;;  %v8161_v29 = vadd.f32 %v1572_v16, %v8041_v49  ;;  %4115 = vmatmul.mubr.f32.gmra.mrb[12].mxu0 %v2773_v13  ;;  %v2781_v9 = vmul.f32 %v2525_v6, %v1757_v58 }
 0x361   : > { %v5760_v14 = vpop.eup %5759  ;;  %v2045_v60 = vmul.f32 0.70710677, %v8157_v42  ;;  %v2782_v43 = vmul.f32 %v2526_v20, %v1758_v57  ;;  %v1789_v20 = vmul.f32 0.5, %v8157_v42 }
 0x362   : > { %v5762_v19 = vpop.eup %5761  ;;  %v2533_v63 = vadd.f32 1.0, %v5760_v14  ;;  %v2046_v1 = vmul.f32 0.70710677, %v8161_v29  ;;  %v1576_v53 = vpop.f32.mrb[216].mxu1  ;;  %v1790_v3 = vmul.f32 0.5, %v8161_v29 }
 0x363   : > { %v2534_v41 = vadd.f32 1.0, %v5762_v19  ;;  %5771 = verf.f32 %v2045_v60  ;;  %v8167_v61 = vadd.f32 %v1576_v53, %v8031_v5  ;;  %v1578_v7 = vpop.f32.mrb[217].mxu1  ;;  %4120 = vmatprep.mubr.f32.mxu0 %v2782_v43 }
 0x364   : > { %5773 = verf.f32 %v2046_v1  ;;  %v8171_v34 = vadd.f32 %v1578_v7, %v8041_v49  ;;  %4121 = vmatmul.mubr.f32.gmra.mrb[14].mxu0 %v2781_v9  ;;  %v2789_v15 = vmul.f32 %v2533_v63, %v1765_v56 }
 0x365   : > { %v5764_v38 = vpop.eup %5763  ;;  %v2053_v12 = vmul.f32 0.70710677, %v8167_v61  ;;  %v2790_v24 = vmul.f32 %v2534_v41, %v1766_v8  ;;  %v1797_v41 = vmul.f32 0.5, %v8167_v61 }
 0x366   : > { %v5766_v54 = vpop.eup %5765  ;;  %v2541_v18 = vadd.f32 1.0, %v5764_v38  ;;  %v2054_v25 = vmul.f32 0.70710677, %v8171_v34  ;;  %v1582_v37 = vpop.f32.mrb[218].mxu1  ;;  %v1798_v53 = vmul.f32 0.5, %v8171_v34 }
 0x367   : > { %v2542_v36 = vadd.f32 1.0, %v5766_v54  ;;  %5775 = verf.f32 %v2053_v12  ;;  %v8177_v0 = vadd.f32 %v1582_v37, %v8031_v5  ;;  %v1584_v30 = vpop.f32.mrb[219].mxu1  ;;  %4126 = vmatprep.mubr.f32.mxu0 %v2790_v24 }
 0x368   : > { %5777 = verf.f32 %v2054_v25  ;;  %v8181_v35 = vadd.f32 %v1584_v30, %v8041_v49  ;;  %4127 = vmatmul.mubr.f32.gmra.mrb[16].mxu0 %v2789_v15  ;;  %v2797_v33 = vmul.f32 %v2541_v18, %v1773_v31 }
 0x369   : > { %v5768_v28 = vpop.eup %5767  ;;  %v2061_v39 = vmul.f32 0.70710677, %v8177_v0  ;;  %v2798_v10 = vmul.f32 %v2542_v36, %v1774_v62  ;;  %v1805_v36 = vmul.f32 0.5, %v8177_v0 }
 0x36a   : > { %v5770_v21 = vpop.eup %5769  ;;  %v2549_v51 = vadd.f32 1.0, %v5768_v28  ;;  %v2062_v40 = vmul.f32 0.70710677, %v8181_v35  ;;  %v1588_v17 = vpop.f32.mrb[220].mxu1  ;;  %v1806_v37 = vmul.f32 0.5, %v8181_v35 }
 0x36b   : > { %v2550_v32 = vadd.f32 1.0, %v5770_v21  ;;  %5779 = verf.f32 %v2061_v39  ;;  %v8187_v45 = vadd.f32 %v1588_v17, %v8031_v5  ;;  %v1590_v23 = vpop.f32.mrb[221].mxu1  ;;  %4132 = vmatprep.mubr.f32.mxu0 %v2798_v10 }
 0x36c   : > { %5781 = verf.f32 %v2062_v40  ;;  %v8191_v27 = vadd.f32 %v1590_v23, %v8041_v49  ;;  %4133 = vmatmul.mubr.f32.gmra.mrb[18].mxu0 %v2797_v33  ;;  %v2805_v2 = vmul.f32 %v2549_v51, %v1781_v52 }
 0x36d   : > { %v5772_v55 = vpop.eup %5771  ;;  %v2069_v46 = vmul.f32 0.70710677, %v8187_v45  ;;  %v2806_v47 = vmul.f32 %v2550_v32, %v1782_v44  ;;  %v1813_v32 = vmul.f32 0.5, %v8187_v45 }
 0x36e   : > { %v5774_v11 = vpop.eup %5773  ;;  %v2557_v26 = vadd.f32 1.0, %v5772_v55  ;;  %v2070_v50 = vmul.f32 0.70710677, %v8191_v27  ;;  %v1594_v6 = vpop.f32.mrb[222].mxu1  ;;  %v1814_v17 = vmul.f32 0.5, %v8191_v27 }
 0x36f   : > { %v2558_v13 = vadd.f32 1.0, %v5774_v11  ;;  %5783 = verf.f32 %v2069_v46  ;;  %v8197_v59 = vadd.f32 %v1594_v6, %v8031_v5  ;;  %v1596_v57 = vpop.f32.mrb[223].mxu1  ;;  %4138 = vmatprep.mubr.f32.mxu0 %v2806_v47 }
 0x370   : > { %5785 = verf.f32 %v2070_v50  ;;  %v8201_v16 = vadd.f32 %v1596_v57, %v8041_v49  ;;  %4139 = vmatmul.mubr.f32.gmra.mrb[20].mxu0 %v2805_v2  ;;  %v2813_v1 = vmul.f32 %v2557_v26, %v1789_v20 }
 0x371   : > { %v5776_v58 = vpop.eup %5775  ;;  %v2077_v14 = vmul.f32 0.70710677, %v8197_v59  ;;  %v2814_v60 = vmul.f32 %v2558_v13, %v1790_v3  ;;  %v1821_v13 = vmul.f32 0.5, %v8197_v59 }
 0x372   : > { %v5778_v43 = vpop.eup %5777  ;;  %v2565_v29 = vadd.f32 1.0, %v5776_v58  ;;  %v2078_v19 = vmul.f32 0.70710677, %v8201_v16  ;;  %v1600_v63 = vpop.f32.mrb[224].mxu1  ;;  %v1822_v6 = vmul.f32 0.5, %v8201_v16 }
 0x373   : > { %v2566_v9 = vadd.f32 1.0, %v5778_v43  ;;  %5787 = verf.f32 %v2077_v14  ;;  %v8207_v42 = vadd.f32 %v1600_v63, %v8031_v5  ;;  %v1602_v8 = vpop.f32.mrb[225].mxu1  ;;  %4144 = vmatprep.mubr.f32.mxu0 %v2814_v60 }
 0x374   : > { %5789 = verf.f32 %v2078_v19  ;;  %v8211_v7 = vadd.f32 %v1602_v8, %v8041_v49  ;;  %4145 = vmatmul.mubr.f32.gmra.mrb[22].mxu0 %v2813_v1  ;;  %v2821_v25 = vmul.f32 %v2565_v29, %v1797_v41 }
 0x375   : > { %v5780_v56 = vpop.eup %5779  ;;  %v2085_v38 = vmul.f32 0.70710677, %v8207_v42  ;;  %v2822_v12 = vmul.f32 %v2566_v9, %v1798_v53  ;;  %v1829_v9 = vmul.f32 0.5, %v8207_v42 }
 0x376   : > { %v5782_v24 = vpop.eup %5781  ;;  %v2573_v34 = vadd.f32 1.0, %v5780_v56  ;;  %v2086_v54 = vmul.f32 0.70710677, %v8211_v7  ;;  %v1606_v18 = vpop.f32.mrb[226].mxu1  ;;  %v1830_v63 = vmul.f32 0.5, %v8211_v7 }
 0x377   : > { %v2574_v15 = vadd.f32 1.0, %v5782_v24  ;;  %5791 = verf.f32 %v2085_v38  ;;  %v8217_v61 = vadd.f32 %v1606_v18, %v8031_v5  ;;  %v1608_v62 = vpop.f32.mrb[227].mxu1  ;;  %4150 = vmatprep.mubr.f32.mxu0 %v2822_v12 }
 0x378   : > { %5793 = verf.f32 %v2086_v54  ;;  %v8221_v30 = vadd.f32 %v1608_v62, %v8041_v49  ;;  %4151 = vmatmul.mubr.f32.gmra.mrb[24].mxu0 %v2821_v25  ;;  %v2829_v40 = vmul.f32 %v2573_v34, %v1805_v36 }
 0x379   : > { %v5784_v31 = vpop.eup %5783  ;;  %v2093_v28 = vmul.f32 0.70710677, %v8217_v61  ;;  %v2830_v39 = vmul.f32 %v2574_v15, %v1806_v37  ;;  %v1837_v15 = vmul.f32 0.5, %v8217_v61 }
 0x37a   : > { %v5786_v10 = vpop.eup %5785  ;;  %v2581_v35 = vadd.f32 1.0, %v5784_v31  ;;  %v2094_v21 = vmul.f32 0.70710677, %v8221_v30  ;;  %v1612_v51 = vpop.f32.mrb[228].mxu1  ;;  %v1838_v18 = vmul.f32 0.5, %v8221_v30 }
 0x37b   : > { %v2582_v33 = vadd.f32 1.0, %v5786_v10  ;;  %5795 = verf.f32 %v2093_v28  ;;  %v8227_v0 = vadd.f32 %v1612_v51, %v8031_v5  ;;  %v1614_v44 = vpop.f32.mrb[229].mxu1  ;;  %4156 = vmatprep.mubr.f32.mxu0 %v2830_v39 }
 0x37c   : > { %5797 = verf.f32 %v2094_v21  ;;  %v8231_v23 = vadd.f32 %v1614_v44, %v8041_v49  ;;  %4157 = vmatmul.mubr.f32.gmra.mrb[26].mxu0 %v2829_v40  ;;  %v2837_v50 = vmul.f32 %v2581_v35, %v1813_v32 }
 0x37d   : > { %v5788_v52 = vpop.eup %5787  ;;  %v2101_v55 = vmul.f32 0.70710677, %v8227_v0  ;;  %v2838_v46 = vmul.f32 %v2582_v33, %v1814_v17  ;;  %v1845_v33 = vmul.f32 0.5, %v8227_v0 }
 0x37e   : > { %v5790_v47 = vpop.eup %5789  ;;  %v2589_v27 = vadd.f32 1.0, %v5788_v52  ;;  %v2102_v11 = vmul.f32 0.70710677, %v8231_v23  ;;  %v1618_v26 = vpop.f32.mrb[230].mxu1  ;;  %v1846_v51 = vmul.f32 0.5, %v8231_v23 }
 0x37f   : > { %v2590_v2 = vadd.f32 1.0, %v5790_v47  ;;  %5799 = verf.f32 %v2101_v55  ;;  %v8237_v45 = vadd.f32 %v1618_v26, %v8031_v5  ;;  %v1620_v3 = vpop.f32.mrb[231].mxu1  ;;  %4162 = vmatprep.mubr.f32.mxu0 %v2838_v46 }
 0x380   : > { %5801 = verf.f32 %v2102_v11  ;;  %v8241_v57 = vadd.f32 %v1620_v3, %v8041_v49  ;;  %4163 = vmatmul.mubr.f32.gmra.mrb[28].mxu0 %v2837_v50  ;;  %v2845_v19 = vmul.f32 %v2589_v27, %v1821_v13 }
 0x381   : > { %v5792_v20 = vpop.eup %5791  ;;  %v2109_v58 = vmul.f32 0.70710677, %v8237_v45  ;;  %v2846_v14 = vmul.f32 %v2590_v2, %v1822_v6  ;;  %v1853_v2 = vmul.f32 0.5, %v8237_v45 }
 0x382   : > { %v5794_v60 = vpop.eup %5793  ;;  %v2597_v16 = vadd.f32 1.0, %v5792_v20  ;;  %v2110_v43 = vmul.f32 0.70710677, %v8241_v57  ;;  %v1624_v29 = vpop.f32.mrb[232].mxu1  ;;  %v1854_v26 = vmul.f32 0.5, %v8241_v57 }
 0x383   : > { %v2598_v1 = vadd.f32 1.0, %v5794_v60  ;;  %5803 = verf.f32 %v2109_v58  ;;  %v8247_v59 = vadd.f32 %v1624_v29, %v8031_v5  ;;  %v1626_v53 = vpop.f32.mrb[233].mxu1  ;;  %4168 = vmatprep.mubr.f32.mxu0 %v2846_v14 }
 0x384   : > { %5805 = verf.f32 %v2110_v43  ;;  %v8251_v8 = vadd.f32 %v1626_v53, %v8041_v49  ;;  %4169 = vmatmul.mubr.f32.gmra.mrb[30].mxu0 %v2845_v19  ;;  %v2853_v54 = vmul.f32 %v2597_v16, %v1829_v9 }
 0x385   : > { %v5796_v41 = vpop.eup %5795  ;;  %v2117_v56 = vmul.f32 0.70710677, %v8247_v59  ;;  %v2854_v38 = vmul.f32 %v2598_v1, %v1830_v63  ;;  %v1861_v1 = vmul.f32 0.5, %v8247_v59 }
 0x386   : > { %v5798_v12 = vpop.eup %5797  ;;  %v2605_v7 = vadd.f32 1.0, %v5796_v41  ;;  %v2118_v24 = vmul.f32 0.70710677, %v8251_v8  ;;  %v1630_v34 = vpop.f32.mrb[234].mxu1  ;;  %v1862_v29 = vmul.f32 0.5, %v8251_v8 }
 0x387   : > { %v2606_v25 = vadd.f32 1.0, %v5798_v12  ;;  %5807 = verf.f32 %v2117_v56  ;;  %v8257_v42 = vadd.f32 %v1630_v34, %v8031_v5  ;;  %v1632_v37 = vpop.f32.mrb[235].mxu1  ;;  %4174 = vmatprep.mubr.f32.mxu0 %v2854_v38 }
 0x388   : > { %5809 = verf.f32 %v2118_v24  ;;  %v8261_v62 = vadd.f32 %v1632_v37, %v8041_v49  ;;  %4175 = vmatmul.mubr.f32.gmra.mrb[32].mxu0 %v2853_v54  ;;  %v2861_v21 = vmul.f32 %v2605_v7, %v1837_v15 }
 0x389   : > { %v5800_v36 = vpop.eup %5799  ;;  %v2125_v31 = vmul.f32 0.70710677, %v8257_v42  ;;  %v2862_v28 = vmul.f32 %v2606_v25, %v1838_v18  ;;  %v1869_v25 = vmul.f32 0.5, %v8257_v42 }
 0x38a   : > { %v5802_v39 = vpop.eup %5801  ;;  %v2613_v30 = vadd.f32 1.0, %v5800_v36  ;;  %v2126_v10 = vmul.f32 0.70710677, %v8261_v62  ;;  %v1636_v35 = vpop.f32.mrb[236].mxu1  ;;  %v1870_v34 = vmul.f32 0.5, %v8261_v62 }
 0x38b   : > { %v2614_v40 = vadd.f32 1.0, %v5802_v39  ;;  %5811 = verf.f32 %v2125_v31  ;;  %v8267_v61 = vadd.f32 %v1636_v35, %v8031_v5  ;;  %v1638_v17 = vpop.f32.mrb[237].mxu1  ;;  %4180 = vmatprep.mubr.f32.mxu0 %v2862_v28 }
 0x38c   : > { %5813 = verf.f32 %v2126_v10  ;;  %v8271_v44 = vadd.f32 %v1638_v17, %v8041_v49  ;;  %4181 = vmatmul.mubr.f32.gmra.mrb[34].mxu0 %v2861_v21  ;;  %v2869_v11 = vmul.f32 %v2613_v30, %v1845_v33 }
 0x38d   : > { %v5804_v32 = vpop.eup %5803  ;;  %v2133_v52 = vmul.f32 0.70710677, %v8267_v61  ;;  %v2870_v55 = vmul.f32 %v2614_v40, %v1846_v51  ;;  %v1877_v40 = vmul.f32 0.5, %v8267_v61 }
 0x38e   : > { %v5806_v46 = vpop.eup %5805  ;;  %v2621_v23 = vadd.f32 1.0, %v5804_v32  ;;  %v2134_v47 = vmul.f32 0.70710677, %v8271_v44  ;;  %v1642_v27 = vpop.f32.mrb[238].mxu1  ;;  %v1878_v35 = vmul.f32 0.5, %v8271_v44 }
 0x38f   : > { %v2622_v50 = vadd.f32 1.0, %v5806_v46  ;;  %5815 = verf.f32 %v2133_v52  ;;  %v8277_v0 = vadd.f32 %v1642_v27, %v8031_v5  ;;  %v1644_v6 = vpop.f32.mrb[239].mxu1  ;;  %4186 = vmatprep.mubr.f32.mxu0 %v2870_v55 }
 0x390   : > { %5817 = verf.f32 %v2134_v47  ;;  %v8281_v3 = vadd.f32 %v1644_v6, %v8041_v49  ;;  %4187 = vmatmul.mubr.f32.gmra.mrb[36].mxu0 %v2869_v11  ;;  %v2877_v43 = vmul.f32 %v2621_v23, %v1853_v2 }
 0x391   : > { %v5808_v13 = vpop.eup %5807  ;;  %v2141_v20 = vmul.f32 0.70710677, %v8277_v0  ;;  %v2878_v58 = vmul.f32 %v2622_v50, %v1854_v26  ;;  %v1885_v50 = vmul.f32 0.5, %v8277_v0 }
 0x392   : > { %v5810_v14 = vpop.eup %5809  ;;  %v2629_v57 = vadd.f32 1.0, %v5808_v13  ;;  %v2142_v60 = vmul.f32 0.70710677, %v8281_v3  ;;  %v1648_v16 = vpop.f32.mrb[240].mxu1  ;;  %v1886_v27 = vmul.f32 0.5, %v8281_v3 }
 0x393   : > { %v2630_v19 = vadd.f32 1.0, %v5810_v14  ;;  %5819 = verf.f32 %v2141_v20  ;;  %v8287_v45 = vadd.f32 %v1648_v16, %v8031_v5  ;;  %v1650_v63 = vpop.f32.mrb[241].mxu1  ;;  %4192 = vmatprep.mubr.f32.mxu0 %v2878_v58 }
 0x394   : > { %5821 = verf.f32 %v2142_v60  ;;  %v8291_v53 = vadd.f32 %v1650_v63, %v8041_v49  ;;  %4193 = vmatmul.mubr.f32.gmra.mrb[38].mxu0 %v2877_v43  ;;  %v2885_v24 = vmul.f32 %v2629_v57, %v1861_v1 }
 0x395   : > { %v5812_v9 = vpop.eup %5811  ;;  %v2149_v41 = vmul.f32 0.70710677, %v8287_v45  ;;  %v2886_v56 = vmul.f32 %v2630_v19, %v1862_v29  ;;  %v1893_v19 = vmul.f32 0.5, %v8287_v45 }
 0x396   : > { %v5814_v38 = vpop.eup %5813  ;;  %v2637_v8 = vadd.f32 1.0, %v5812_v9  ;;  %v2150_v12 = vmul.f32 0.70710677, %v8291_v53  ;;  %v1654_v7 = vpop.f32.mrb[242].mxu1  ;;  %v1894_v16 = vmul.f32 0.5, %v8291_v53 }
 0x397   : > { %v2638_v54 = vadd.f32 1.0, %v5814_v38  ;;  %5823 = verf.f32 %v2149_v41  ;;  %v8297_v59 = vadd.f32 %v1654_v7, %v8031_v5  ;;  %v1656_v18 = vpop.f32.mrb[243].mxu1  ;;  %4198 = vmatprep.mubr.f32.mxu0 %v2886_v56 }
 0x398   : > { %5825 = verf.f32 %v2150_v12  ;;  %v8301_v37 = vadd.f32 %v1656_v18, %v8041_v49  ;;  %4199 = vmatmul.mubr.f32.gmra.mrb[40].mxu0 %v2885_v24  ;;  %v2893_v10 = vmul.f32 %v2637_v8, %v1869_v25 }
 0x399   : > { %v5816_v15 = vpop.eup %5815  ;;  %v2157_v36 = vmul.f32 0.70710677, %v8297_v59  ;;  %v2894_v31 = vmul.f32 %v2638_v54, %v1870_v34  ;;  %v1901_v54 = vmul.f32 0.5, %v8297_v59 }
 0x39a   : > { %v5818_v28 = vpop.eup %5817  ;;  %v2645_v62 = vadd.f32 1.0, %v5816_v15  ;;  %v2158_v39 = vmul.f32 0.70710677, %v8301_v37  ;;  %v1660_v30 = vpop.f32.mrb[244].mxu1  ;;  %v1902_v7 = vmul.f32 0.5, %v8301_v37 }
 0x39b   : > { %v2646_v21 = vadd.f32 1.0, %v5818_v28  ;;  %5827 = verf.f32 %v2157_v36  ;;  %v8307_v42 = vadd.f32 %v1660_v30, %v8031_v5  ;;  %v1662_v51 = vpop.f32.mrb[245].mxu1  ;;  %4204 = vmatprep.mubr.f32.mxu0 %v2894_v31 }
 0x39c   : > { %5829 = verf.f32 %v2158_v39  ;;  %v8311_v17 = vadd.f32 %v1662_v51, %v8041_v49  ;;  %4205 = vmatmul.mubr.f32.gmra.mrb[42].mxu0 %v2893_v10  ;;  %v2901_v47 = vmul.f32 %v2645_v62, %v1877_v40 }
 0x39d   : > { %v5820_v33 = vpop.eup %5819  ;;  %v2165_v32 = vmul.f32 0.70710677, %v8307_v42  ;;  %v2902_v52 = vmul.f32 %v2646_v21, %v1878_v35  ;;  %v1909_v21 = vmul.f32 0.5, %v8307_v42 }
 0x39e   : > { %v5822_v55 = vpop.eup %5821  ;;  %v2653_v44 = vadd.f32 1.0, %v5820_v33  ;;  %v2166_v46 = vmul.f32 0.70710677, %v8311_v17  ;;  %v1666_v23 = vpop.f32.mrb[246].mxu1  ;;  %v1910_v30 = vmul.f32 0.5, %v8311_v17 }
 0x39f   : > { %v2654_v11 = vadd.f32 1.0, %v5822_v55  ;;  %5831 = verf.f32 %v2165_v32  ;;  %v8317_v61 = vadd.f32 %v1666_v23, %v8031_v5  ;;  %v1668_v26 = vpop.f32.mrb[247].mxu1  ;;  %4210 = vmatprep.mubr.f32.mxu0 %v2902_v52 }
 0x3a0   : > { %5833 = verf.f32 %v2166_v46  ;;  %v8321_v6 = vadd.f32 %v1668_v26, %v8041_v49  ;;  %4211 = vmatmul.mubr.f32.gmra.mrb[44].mxu0 %v2901_v47  ;;  %v2909_v60 = vmul.f32 %v2653_v44, %v1885_v50 }
 0x3a1   : > { %v5824_v2 = vpop.eup %5823  ;;  %v2173_v13 = vmul.f32 0.70710677, %v8317_v61  ;;  %v2910_v20 = vmul.f32 %v2654_v11, %v1886_v27  ;;  %v1917_v42 = vmul.f32 0.5, %v8317_v61 }
 0x3a2   : > { %v5826_v58 = vpop.eup %5825  ;;  %v2661_v3 = vadd.f32 1.0, %v5824_v2  ;;  %v2174_v14 = vmul.f32 0.70710677, %v8321_v6  ;;  %v1672_v57 = vpop.f32.mrb[248].mxu1  ;;  %v1918_v23 = vmul.f32 0.5, %v8321_v6 }
 0x3a3   : > { %v2662_v43 = vadd.f32 1.0, %v5826_v58  ;;  %5835 = verf.f32 %v2173_v13  ;;  %v8327_v0 = vadd.f32 %v1672_v57, %v8031_v5  ;;  %v1674_v29 = vpop.f32.mrb[249].mxu1  ;;  %4216 = vmatprep.mubr.f32.mxu0 %v2910_v20 }
 0x3a4   : > { %5837 = verf.f32 %v2174_v14  ;;  %v8331_v63 = vadd.f32 %v1674_v29, %v8041_v49  ;;  %4217 = vmatmul.mubr.f32.gmra.mrb[46].mxu0 %v2909_v60  ;;  %v2917_v12 = vmul.f32 %v2661_v3, %v1893_v19 }
 0x3a5   : > { %v5828_v1 = vpop.eup %5827  ;;  %v2181_v9 = vmul.f32 0.70710677, %v8327_v0  ;;  %v2918_v41 = vmul.f32 %v2662_v43, %v1894_v16 }
 0x3a6   : > { %v5830_v56 = vpop.eup %5829  ;;  %v2669_v53 = vadd.f32 1.0, %v5828_v1  ;;  %v2182_v38 = vmul.f32 0.70710677, %v8331_v63  ;;  %v1678_v8 = vpop.f32.mrb[250].mxu1  ;;  %v1926_v6 = vmul.f32 0.5, %v8331_v63 }
 0x3a7   : > { %v2670_v24 = vadd.f32 1.0, %v5830_v56  ;;  %5839 = verf.f32 %v2181_v9  ;;  %v8337_v45 = vadd.f32 %v1678_v8, %v8031_v5  ;;  %v1680_v34 = vpop.f32.mrb[251].mxu1  ;;  %4222 = vmatprep.mubr.f32.mxu0 %v2918_v41 }
 0x3a8   : > { %5841 = verf.f32 %v2182_v38  ;;  %v1681_v18 = vadd.f32 %v1680_v34, %v8041_v49  ;;  %4223 = vmatmul.mubr.f32.gmra.mrb[48].mxu0 %v2917_v12  ;;  %v2925_v39 = vmul.f32 %v2669_v53, %v1901_v54 }
 0x3a9   : > { %v5832_v25 = vpop.eup %5831  ;;  %v2189_v15 = vmul.f32 0.70710677, %v8337_v45  ;;  %v2926_v36 = vmul.f32 %v2670_v24, %v1902_v7  ;;  %v1933_v1 = vmul.f32 0.5, %v8337_v45 }
 0x3aa   : > { %v5834_v31 = vpop.eup %5833  ;;  %v2677_v28 = vadd.f32 1.0, %v5832_v25  ;;  %v2190_v37 = vmul.f32 0.70710677, %v1681_v18  ;;  %v1684_v62 = vpop.f32.mrb[252].mxu1  ;;  %v1934_v29 = vmul.f32 0.5, %v1681_v18 }
 0x3ab   : > { %v2678_v10 = vadd.f32 1.0, %v5834_v31  ;;  %5843 = verf.f32 %v2189_v15  ;;  %v1685_v35 = vadd.f32 %v1684_v62, %v8031_v5  ;;  %v1686_v59 = vpop.f32.mrb[253].mxu1  ;;  %4228 = vmatprep.mubr.f32.mxu0 %v2926_v36  ;;  %v3231_v31 = vld [vmem:[%s8563_s4] sm:$0x3] }
 0x3ac   : > { %5845 = verf.f32 %v2190_v37  ;;  %v1687_v51 = vadd.f32 %v1686_v59, %v8041_v49  ;;  %4229 = vmatmul.mubr.f32.gmra.mrb[50].mxu0 %v2925_v39  ;;  %v2933_v17 = vmul.f32 %v2677_v28, %v1909_v21  ;;  %v8358_v28 = vrot.slane %v3231_v31, %v629_v22 }
 0x3ad   : > { %v5836_v40 = vpop.eup %5835  ;;  %v2197_v33 = vmul.f32 0.70710677, %v1685_v35  ;;  %v2934_v32 = vmul.f32 %v2678_v10, %v1910_v30  ;;  %v1941_v8 = vmul.f32 0.5, %v1685_v35  ;;  %v8362_v37 = vrot.slane %v3231_v31, %v633_v48 }
 0x3ae   : > { %v5838_v52 = vpop.eup %5837  ;;  %v2685_v55 = vadd.f32 1.0, %v5836_v40  ;;  %v2198_v44 = vmul.f32 0.70710677, %v1687_v51  ;;  %v1690_v46 = vpop.f32.mrb[254].mxu1  ;;  %v1942_v38 = vmul.f32 0.5, %v1687_v51 }
 0x3af   : > { %v2686_v47 = vadd.f32 1.0, %v5838_v52  ;;  %5847 = verf.f32 %v2197_v33  ;;  %v1691_v27 = vadd.f32 %v1690_v46, %v8031_v5  ;;  %v1692_v11 = vpop.f32.mrb[255].mxu1  ;;  %4234 = vmatprep.mubr.f32.mxu0 %v2934_v32  ;;  %v1925_v5 = vmul.f32 0.5, %v8327_v0 }
 0x3b0   : > { %5849 = verf.f32 %v2198_v44  ;;  %v1693_v26 = vadd.f32 %v1692_v11, %v8041_v49  ;;  %4235 = vmatmul.mubr.f32.gmra.mrb[52].mxu0 %v2933_v17  ;;  %v2941_v14 = vmul.f32 %v2685_v55, %v1917_v42 }
 0x3b1   : > { %v5840_v50 = vpop.eup %5839  ;;  %v2205_v2 = vmul.f32 0.70710677, %v1691_v27  ;;  %v2942_v13 = vmul.f32 %v2686_v47, %v1918_v23  ;;  %v1949_v45 = vmul.f32 0.5, %v1691_v27 }
 0x3b2   : > { %v5842_v20 = vpop.eup %5841  ;;  %v2693_v58 = vadd.f32 1.0, %v5840_v50  ;;  %v2206_v3 = vmul.f32 0.70710677, %v1693_v26  ;;  %v1950_v18 = vmul.f32 0.5, %v1693_v26 }
 0x3b3   : > { %v2694_v57 = vadd.f32 1.0, %v5842_v20  ;;  %5851 = verf.f32 %v2205_v2  ;;  %4240 = vmatprep.mubr.f32.mxu0 %v2942_v13 }
 0x3b4   : > { %5853 = verf.f32 %v2206_v3  ;;  %4241 = vmatmul.mubr.f32.gmra.mrb[54].mxu0 %v2941_v14  ;;  %v2949_v43 = vmul.f32 %v2693_v58, %v1925_v5 }
 0x3b5   : > { %v5844_v61 = vpop.eup %5843  ;;  %v2950_v60 = vmul.f32 %v2694_v57, %v1926_v6 }
 0x3b6   : > { %v5846_v49 = vpop.eup %5845  ;;  %v2701_v16 = vadd.f32 1.0, %v5844_v61 }
 0x3b7   : > { %v2702_v19 = vadd.f32 1.0, %v5846_v49  ;;  %4246 = vmatprep.mubr.f32.mxu0 %v2950_v60 }
 0x3b8   : > { %4247 = vmatmul.mubr.f32.gmra.mrb[56].mxu0 %v2949_v43  ;;  %v2957_v53 = vmul.f32 %v2701_v16, %v1933_v1 }
 0x3b9   : > { %v5848_v9 = vpop.eup %5847  ;;  %v2958_v63 = vmul.f32 %v2702_v19, %v1934_v29 }
 0x3ba   : > { %v5850_v41 = vpop.eup %5849  ;;  %v2709_v56 = vadd.f32 1.0, %v5848_v9 }
 0x3bb   : > { %v2710_v0 = vadd.f32 1.0, %v5850_v41  ;;  %4252 = vmatprep.mubr.f32.mxu0 %v2958_v63 }
 0x3bc   : > { %4253 = vmatmul.mubr.f32.gmra.mrb[58].mxu0 %v2957_v53  ;;  %v2965_v54 = vmul.f32 %v2709_v56, %v1941_v8 }
 0x3bd   : > { %v5852_v12 = vpop.eup %5851  ;;  %v2966_v7 = vmul.f32 %v2710_v0, %v1942_v38 }
 0x3be   : > { %v5854_v24 = vpop.eup %5853  ;;  %v2717_v34 = vadd.f32 1.0, %v5852_v12 }
 0x3bf   : > { %v2718_v25 = vadd.f32 1.0, %v5854_v24  ;;  %4258 = vmatprep.mubr.f32.mxu0 %v2966_v7 }
 0x3c0   : > { %4259 = vmatmul.mubr.f32.gmra.mrb[60].mxu0 %v2965_v54  ;;  %v2973_v36 = vmul.f32 %v2717_v34, %v1949_v45 }
 0x3c1   : > { %v2974_v15 = vmul.f32 %v2718_v25, %v1950_v18 }
 0x3c3   : > { %4264 = vmatprep.mubr.f32.mxu0 %v2974_v15 }
 0x3c4   : > { %4265 = vmatmul.mubr.f32.gmra.mrb[62].mxu0 %v2973_v36 }
 0x41b   : > { %v4080_v62 = vpop.f32.mrb[0].mxu0 }
 0x41c   : > { %v5009_v39 = vadd.f32 %v4080_v62, %v8358_v28  ;;  %v4082_v30 = vpop.f32.mrb[1].mxu0 }
 0x41d   : > { %v5010_v10 = vadd.f32 %v4082_v30, %v8362_v37 }
 0x41e   : > { %4271 = vst [vmem:[%s8368_s10] sm:$0xff] %v5009_v39 }
 0x41f   : > { %4272 = vst [vmem:[%s8368_s10 + $0x8] sm:$0xff] %v5010_v10  ;;  %v4086_v4 = vpop.f32.mrb[2].mxu0 }
 0x420   : > { %v5011_v22 = vadd.f32 %v4086_v4, %v8358_v28  ;;  %v4088_v48 = vpop.f32.mrb[3].mxu0 }
 0x421   : > { %v5012_v35 = vadd.f32 %v4088_v48, %v8362_v37 }
 0x422   : > { %4273 = vst [vmem:[%s8368_s10 + $0x10] sm:$0xff] %v5011_v22 }
 0x423   : > { %4274 = vst [vmem:[%s8368_s10 + $0x18] sm:$0xff] %v5012_v35  ;;  %v4092_v59 = vpop.f32.mrb[4].mxu0 }
 0x424   : > { %v5013_v21 = vadd.f32 %v4092_v59, %v8358_v28  ;;  %v4094_v51 = vpop.f32.mrb[5].mxu0 }
 0x425   : > { %v5014_v40 = vadd.f32 %v4094_v51, %v8362_v37 }
 0x426   : > { %4275 = vst [vmem:[%s8368_s10 + $0x20] sm:$0xff] %v5013_v21 }
 0x427   : > { %4276 = vst [vmem:[%s8368_s10 + $0x28] sm:$0xff] %v5014_v40  ;;  %v4098_v33 = vpop.f32.mrb[6].mxu0 }
 0x428   : > { %v5015_v32 = vadd.f32 %v4098_v33, %v8358_v28  ;;  %v4100_v52 = vpop.f32.mrb[7].mxu0 }
 0x429   : > { %v5016_v55 = vadd.f32 %v4100_v52, %v8362_v37 }
 0x42a   : > { %4277 = vst [vmem:[%s8368_s10 + $0x30] sm:$0xff] %v5015_v32 }
 0x42b   : > { %4278 = vst [vmem:[%s8368_s10 + $0x38] sm:$0xff] %v5016_v55  ;;  %v4104_v44 = vpop.f32.mrb[8].mxu0 }
 0x42c   : > { %v5017_v46 = vadd.f32 %v4104_v44, %v8358_v28  ;;  %v4106_v17 = vpop.f32.mrb[9].mxu0 }
 0x42d   : > { %v5018_v23 = vadd.f32 %v4106_v17, %v8362_v37 }
 0x42e   : > { %4279 = vst [vmem:[%s8368_s10 + $0x40] sm:$0xff] %v5017_v46 }
 0x42f   : > { %4280 = vst [vmem:[%s8368_s10 + $0x48] sm:$0xff] %v5018_v23  ;;  %v4110_v47 = vpop.f32.mrb[10].mxu0 }
 0x430   : > { %v5019_v27 = vadd.f32 %v4110_v47, %v8358_v28  ;;  %v4112_v11 = vpop.f32.mrb[11].mxu0 }
 0x431   : > { %v5020_v42 = vadd.f32 %v4112_v11, %v8362_v37 }
 0x432   : > { %4281 = vst [vmem:[%s8368_s10 + $0x50] sm:$0xff] %v5019_v27 }
 0x433   : > { %4282 = vst [vmem:[%s8368_s10 + $0x58] sm:$0xff] %v5020_v42  ;;  %v4116_v26 = vpop.f32.mrb[12].mxu0 }
 0x434   : > { %v5021_v50 = vadd.f32 %v4116_v26, %v8358_v28  ;;  %v4118_v2 = vpop.f32.mrb[13].mxu0 }
 0x435   : > { %v5022_v13 = vadd.f32 %v4118_v2, %v8362_v37 }
 0x436   : > { %4283 = vst [vmem:[%s8368_s10 + $0x60] sm:$0xff] %v5021_v50 }
 0x437   : > { %4284 = vst [vmem:[%s8368_s10 + $0x68] sm:$0xff] %v5022_v13  ;;  %v4122_v20 = vpop.f32.mrb[14].mxu0 }
 0x438   : > { %v5023_v58 = vadd.f32 %v4122_v20, %v8358_v28  ;;  %v4124_v3 = vpop.f32.mrb[15].mxu0 }
 0x439   : > { %v5024_v14 = vadd.f32 %v4124_v3, %v8362_v37 }
 0x43a   : > { %4285 = vst [vmem:[%s8368_s10 + $0x70] sm:$0xff] %v5023_v58 }
 0x43b   : > { %4286 = vst [vmem:[%s8368_s10 + $0x78] sm:$0xff] %v5024_v14  ;;  %v4128_v6 = vpop.f32.mrb[16].mxu0 }
 0x43c   : > { %v5025_v57 = vadd.f32 %v4128_v6, %v8358_v28  ;;  %v4130_v5 = vpop.f32.mrb[17].mxu0 }
 0x43d   : > { %v5026_v61 = vadd.f32 %v4130_v5, %v8362_v37 }
 0x43e   : > { %4287 = vst [vmem:[%s8368_s10 + $0x80] sm:$0xff] %v5025_v57 }
 0x43f   : > { %4288 = vst [vmem:[%s8368_s10 + $0x88] sm:$0xff] %v5026_v61  ;;  %v4134_v60 = vpop.f32.mrb[18].mxu0 }
 0x440   : > { %v5027_v49 = vadd.f32 %v4134_v60, %v8358_v28  ;;  %v4136_v16 = vpop.f32.mrb[19].mxu0 }
 0x441   : > { %v5028_v43 = vadd.f32 %v4136_v16, %v8362_v37 }
 0x442   : > { %4289 = vst [vmem:[%s8368_s10 + $0x90] sm:$0xff] %v5027_v49 }
 0x443   : > { %4290 = vst [vmem:[%s8368_s10 + $0x98] sm:$0xff] %v5028_v43  ;;  %v4140_v29 = vpop.f32.mrb[20].mxu0 }
 0x444   : > { %v5029_v19 = vadd.f32 %v4140_v29, %v8358_v28  ;;  %v4142_v1 = vpop.f32.mrb[21].mxu0 }
 0x445   : > { %v5030_v9 = vadd.f32 %v4142_v1, %v8362_v37 }
 0x446   : > { %4291 = vst [vmem:[%s8368_s10 + $0xa0] sm:$0xff] %v5029_v19 }
 0x447   : > { %4292 = vst [vmem:[%s8368_s10 + $0xa8] sm:$0xff] %v5030_v9  ;;  %v4146_v63 = vpop.f32.mrb[22].mxu0 }
 0x448   : > { %v5031_v41 = vadd.f32 %v4146_v63, %v8358_v28  ;;  %v4148_v56 = vpop.f32.mrb[23].mxu0 }
 0x449   : > { %v5032_v53 = vadd.f32 %v4148_v56, %v8362_v37 }
 0x44a   : > { %4293 = vst [vmem:[%s8368_s10 + $0xb0] sm:$0xff] %v5031_v41 }
 0x44b   : > { %4294 = vst [vmem:[%s8368_s10 + $0xb8] sm:$0xff] %v5032_v53  ;;  %v4152_v38 = vpop.f32.mrb[24].mxu0 }
 0x44c   : > { %v5033_v0 = vadd.f32 %v4152_v38, %v8358_v28  ;;  %v4154_v8 = vpop.f32.mrb[25].mxu0 }
 0x44d   : > { %v5034_v12 = vadd.f32 %v4154_v8, %v8362_v37 }
 0x44e   : > { %4295 = vst [vmem:[%s8368_s10 + $0xc0] sm:$0xff] %v5033_v0 }
 0x44f   : > { %4296 = vst [vmem:[%s8368_s10 + $0xc8] sm:$0xff] %v5034_v12  ;;  %v4158_v7 = vpop.f32.mrb[26].mxu0 }
 0x450   : > { %v5035_v24 = vadd.f32 %v4158_v7, %v8358_v28  ;;  %v4160_v34 = vpop.f32.mrb[27].mxu0 }
 0x451   : > { %v5036_v54 = vadd.f32 %v4160_v34, %v8362_v37 }
 0x452   : > { %4297 = vst [vmem:[%s8368_s10 + $0xd0] sm:$0xff] %v5035_v24 }
 0x453   : > { %4298 = vst [vmem:[%s8368_s10 + $0xd8] sm:$0xff] %v5036_v54  ;;  %v4164_v18 = vpop.f32.mrb[28].mxu0 }
 0x454   : > { %v5037_v25 = vadd.f32 %v4164_v18, %v8358_v28  ;;  %v4166_v45 = vpop.f32.mrb[29].mxu0 }
 0x455   : > { %v5038_v15 = vadd.f32 %v4166_v45, %v8362_v37 }
 0x456   : > { %4299 = vst [vmem:[%s8368_s10 + $0xe0] sm:$0xff] %v5037_v25 }
 0x457   : > { %4300 = vst [vmem:[%s8368_s10 + $0xe8] sm:$0xff] %v5038_v15  ;;  %v4170_v36 = vpop.f32.mrb[30].mxu0 }
 0x458   : > { %v5039_v31 = vadd.f32 %v4170_v36, %v8358_v28  ;;  %v4172_v62 = vpop.f32.mrb[31].mxu0 }
 0x459   : > { %v5040_v39 = vadd.f32 %v4172_v62, %v8362_v37 }
 0x45a   : > { %4301 = vst [vmem:[%s8368_s10 + $0xf0] sm:$0xff] %v5039_v31 }
 0x45b   : > { %4302 = vst [vmem:[%s8368_s10 + $0xf8] sm:$0xff] %v5040_v39  ;;  %v4176_v30 = vpop.f32.mrb[32].mxu0 }
 0x45c   : > { %v5041_v10 = vadd.f32 %v4176_v30, %v8358_v28  ;;  %v4178_v4 = vpop.f32.mrb[33].mxu0 }
 0x45d   : > { %v5042_v22 = vadd.f32 %v4178_v4, %v8362_v37 }
 0x45e   : > { %4303 = vst [vmem:[%s8368_s10 + $0x100] sm:$0xff] %v5041_v10 }
 0x45f   : > { %4304 = vst [vmem:[%s8368_s10 + $0x108] sm:$0xff] %v5042_v22  ;;  %v4182_v48 = vpop.f32.mrb[34].mxu0 }
 0x460   : > { %v5043_v35 = vadd.f32 %v4182_v48, %v8358_v28  ;;  %v4184_v59 = vpop.f32.mrb[35].mxu0 }
 0x461   : > { %v5044_v21 = vadd.f32 %v4184_v59, %v8362_v37 }
 0x462   : > { %4305 = vst [vmem:[%s8368_s10 + $0x110] sm:$0xff] %v5043_v35 }
 0x463   : > { %4306 = vst [vmem:[%s8368_s10 + $0x118] sm:$0xff] %v5044_v21  ;;  %v4188_v51 = vpop.f32.mrb[36].mxu0 }
 0x464   : > { %v5045_v40 = vadd.f32 %v4188_v51, %v8358_v28  ;;  %v4190_v33 = vpop.f32.mrb[37].mxu0 }
 0x465   : > { %v5046_v32 = vadd.f32 %v4190_v33, %v8362_v37 }
 0x466   : > { %4307 = vst [vmem:[%s8368_s10 + $0x120] sm:$0xff] %v5045_v40 }
 0x467   : > { %4308 = vst [vmem:[%s8368_s10 + $0x128] sm:$0xff] %v5046_v32  ;;  %v4194_v52 = vpop.f32.mrb[38].mxu0 }
 0x468   : > { %v5047_v55 = vadd.f32 %v4194_v52, %v8358_v28  ;;  %v4196_v44 = vpop.f32.mrb[39].mxu0 }
 0x469   : > { %v5048_v46 = vadd.f32 %v4196_v44, %v8362_v37 }
 0x46a   : > { %4309 = vst [vmem:[%s8368_s10 + $0x130] sm:$0xff] %v5047_v55 }
 0x46b   : > { %4310 = vst [vmem:[%s8368_s10 + $0x138] sm:$0xff] %v5048_v46  ;;  %v4200_v17 = vpop.f32.mrb[40].mxu0 }
 0x46c   : > { %v5049_v23 = vadd.f32 %v4200_v17, %v8358_v28  ;;  %v4202_v47 = vpop.f32.mrb[41].mxu0 }
 0x46d   : > { %v5050_v27 = vadd.f32 %v4202_v47, %v8362_v37 }
 0x46e   : > { %4311 = vst [vmem:[%s8368_s10 + $0x140] sm:$0xff] %v5049_v23 }
 0x46f   : > { %4312 = vst [vmem:[%s8368_s10 + $0x148] sm:$0xff] %v5050_v27  ;;  %v4206_v11 = vpop.f32.mrb[42].mxu0 }
 0x470   : > { %v5051_v42 = vadd.f32 %v4206_v11, %v8358_v28  ;;  %v4208_v26 = vpop.f32.mrb[43].mxu0 }
 0x471   : > { %v5052_v50 = vadd.f32 %v4208_v26, %v8362_v37 }
 0x472   : > { %4313 = vst [vmem:[%s8368_s10 + $0x150] sm:$0xff] %v5051_v42 }
 0x473   : > { %4314 = vst [vmem:[%s8368_s10 + $0x158] sm:$0xff] %v5052_v50  ;;  %v4212_v2 = vpop.f32.mrb[44].mxu0 }
 0x474   : > { %v5053_v13 = vadd.f32 %v4212_v2, %v8358_v28  ;;  %v4214_v20 = vpop.f32.mrb[45].mxu0 }
 0x475   : > { %v5054_v58 = vadd.f32 %v4214_v20, %v8362_v37 }
 0x476   : > { %4315 = vst [vmem:[%s8368_s10 + $0x160] sm:$0xff] %v5053_v13 }
 0x477   : > { %4316 = vst [vmem:[%s8368_s10 + $0x168] sm:$0xff] %v5054_v58  ;;  %v4218_v3 = vpop.f32.mrb[46].mxu0 }
 0x478   : > { %v5055_v14 = vadd.f32 %v4218_v3, %v8358_v28  ;;  %v4220_v6 = vpop.f32.mrb[47].mxu0 }
 0x479   : > { %v5056_v57 = vadd.f32 %v4220_v6, %v8362_v37 }
 0x47a   : > { %4317 = vst [vmem:[%s8368_s10 + $0x170] sm:$0xff] %v5055_v14 }
 0x47b   : > { %4318 = vst [vmem:[%s8368_s10 + $0x178] sm:$0xff] %v5056_v57  ;;  %v4224_v5 = vpop.f32.mrb[48].mxu0 }
 0x47c   : > { %v5057_v61 = vadd.f32 %v4224_v5, %v8358_v28  ;;  %v4226_v60 = vpop.f32.mrb[49].mxu0 }
 0x47d   : > { %v5058_v49 = vadd.f32 %v4226_v60, %v8362_v37 }
 0x47e   : > { %4319 = vst [vmem:[%s8368_s10 + $0x180] sm:$0xff] %v5057_v61 }
 0x47f   : > { %4320 = vst [vmem:[%s8368_s10 + $0x188] sm:$0xff] %v5058_v49  ;;  %v4230_v16 = vpop.f32.mrb[50].mxu0 }
 0x480   : > { %v5059_v43 = vadd.f32 %v4230_v16, %v8358_v28  ;;  %v4232_v29 = vpop.f32.mrb[51].mxu0 }
 0x481   : > { %v5060_v19 = vadd.f32 %v4232_v29, %v8362_v37 }
 0x482   : > { %4321 = vst [vmem:[%s8368_s10 + $0x190] sm:$0xff] %v5059_v43 }
 0x483   : > { %4322 = vst [vmem:[%s8368_s10 + $0x198] sm:$0xff] %v5060_v19  ;;  %v4236_v1 = vpop.f32.mrb[52].mxu0 }
 0x484   : > { %v5061_v9 = vadd.f32 %v4236_v1, %v8358_v28  ;;  %v4238_v63 = vpop.f32.mrb[53].mxu0 }
 0x485   : > { %v5062_v41 = vadd.f32 %v4238_v63, %v8362_v37 }
 0x486   : > { %4323 = vst [vmem:[%s8368_s10 + $0x1a0] sm:$0xff] %v5061_v9 }
 0x487   : > { %4324 = vst [vmem:[%s8368_s10 + $0x1a8] sm:$0xff] %v5062_v41  ;;  %v4242_v56 = vpop.f32.mrb[54].mxu0 }
 0x488   : > { %v5063_v53 = vadd.f32 %v4242_v56, %v8358_v28  ;;  %v4244_v38 = vpop.f32.mrb[55].mxu0 }
 0x489   : > { %v5064_v0 = vadd.f32 %v4244_v38, %v8362_v37 }
 0x48a   : > { %4325 = vst [vmem:[%s8368_s10 + $0x1b0] sm:$0xff] %v5063_v53 }
 0x48b   : > { %4326 = vst [vmem:[%s8368_s10 + $0x1b8] sm:$0xff] %v5064_v0  ;;  %v4248_v8 = vpop.f32.mrb[56].mxu0 }
 0x48c   : > { %v5065_v12 = vadd.f32 %v4248_v8, %v8358_v28  ;;  %v4250_v7 = vpop.f32.mrb[57].mxu0 }
 0x48d   : > { %v5066_v24 = vadd.f32 %v4250_v7, %v8362_v37 }
 0x48e   : > { %4327 = vst [vmem:[%s8368_s10 + $0x1c0] sm:$0xff] %v5065_v12 }
 0x48f   : > { %4328 = vst [vmem:[%s8368_s10 + $0x1c8] sm:$0xff] %v5066_v24  ;;  %v4254_v34 = vpop.f32.mrb[58].mxu0 }
 0x490   : > { %v5067_v54 = vadd.f32 %v4254_v34, %v8358_v28  ;;  %v4256_v18 = vpop.f32.mrb[59].mxu0 }
 0x491   : > { %v5068_v25 = vadd.f32 %v4256_v18, %v8362_v37 }
 0x492   : > { %4329 = vst [vmem:[%s8368_s10 + $0x1d0] sm:$0xff] %v5067_v54 }
 0x493   : > { %4330 = vst [vmem:[%s8368_s10 + $0x1d8] sm:$0xff] %v5068_v25  ;;  %v4260_v45 = vpop.f32.mrb[60].mxu0 }
 0x494   : > { %v5069_v15 = vadd.f32 %v4260_v45, %v8358_v28  ;;  %v4262_v36 = vpop.f32.mrb[61].mxu0 }
 0x495   : > { %v5070_v31 = vadd.f32 %v4262_v36, %v8362_v37  ;;  %4342 = sbr.rel (!%p8634_p1) target bundleno = 1208 (0x4b8), region = 60 }
 0x496   : > { %4331 = vst [vmem:[%s8368_s10 + $0x1e0] sm:$0xff] %v5069_v15 }
 0x497   : > { %4332 = vst [vmem:[%s8368_s10 + $0x1e8] sm:$0xff] %v5070_v31  ;;  %v4266_v62 = vpop.f32.mrb[62].mxu0 }
 0x498   : > { %v5071_v39 = vadd.f32 %v4266_v62, %v8358_v28  ;;  %v4268_v30 = vpop.f32.mrb[63].mxu0 }
 0x499   : > { %v5072_v10 = vadd.f32 %v4268_v30, %v8362_v37 }
 0x49a   : > { %4333 = vst [vmem:[%s8368_s10 + $0x1f0] sm:$0xff] %v5071_v39 }
 0x49b   : > { %4334 = vst [vmem:[%s8368_s10 + $0x1f8] sm:$0xff] %v5072_v10 }
 0x49c   : > { %s8644_s9 = smov (!%p4345_p3, %s4344_s9), 32 }
 0x49d   : > { %s8500_s14 = sshll.u32 %s8644_s9, 8 }
 0x49e   : > { %s4350_s15 = ssub.s32 8192, %s8500_s14 }
 0x49f   : > { %4351 = vsyncadd %s4336_s17, %s4350_s15  ;;  %p4484_p6 = scmp.ne.s32.totalorder %s8500_s14, 0  ;;  %s4496_s30 = sshll.u32 %s6238_s22, 13 }
 0x4a0   : > { %s8510_s25 = scalar_lea.hbm %s8564_s5, %s4496_s30  ;;  %s4357_s28 = sshll.u32 %s8368_s10, 4  ;;  %s8513_s28 = int_to_ptr.vmem [resolvable:$true] %s4357_s28 }
 0x4a1   : > { %s6098_s26 = scalar_lea.vmem %s8513_s28, %s8500_s14  ;;  %s6184_s8 = smov [#allocation10]  }
 0x4a2   : > { %p6099_p5 = scmp.ne.s32.totalorder %s8513_s28, %s6098_s26  ;;  %s6102_s27 = sshll.u32 %s6184_s8, 4  ;;  %s6103_s27 = int_to_ptr.vmem [resolvable:$false] %s6102_s27 }
 0x4a3   : > { %s6104_s22 = scalar_lea.vmem %s6103_s27, 16384  ;;  %p6105_p0 = scmp.lt.s32.totalorder %s8513_s28, %s6103_s27 }
 0x4a4   : > { %p6100_p11 = pnand %p6099_p5, %p4484_p6  ;;  %p6106_p12 = scmp.lt.s32.totalorder %s6104_s22, %s6098_s26 }
 0x4a6   : > { %p6101_p13 = pneg %p6100_p11  ;;  %p6107_p7 = por %p6106_p12, %p6105_p0 }
 0x4a8   : > { %p6108_p2 = pnand %p6107_p7, %p6101_p13 }
 0x4aa   : > { %6111 = shalt.err (!%p6108_p2)
}
 0x4ab   : > { %s6112_s11 = scalar_lea.hbm %s8510_s25, %s8500_s14  ;;  %s6116_s7 = scalar_lea.hbm %s8564_s5, 12800 }
 0x4ac   : > { %p6113_p8 = scmp.ne.s32.totalorder %s8510_s25, %s6112_s11  ;;  %p6117_p1 = scmp.lt.u32.totalorder %s8510_s25, %s8564_s5 }
 0x4ad   : > { %p6118_p3 = scmp.lt.u32.totalorder %s6116_s7, %s6112_s11  ;;  %p6120_p11 = scmp.lt.u32.totalorder %s6112_s11, %s8510_s25 }
 0x4ae   : > { %p6114_p9 = pnand %p6113_p8, %p4484_p6 }
 0x4af   : > { %p6119_p5 = por %p6118_p3, %p6117_p1 }
 0x4b0   : > { %p6115_p10 = pneg %p6114_p9 }
 0x4b1   : > { %p6121_p13 = por %p6120_p11, %p6119_p5 }
 0x4b3   : > { %p6122_p0 = pnand %p6121_p13, %p6115_p10 }
 0x4b5   : > { %6125 = shalt.err (!%p6122_p0)
}
 0x4b6   : > { %s6185_s9 = smov 256   ;;  %s6186_s15 = smov 16  }
 0x4b7   : > { %4363 = dma.vmem_to_hbm [thread:$0]  (%p4484_p6), %s8513_s28, %s8500_s14, %s8510_s25, %s4336_s17, %s6185_s9, %s6185_s9, %s6186_s15  }
 0x4b8 PF: > { %s4372_s30 = sand.u32 1, %s6160_s18   ;;  %p8635_p12 = scmp.ne.s32.totalorder %s8591_s6, 0 }
 0x4b9   : > { %s4373_s16 = scalar_lea.sflag [#allocation4], %s4372_s30 }
 0x4ba   : > { %p5290_p7 = pnand %p4464_p4, %p8635_p12 }
 0x4bc   : > { %6155 = dma.done.wait (!%p5290_p7), %s4373_s16, 8192  }
 0x4bd   : > { %6157 = vsyncadd (!%p5290_p7), %s4373_s16, 4294959104  ;;  %s8636_s21 = sld [smem:[#allocation15_spill]]  ;;  %s8637_s13 = sld [smem:[#allocation16_spill]] }
 0x4be   : > { %s8638_s18 = smov %s6164_s19  ;;  %s8639_s19 = smov %s6168_s20 }
 0x4c3   : > { %p20_p2 = scmp.ge.s32.totalorder %s8636_s21, 4   ;;  %s8640_s20 = smov %s8637_s13 }
 0x4c5   :  { %22 = sbr.rel (!%p20_p2) target bundleno = 7 (0x7), region = 97 }
 0x4cc   :  { %4378 = vsyncpa [#allocation3], 1 }
 0x4cd   :  { %4380 = vsyncpa [#allocation3 + $0x1], 1 }
 0x4ce   :  { %4381 = vsyncpa [#allocation6], 1 }
 0x4cf   :  { %4382 = vsyncpa [#allocation9], 1 }
 0x4d0   :  { %4383 = vsyncpa [#allocation4], 1 }
 0x4d1   :  { %4385 = vsyncpa [#allocation4 + $0x1], 1 }

</bundles_post_ra>
